<compile_context>
chip_gen: v6e
topology: v6e:2x2x1
jax: 0.10.0
libtpu: 0.0.40
codegen_flags: <defaults>
</compile_context>

<pallas_src>
import numpy as np

import jax
import jax.numpy as jnp
from jax.experimental import pallas as pl
from jax.experimental.pallas import tpu as pltpu

BN_EPS = 1e-5
LRELU_SLOPE = 0.01
N_ENC = 4
N_DEC = 4


# ----------------------------------------------------------------------------
# Fused Pallas kernel
# ----------------------------------------------------------------------------
def _conv_bn_lrelu_block(x_f32, r_ref, m_ref, qgb_ref):
    """One (transposed-)conv + BatchNorm(batch stats) + LeakyReLU block.

    x_f32   : (B*H, W*Cin)          f32 activation (rows = (b,h), cols = (w,c))
    r_ref   : (k, B*OH, B*H)        bf16 0/1 row gather/scatter, one slice per kernel-row tap
    m_ref   : (k, W*Cin, OW*Cout)   bf16 kernel-column-tap + weight embedding matrices
    qgb_ref : (OW*Cout + 2, OW*Cout) f32 [Q averaging matrix (incl. 1/(B*OH*OW)) ;
                                          gamma row ; beta row]
    Conv bias is intentionally omitted: with batch-statistics BN it cancels exactly.
    """
    k = r_ref.shape[0]
    n = qgb_ref.shape[1]
    xb = x_f32.astype(jnp.bfloat16)
    acc = None
    for i in range(k):
        # Row gather/scatter (exact 0/1 matrix), then weight contraction; f32 accumulate.
        z = jnp.dot(r_ref[i], xb, preferred_element_type=jnp.float32)
        t = jnp.dot(z.astype(jnp.bfloat16), m_ref[i], preferred_element_type=jnp.float32)
        acc = t if acc is None else acc + t
    y = acc                                                # pre-BN activation (bias dropped)

    # BatchNorm over (B, OH, OW) per channel, batch statistics (training-mode forward).
    colsum = jnp.sum(y, axis=0, keepdims=True)             # (1, OW*Cout)
    colsq = jnp.sum(y * y, axis=0, keepdims=True)
    q = qgb_ref[0:n, :]                                    # per-channel averaging matrix
    mean = jnp.dot(colsum, q, preferred_element_type=jnp.float32)
    ex2 = jnp.dot(colsq, q, preferred_element_type=jnp.float32)
    var = jnp.maximum(ex2 - mean * mean, 0.0)              # clamp: no rsqrt(neg) from cancellation
    gb = qgb_ref[n:n + 2, :]                               # (2, n): [gamma ; beta] tiled per column
    scale = gb[0:1, :] * jax.lax.rsqrt(var + BN_EPS)       # gamma / sqrt(var+eps)   (1, n)
    shift = gb[1:2, :] - mean * scale                      # beta - mean*scale       (1, n)
    out = y * scale + shift                                # 2 full-tile VPU ops
    return jnp.maximum(out, LRELU_SLOPE * out)             # LeakyReLU(0.01), exact


def _fused_autoencoder_kernel(*refs):
    *in_refs, latent_ref, dec_ref = refs
    it = iter(in_refs)

    x = next(it)[...]                                      # (B*32, 32) f32 image

    # ---- Encoder: 4 x (Conv2d k3 s2 p1 + BN + LeakyReLU): 32->16->8->4->2 ----
    for _ in range(N_ENC):
        r_ref, m_ref, qgb_ref = next(it), next(it), next(it)
        x = _conv_bn_lrelu_block(x, r_ref, m_ref, qgb_ref)

    # ---- Encoder FC (NCHW flatten folded into G) + tanh ----
    sel_ref, g_ref, bfc_ref = next(it), next(it), next(it)
    xb = x.astype(jnp.bfloat16)
    lat = None
    for h in range(2):
        t = jnp.dot(sel_ref[h], xb, preferred_element_type=jnp.float32)       # (B, 2*16)
        t = jnp.dot(t.astype(jnp.bfloat16), g_ref[h], preferred_element_type=jnp.float32)
        lat = t if lat is None else lat + t
    lat = jnp.tanh(lat + bfc_ref[...])
    latent_ref[...] = lat

    # ---- Decoder FC + ReLU + unflatten back to (B*2, 2*16) layout ----
    wd_ref, bd_ref, e_ref, u_ref = next(it), next(it), next(it), next(it)
    hv = jnp.dot(lat.astype(jnp.bfloat16), wd_ref[...],
                 preferred_element_type=jnp.float32) + bd_ref[...]
    hv = jnp.maximum(hv, 0.0)
    hb = hv.astype(jnp.bfloat16)
    x = None
    for h in range(2):
        t = jnp.dot(hb, e_ref[h], preferred_element_type=jnp.float32)         # (B, 2*16)
        t = jnp.dot(u_ref[h], t.astype(jnp.bfloat16), preferred_element_type=jnp.float32)
        x = t if x is None else x + t

    # ---- Decoder: 4 x (ConvTranspose2d k3 s2 p1 op1 + BN + LeakyReLU): 2->4->8->16->32 ----
    for _ in range(N_DEC):
        r_ref, m_ref, qgb_ref = next(it), next(it), next(it)
        x = _conv_bn_lrelu_block(x, r_ref, m_ref, qgb_ref)

    # ---- Final Conv2d(8->1, k5, s1, p0) + Sigmoid: 32 -> 28 ----
    rf_ref, mf_ref, bf_ref = next(it), next(it), next(it)
    xb = x.astype(jnp.bfloat16)
    acc = None
    for i in range(rf_ref.shape[0]):
        z = jnp.dot(rf_ref[i], xb, preferred_element_type=jnp.float32)
        t = jnp.dot(z.astype(jnp.bfloat16), mf_ref[i], preferred_element_type=jnp.float32)
        acc = t if acc is None else acc + t
    y = acc + bf_ref[...]
    out = pl.reciprocal(1.0 + jnp.exp(-y), approx=True)    # sigmoid; exp+recip ride the EUP
    dec_ref[...] = jnp.clip(out, 0.0, 1.0)                 # keep strictly inside [0,1]


# ----------------------------------------------------------------------------
# One-time parameter packing (all layout work hoisted out of the hot path)
# ----------------------------------------------------------------------------
def _tap_gather(L, OL, stride, pad, k):
    """T[i, o, l] = 1  iff  l == stride*o - pad + i  (conv input gather, implicit zero-pad)."""
    T = np.zeros((k, OL, L), np.float32)
    for i in range(k):
        for o in range(OL):
            l = stride * o - pad + i
            if 0 <= l < L:
                T[i, o, l] = 1.0
    return T


def _tap_scatter(L, OL, stride, pad, k):
    """T[i, o, l] = 1  iff  o == stride*l - pad + i  (transposed-conv output scatter)."""
    T = np.zeros((k, OL, L), np.float32)
    for i in range(k):
        for l in range(L):
            o = stride * l - pad + i
            if 0 <= o < OL:
                T[i, o, l] = 1.0
    return T


def _bn_qgb(gamma, beta, B, OH, OW, Cout):
    """Pack [Q ; gamma_row ; beta_row] into one (n+2, n) f32 operand (n = OW*Cout)."""
    n = OW * Cout
    q = np.kron(np.ones((OW, OW), np.float32), np.eye(Cout, dtype=np.float32))
    q /= float(B * OH * OW)
    gb = jnp.stack([jnp.tile(gamma, OW), jnp.tile(beta, OW)]).astype(jnp.float32)  # (2, n)
    return jnp.concatenate([jnp.asarray(q, jnp.float32), gb], axis=0)              # (n+2, n)


def _prep_conv_layer(w4, bias, gamma, beta, B, H, W, stride, pad, with_bn):
    """Conv2d -> [R (k,B*OH,B*H), M (k,W*Cin,OW*Cout), qgb | bias_cols]."""
    Cout, Cin, kh, kw = w4.shape
    OH = (H + 2 * pad - kh) // stride + 1
    OW = (W + 2 * pad - kw) // stride + 1
    rt = _tap_gather(H, OH, stride, pad, kh)                         # (kh, OH, H)
    r = np.stack([np.kron(np.eye(B, dtype=np.float32), rt[i]) for i in range(kh)])
    pc = _tap_gather(W, OW, stride, pad, kw).transpose(0, 2, 1)      # (kw, W, OW)
    m = jnp.einsum("jwq,ocij->iwcqo", jnp.asarray(pc), w4.astype(jnp.float32))
    m = m.reshape(kh, W * Cin, OW * Cout)
    arrs = [jnp.asarray(r, jnp.bfloat16), m.astype(jnp.bfloat16)]
    if with_bn:
        # Conv bias omitted on purpose: batch-stat BN cancels a per-channel constant shift.
        arrs.append(_bn_qgb(gamma, beta, B, OH, OW, Cout))
    else:
        arrs.append(jnp.tile(bias, OW).reshape(1, OW * Cout).astype(jnp.float32))
    return arrs, (OH, OW, Cout)


def _prep_convT_layer(wt4, gamma, beta, B, H, W, stride, pad, outpad):
    """ConvTranspose2d -> [S, N, qgb] in sub-pixel form (no zero-dilated input)."""
    Cin, Cout, kh, kw = wt4.shape
    OH = (H - 1) * stride - 2 * pad + kh + outpad
    OW = (W - 1) * stride - 2 * pad + kw + outpad
    st = _tap_scatter(H, OH, stride, pad, kh)                        # (kh, OH, H)
    s = np.stack([np.kron(np.eye(B, dtype=np.float32), st[i]) for i in range(kh)])
    pc = _tap_scatter(W, OW, stride, pad, kw).transpose(0, 2, 1)     # (kw, W, OW)
    n = jnp.einsum("jwq,coij->iwcqo", jnp.asarray(pc), wt4.astype(jnp.float32))
    n = n.reshape(kh, W * Cin, OW * Cout)
    return [jnp.asarray(s, jnp.bfloat16), n.astype(jnp.bfloat16),
            _bn_qgb(gamma, beta, B, OH, OW, Cout)], (OH, OW, Cout)


def prepare_fused_params(params, batch):
    """Pack all weights into the flat list of matrices the fused kernel consumes."""
    B = batch
    flat = []

    # ---- Encoder convs: 32 -> 16 -> 8 -> 4 -> 2
    H = W = 32
    for blk in params["enc_convs"]:
        arrs, (H, W, _) = _prep_conv_layer(blk["w"], blk["b"], blk["g"], blk["beta"],
                                           B, H, W, stride=2, pad=1, with_bn=True)
        flat += arrs

    # ---- Encoder FC: NCHW flatten (k = c*4 + h*2 + w) folded into G_h; tanh in kernel.
    latent_w = params["enc_fc_w"]                                   # (latent, 64)
    latent_dim = latent_w.shape[0]
    idx = [np.array([c * 4 + h * 2 + w for w in range(2) for c in range(16)], np.int32)
           for h in range(2)]
    sel = np.stack([np.kron(np.eye(B, dtype=np.float32), np.eye(2, dtype=np.float32)[[h], :])
                    for h in range(2)])                             # (2, B, 2B)
    g = jnp.stack([latent_w[:, idx[h]].T for h in range(2)])        # (2, 32, latent)
    flat += [jnp.asarray(sel, jnp.bfloat16), g.astype(jnp.bfloat16),
             params["enc_fc_b"].reshape(1, latent_dim).astype(jnp.float32)]

    # ---- Decoder FC + unflatten back to (B*2, 2*16) layout.
    wdT = params["dec_fc_w"].T                                      # (latent, 64)
    e = np.stack([np.eye(16 * 2 * 2, dtype=np.float32)[idx[h]].T for h in range(2)])  # (2,64,32)
    u = np.stack([np.kron(np.eye(B, dtype=np.float32), np.eye(2, dtype=np.float32)[:, [h]])
                  for h in range(2)])                               # (2, 2B, B)
    flat += [wdT.astype(jnp.bfloat16),
             params["dec_fc_b"].reshape(1, -1).astype(jnp.float32),
             jnp.asarray(e, jnp.bfloat16), jnp.asarray(u, jnp.bfloat16)]

    # ---- Decoder convT: 2 -> 4 -> 8 -> 16 -> 32
    H = W = 2
    for blk in params["dec_convt"]:
        arrs, (H, W, _) = _prep_convT_layer(blk["w"], blk["g"], blk["beta"],
                                            B, H, W, stride=2, pad=1, outpad=1)
        flat += arrs

    # ---- Final Conv2d(8->1, k5, s1, p0) + Sigmoid: 32 -> 28
    arrs, _ = _prep_conv_layer(params["dec_final_w"], params["dec_final_b"], None, None,
                               B, H, W, stride=1, pad=0, with_bn=False)
    flat += arrs
    return flat


# ----------------------------------------------------------------------------
# Forward: one reshape + one pallas_call + one reshape
# ----------------------------------------------------------------------------
def fused_forward(flat_params, images_nchw):
    B, _, H, W = images_nchw.shape
    latent_dim = flat_params[3 * N_ENC + 2].shape[1]     # encoder-fc bias (1, latent)
    out_hw = flat_params[-1].shape[1]                    # final bias (1, 28*1)
    x2d = images_nchw.astype(jnp.float32).reshape(B * H, W)   # C == 1 -> (b*h, w)
    latent, dec2d = pl.pallas_call(
        _fused_autoencoder_kernel,
        out_shape=(jax.ShapeDtypeStruct((B, latent_dim), jnp.float32),
                   jax.ShapeDtypeStruct((B * out_hw, out_hw), jnp.float32)),
        # Whole problem (<~3 MiB of operands + activations) lives in VMEM; the
        # explicit budget also fits v7x's 64 MiB physical VMEM with headroom.
        compiler_params=pltpu.CompilerParams(vmem_limit_bytes=32 * 1024 * 1024),
    )(x2d, *flat_params)
    decoded = dec2d.reshape(B, 1, out_hw, out_hw)
    return decoded, latent


# ----------------------------------------------------------------------------
# Parameters (deterministic synthetic init matching the PyTorch module's shapes)
# ----------------------------------------------------------------------------
def init_params(key, latent_width=64):
    ks = iter(jax.random.split(key, 32))

    def w(shape, scale=0.1):
        return scale * jax.random.normal(next(ks), shape, dtype=jnp.float32)

    def bn(c):
        return {"g": jnp.ones((c,), jnp.float32), "beta": jnp.zeros((c,), jnp.float32)}

    params = {}
    enc_chans = [(1, 8), (8, 8), (8, 16), (16, 16)]
    params["enc_convs"] = [
        dict(w=w((co, ci, 3, 3)), b=w((co,), 0.05), **bn(co)) for ci, co in enc_chans
    ]
    params["enc_fc_w"] = w((latent_width, 16 * 2 * 2))
    params["enc_fc_b"] = w((latent_width,), 0.05)
    params["dec_fc_w"] = w((16 * 2 * 2, latent_width))
    params["dec_fc_b"] = w((16 * 2 * 2,), 0.05)
    dec_chans = [(16, 16), (16, 8), (8, 8), (8, 8)]
    params["dec_convt"] = [
        dict(w=w((ci, co, 3, 3)), b=w((co,), 0.05), **bn(co)) for ci, co in dec_chans
    ]
    params["dec_final_w"] = w((1, 8, 5, 5))
    params["dec_final_b"] = w((1,), 0.05)
    return params


if __name__ == "__main__":
    key = jax.random.PRNGKey(0)
    pkey, xkey = jax.random.split(key)
    params = init_params(pkey, latent_width=64)
    # Encoder flatten requires 2x2 after four stride-2 convs -> 32x32 input.
    images = jax.random.uniform(xkey, (2, 1, 32, 32), dtype=jnp.float32)

    flat = prepare_fused_params(params, batch=2)   # one-time packing (init time)
    fwd = jax.jit(fused_forward)
    decoded, latent = fwd(flat, images)
    jax.block_until_ready((decoded, latent))

    assert decoded.shape == (2, 1, 28, 28), decoded.shape
    assert latent.shape == (2, 64), latent.shape
    assert bool(jnp.all(jnp.isfinite(decoded))) and bool(jnp.all(jnp.isfinite(latent)))
    assert bool(jnp.all(decoded >= 0.0)) and bool(jnp.all(decoded <= 1.0))  # sigmoid
    assert bool(jnp.all(latent >= -1.0)) and bool(jnp.all(latent <= 1.0))   # tanh
    print("KERNEL_OK")
</pallas_src>

<mosaic_0001>
module attributes {stable_mosaic.version = 11 : i64} {
  func.func @_fused_autoencoder_kernel(%arg0: memref<64x32xf32, #tpu.memory_space<vmem>>, %arg1: memref<3x32x64xbf16, #tpu.memory_space<vmem>>, %arg2: memref<3x32x128xbf16, #tpu.memory_space<vmem>>, %arg3: memref<130x128xf32, #tpu.memory_space<vmem>>, %arg4: memref<3x16x32xbf16, #tpu.memory_space<vmem>>, %arg5: memref<3x128x64xbf16, #tpu.memory_space<vmem>>, %arg6: memref<66x64xf32, #tpu.memory_space<vmem>>, %arg7: memref<3x8x16xbf16, #tpu.memory_space<vmem>>, %arg8: memref<3x64x64xbf16, #tpu.memory_space<vmem>>, %arg9: memref<66x64xf32, #tpu.memory_space<vmem>>, %arg10: memref<3x4x8xbf16, #tpu.memory_space<vmem>>, %arg11: memref<3x64x32xbf16, #tpu.memory_space<vmem>>, %arg12: memref<34x32xf32, #tpu.memory_space<vmem>>, %arg13: memref<2x2x4xbf16, #tpu.memory_space<vmem>>, %arg14: memref<2x32x64xbf16, #tpu.memory_space<vmem>>, %arg15: memref<1x64xf32, #tpu.memory_space<vmem>>, %arg16: memref<64x64xbf16, #tpu.memory_space<vmem>>, %arg17: memref<1x64xf32, #tpu.memory_space<vmem>>, %arg18: memref<2x64x32xbf16, #tpu.memory_space<vmem>>, %arg19: memref<2x4x2xbf16, #tpu.memory_space<vmem>>, %arg20: memref<3x8x4xbf16, #tpu.memory_space<vmem>>, %arg21: memref<3x32x64xbf16, #tpu.memory_space<vmem>>, %arg22: memref<66x64xf32, #tpu.memory_space<vmem>>, %arg23: memref<3x16x8xbf16, #tpu.memory_space<vmem>>, %arg24: memref<3x64x64xbf16, #tpu.memory_space<vmem>>, %arg25: memref<66x64xf32, #tpu.memory_space<vmem>>, %arg26: memref<3x32x16xbf16, #tpu.memory_space<vmem>>, %arg27: memref<3x64x128xbf16, #tpu.memory_space<vmem>>, %arg28: memref<130x128xf32, #tpu.memory_space<vmem>>, %arg29: memref<3x64x32xbf16, #tpu.memory_space<vmem>>, %arg30: memref<3x128x256xbf16, #tpu.memory_space<vmem>>, %arg31: memref<258x256xf32, #tpu.memory_space<vmem>>, %arg32: memref<5x56x64xbf16, #tpu.memory_space<vmem>>, %arg33: memref<5x256x28xbf16, #tpu.memory_space<vmem>>, %arg34: memref<1x28xf32, #tpu.memory_space<vmem>>, %arg35: memref<2x64xf32, #tpu.memory_space<vmem>>, %arg36: memref<56x28xf32, #tpu.memory_space<vmem>>) attributes {dimension_semantics = [], scalar_prefetch = 0 : i64, scratch_operands = 0 : i64, tpu.core_type = #tpu.core_type<tc>} {
    %c0 = arith.constant 0 : index
    %c0_0 = arith.constant 0 : index
    %0 = vector.load %arg0[%c0, %c0_0] : memref<64x32xf32, #tpu.memory_space<vmem>>, vector<64x32xf32>
    %1 = arith.truncf %0 : vector<64x32xf32> to vector<64x32xbf16>
    %c0_1 = arith.constant 0 : index
    %c0_2 = arith.constant 0 : index
    %c0_3 = arith.constant 0 : index
    %2 = vector.load %arg1[%c0_1, %c0_2, %c0_3] : memref<3x32x64xbf16, #tpu.memory_space<vmem>>, vector<1x32x64xbf16>
    %3 = vector.shape_cast %2 : vector<1x32x64xbf16> to vector<32x64xbf16>
    %cst = arith.constant dense<0.000000e+00> : vector<32x32xf32>
    %4 = tpu.matmul %3, %1, %cst {dimension_numbers = #tpu.dot_dimension_numbers<[1], [0], [0], [1], [0, 0, 1, 1], [], []>} : vector<32x64xbf16>, vector<64x32xbf16>, vector<32x32xf32> -> vector<32x32xf32>
    %5 = arith.truncf %4 : vector<32x32xf32> to vector<32x32xbf16>
    %c0_4 = arith.constant 0 : index
    %c0_5 = arith.constant 0 : index
    %c0_6 = arith.constant 0 : index
    %6 = vector.load %arg2[%c0_4, %c0_5, %c0_6] : memref<3x32x128xbf16, #tpu.memory_space<vmem>>, vector<1x32x128xbf16>
    %7 = vector.shape_cast %6 : vector<1x32x128xbf16> to vector<32x128xbf16>
    %cst_7 = arith.constant dense<0.000000e+00> : vector<32x128xf32>
    %8 = tpu.matmul %5, %7, %cst_7 {dimension_numbers = #tpu.dot_dimension_numbers<[1], [0], [0], [1], [0, 0, 1, 1], [], []>} : vector<32x32xbf16>, vector<32x128xbf16>, vector<32x128xf32> -> vector<32x128xf32>
    %c1 = arith.constant 1 : index
    %c0_8 = arith.constant 0 : index
    %c0_9 = arith.constant 0 : index
    %9 = vector.load %arg1[%c1, %c0_8, %c0_9] : memref<3x32x64xbf16, #tpu.memory_space<vmem>>, vector<1x32x64xbf16>
    %10 = vector.shape_cast %9 : vector<1x32x64xbf16> to vector<32x64xbf16>
    %cst_10 = arith.constant dense<0.000000e+00> : vector<32x32xf32>
    %11 = tpu.matmul %10, %1, %cst_10 {dimension_numbers = #tpu.dot_dimension_numbers<[1], [0], [0], [1], [0, 0, 1, 1], [], []>} : vector<32x64xbf16>, vector<64x32xbf16>, vector<32x32xf32> -> vector<32x32xf32>
    %12 = arith.truncf %11 : vector<32x32xf32> to vector<32x32xbf16>
    %c1_11 = arith.constant 1 : index
    %c0_12 = arith.constant 0 : index
    %c0_13 = arith.constant 0 : index
    %13 = vector.load %arg2[%c1_11, %c0_12, %c0_13] : memref<3x32x128xbf16, #tpu.memory_space<vmem>>, vector<1x32x128xbf16>
    %14 = vector.shape_cast %13 : vector<1x32x128xbf16> to vector<32x128xbf16>
    %cst_14 = arith.constant dense<0.000000e+00> : vector<32x128xf32>
    %15 = tpu.matmul %12, %14, %cst_14 {dimension_numbers = #tpu.dot_dimension_numbers<[1], [0], [0], [1], [0, 0, 1, 1], [], []>} : vector<32x32xbf16>, vector<32x128xbf16>, vector<32x128xf32> -> vector<32x128xf32>
    %16 = arith.addf %8, %15 : vector<32x128xf32>
    %c2 = arith.constant 2 : index
    %c0_15 = arith.constant 0 : index
    %c0_16 = arith.constant 0 : index
    %17 = vector.load %arg1[%c2, %c0_15, %c0_16] : memref<3x32x64xbf16, #tpu.memory_space<vmem>>, vector<1x32x64xbf16>
    %18 = vector.shape_cast %17 : vector<1x32x64xbf16> to vector<32x64xbf16>
    %cst_17 = arith.constant dense<0.000000e+00> : vector<32x32xf32>
    %19 = tpu.matmul %18, %1, %cst_17 {dimension_numbers = #tpu.dot_dimension_numbers<[1], [0], [0], [1], [0, 0, 1, 1], [], []>} : vector<32x64xbf16>, vector<64x32xbf16>, vector<32x32xf32> -> vector<32x32xf32>
    %20 = arith.truncf %19 : vector<32x32xf32> to vector<32x32xbf16>
    %c2_18 = arith.constant 2 : index
    %c0_19 = arith.constant 0 : index
    %c0_20 = arith.constant 0 : index
    %21 = vector.load %arg2[%c2_18, %c0_19, %c0_20] : memref<3x32x128xbf16, #tpu.memory_space<vmem>>, vector<1x32x128xbf16>
    %22 = vector.shape_cast %21 : vector<1x32x128xbf16> to vector<32x128xbf16>
    %cst_21 = arith.constant dense<0.000000e+00> : vector<32x128xf32>
    %23 = tpu.matmul %20, %22, %cst_21 {dimension_numbers = #tpu.dot_dimension_numbers<[1], [0], [0], [1], [0, 0, 1, 1], [], []>} : vector<32x32xbf16>, vector<32x128xbf16>, vector<32x128xf32> -> vector<32x128xf32>
    %24 = arith.addf %16, %23 : vector<32x128xf32>
    %cst_22 = arith.constant dense<0.000000e+00> : vector<128xf32>
    %25 = vector.multi_reduction <add>, %24, %cst_22 [0] : vector<32x128xf32> to vector<128xf32>
    %26 = vector.shape_cast %25 : vector<128xf32> to vector<1x128xf32>
    %27 = arith.mulf %24, %24 : vector<32x128xf32>
    %cst_23 = arith.constant dense<0.000000e+00> : vector<128xf32>
    %28 = vector.multi_reduction <add>, %27, %cst_23 [0] : vector<32x128xf32> to vector<128xf32>
    %29 = vector.shape_cast %28 : vector<128xf32> to vector<1x128xf32>
    %c0_24 = arith.constant 0 : index
    %c0_25 = arith.constant 0 : index
    %30 = vector.load %arg3[%c0_24, %c0_25] : memref<130x128xf32, #tpu.memory_space<vmem>>, vector<128x128xf32>
    %cst_26 = arith.constant dense<0.000000e+00> : vector<1x128xf32>
    %31 = tpu.matmul %26, %30, %cst_26 {dimension_numbers = #tpu.dot_dimension_numbers<[1], [0], [0], [1], [0, 0, 1, 1], [], []>} : vector<1x128xf32>, vector<128x128xf32>, vector<1x128xf32> -> vector<1x128xf32>
    %cst_27 = arith.constant dense<0.000000e+00> : vector<1x128xf32>
    %32 = tpu.matmul %29, %30, %cst_27 {dimension_numbers = #tpu.dot_dimension_numbers<[1], [0], [0], [1], [0, 0, 1, 1], [], []>} : vector<1x128xf32>, vector<128x128xf32>, vector<1x128xf32> -> vector<1x128xf32>
    %33 = arith.mulf %31, %31 : vector<1x128xf32>
    %34 = arith.subf %32, %33 : vector<1x128xf32>
    %cst_28 = arith.constant 0.000000e+00 : f32
    %35 = vector.broadcast %cst_28 : f32 to vector<1x128xf32>
    %36 = arith.maximumf %34, %35 : vector<1x128xf32>
    %c128 = arith.constant 128 : index
    %c0_29 = arith.constant 0 : index
    %37 = vector.load %arg3[%c128, %c0_29] : memref<130x128xf32, #tpu.memory_space<vmem>>, vector<2x128xf32>
    %38 = vector.extract_strided_slice %37 {offsets = [0, 0], sizes = [1, 128], strides = [1, 1]} : vector<2x128xf32> to vector<1x128xf32>
    %cst_30 = arith.constant 9.99999974E-6 : f32
    %39 = vector.broadcast %cst_30 : f32 to vector<1x128xf32>
    %40 = arith.addf %36, %39 : vector<1x128xf32>
    %41 = math.rsqrt %40 : vector<1x128xf32>
    %42 = arith.mulf %38, %41 : vector<1x128xf32>
    %43 = vector.extract_strided_slice %37 {offsets = [1, 0], sizes = [1, 128], strides = [1, 1]} : vector<2x128xf32> to vector<1x128xf32>
    %44 = arith.mulf %31, %42 : vector<1x128xf32>
    %45 = arith.subf %43, %44 : vector<1x128xf32>
    %46 = vector.broadcast %42 : vector<1x128xf32> to vector<32x128xf32>
    %47 = arith.mulf %24, %46 : vector<32x128xf32>
    %48 = vector.broadcast %45 : vector<1x128xf32> to vector<32x128xf32>
    %49 = arith.addf %47, %48 : vector<32x128xf32>
    %cst_31 = arith.constant 0.00999999977 : f32
    %50 = vector.broadcast %cst_31 : f32 to vector<32x128xf32>
    %51 = arith.mulf %50, %49 : vector<32x128xf32>
    %52 = arith.maximumf %49, %51 : vector<32x128xf32>
    %53 = arith.truncf %52 : vector<32x128xf32> to vector<32x128xbf16>
    %c0_32 = arith.constant 0 : index
    %c0_33 = arith.constant 0 : index
    %c0_34 = arith.constant 0 : index
    %54 = vector.load %arg4[%c0_32, %c0_33, %c0_34] : memref<3x16x32xbf16, #tpu.memory_space<vmem>>, vector<1x16x32xbf16>
    %55 = vector.shape_cast %54 : vector<1x16x32xbf16> to vector<16x32xbf16>
    %cst_35 = arith.constant dense<0.000000e+00> : vector<16x128xf32>
    %56 = tpu.matmul %55, %53, %cst_35 {dimension_numbers = #tpu.dot_dimension_numbers<[1], [0], [0], [1], [0, 0, 1, 1], [], []>} : vector<16x32xbf16>, vector<32x128xbf16>, vector<16x128xf32> -> vector<16x128xf32>
    %57 = arith.truncf %56 : vector<16x128xf32> to vector<16x128xbf16>
    %c0_36 = arith.constant 0 : index
    %c0_37 = arith.constant 0 : index
    %c0_38 = arith.constant 0 : index
    %58 = vector.load %arg5[%c0_36, %c0_37, %c0_38] : memref<3x128x64xbf16, #tpu.memory_space<vmem>>, vector<1x128x64xbf16>
    %59 = vector.shape_cast %58 : vector<1x128x64xbf16> to vector<128x64xbf16>
    %cst_39 = arith.constant dense<0.000000e+00> : vector<16x64xf32>
    %60 = tpu.matmul %57, %59, %cst_39 {dimension_numbers = #tpu.dot_dimension_numbers<[1], [0], [0], [1], [0, 0, 1, 1], [], []>} : vector<16x128xbf16>, vector<128x64xbf16>, vector<16x64xf32> -> vector<16x64xf32>
    %c1_40 = arith.constant 1 : index
    %c0_41 = arith.constant 0 : index
    %c0_42 = arith.constant 0 : index
    %61 = vector.load %arg4[%c1_40, %c0_41, %c0_42] : memref<3x16x32xbf16, #tpu.memory_space<vmem>>, vector<1x16x32xbf16>
    %62 = vector.shape_cast %61 : vector<1x16x32xbf16> to vector<16x32xbf16>
    %cst_43 = arith.constant dense<0.000000e+00> : vector<16x128xf32>
    %63 = tpu.matmul %62, %53, %cst_43 {dimension_numbers = #tpu.dot_dimension_numbers<[1], [0], [0], [1], [0, 0, 1, 1], [], []>} : vector<16x32xbf16>, vector<32x128xbf16>, vector<16x128xf32> -> vector<16x128xf32>
    %64 = arith.truncf %63 : vector<16x128xf32> to vector<16x128xbf16>
    %c1_44 = arith.constant 1 : index
    %c0_45 = arith.constant 0 : index
    %c0_46 = arith.constant 0 : index
    %65 = vector.load %arg5[%c1_44, %c0_45, %c0_46] : memref<3x128x64xbf16, #tpu.memory_space<vmem>>, vector<1x128x64xbf16>
    %66 = vector.shape_cast %65 : vector<1x128x64xbf16> to vector<128x64xbf16>
    %cst_47 = arith.constant dense<0.000000e+00> : vector<16x64xf32>
    %67 = tpu.matmul %64, %66, %cst_47 {dimension_numbers = #tpu.dot_dimension_numbers<[1], [0], [0], [1], [0, 0, 1, 1], [], []>} : vector<16x128xbf16>, vector<128x64xbf16>, vector<16x64xf32> -> vector<16x64xf32>
    %68 = arith.addf %60, %67 : vector<16x64xf32>
    %c2_48 = arith.constant 2 : index
    %c0_49 = arith.constant 0 : index
    %c0_50 = arith.constant 0 : index
    %69 = vector.load %arg4[%c2_48, %c0_49, %c0_50] : memref<3x16x32xbf16, #tpu.memory_space<vmem>>, vector<1x16x32xbf16>
    %70 = vector.shape_cast %69 : vector<1x16x32xbf16> to vector<16x32xbf16>
    %cst_51 = arith.constant dense<0.000000e+00> : vector<16x128xf32>
    %71 = tpu.matmul %70, %53, %cst_51 {dimension_numbers = #tpu.dot_dimension_numbers<[1], [0], [0], [1], [0, 0, 1, 1], [], []>} : vector<16x32xbf16>, vector<32x128xbf16>, vector<16x128xf32> -> vector<16x128xf32>
    %72 = arith.truncf %71 : vector<16x128xf32> to vector<16x128xbf16>
    %c2_52 = arith.constant 2 : index
    %c0_53 = arith.constant 0 : index
    %c0_54 = arith.constant 0 : index
    %73 = vector.load %arg5[%c2_52, %c0_53, %c0_54] : memref<3x128x64xbf16, #tpu.memory_space<vmem>>, vector<1x128x64xbf16>
    %74 = vector.shape_cast %73 : vector<1x128x64xbf16> to vector<128x64xbf16>
    %cst_55 = arith.constant dense<0.000000e+00> : vector<16x64xf32>
    %75 = tpu.matmul %72, %74, %cst_55 {dimension_numbers = #tpu.dot_dimension_numbers<[1], [0], [0], [1], [0, 0, 1, 1], [], []>} : vector<16x128xbf16>, vector<128x64xbf16>, vector<16x64xf32> -> vector<16x64xf32>
    %76 = arith.addf %68, %75 : vector<16x64xf32>
    %cst_56 = arith.constant dense<0.000000e+00> : vector<64xf32>
    %77 = vector.multi_reduction <add>, %76, %cst_56 [0] : vector<16x64xf32> to vector<64xf32>
    %78 = vector.shape_cast %77 : vector<64xf32> to vector<1x64xf32>
    %79 = arith.mulf %76, %76 : vector<16x64xf32>
    %cst_57 = arith.constant dense<0.000000e+00> : vector<64xf32>
    %80 = vector.multi_reduction <add>, %79, %cst_57 [0] : vector<16x64xf32> to vector<64xf32>
    %81 = vector.shape_cast %80 : vector<64xf32> to vector<1x64xf32>
    %c0_58 = arith.constant 0 : index
    %c0_59 = arith.constant 0 : index
    %82 = vector.load %arg6[%c0_58, %c0_59] : memref<66x64xf32, #tpu.memory_space<vmem>>, vector<64x64xf32>
    %cst_60 = arith.constant dense<0.000000e+00> : vector<1x64xf32>
    %83 = tpu.matmul %78, %82, %cst_60 {dimension_numbers = #tpu.dot_dimension_numbers<[1], [0], [0], [1], [0, 0, 1, 1], [], []>} : vector<1x64xf32>, vector<64x64xf32>, vector<1x64xf32> -> vector<1x64xf32>
    %cst_61 = arith.constant dense<0.000000e+00> : vector<1x64xf32>
    %84 = tpu.matmul %81, %82, %cst_61 {dimension_numbers = #tpu.dot_dimension_numbers<[1], [0], [0], [1], [0, 0, 1, 1], [], []>} : vector<1x64xf32>, vector<64x64xf32>, vector<1x64xf32> -> vector<1x64xf32>
    %85 = arith.mulf %83, %83 : vector<1x64xf32>
    %86 = arith.subf %84, %85 : vector<1x64xf32>
    %cst_62 = arith.constant 0.000000e+00 : f32
    %87 = vector.broadcast %cst_62 : f32 to vector<1x64xf32>
    %88 = arith.maximumf %86, %87 : vector<1x64xf32>
    %c64 = arith.constant 64 : index
    %c0_63 = arith.constant 0 : index
    %89 = vector.load %arg6[%c64, %c0_63] : memref<66x64xf32, #tpu.memory_space<vmem>>, vector<2x64xf32>
    %90 = vector.extract_strided_slice %89 {offsets = [0, 0], sizes = [1, 64], strides = [1, 1]} : vector<2x64xf32> to vector<1x64xf32>
    %cst_64 = arith.constant 9.99999974E-6 : f32
    %91 = vector.broadcast %cst_64 : f32 to vector<1x64xf32>
    %92 = arith.addf %88, %91 : vector<1x64xf32>
    %93 = math.rsqrt %92 : vector<1x64xf32>
    %94 = arith.mulf %90, %93 : vector<1x64xf32>
    %95 = vector.extract_strided_slice %89 {offsets = [1, 0], sizes = [1, 64], strides = [1, 1]} : vector<2x64xf32> to vector<1x64xf32>
    %96 = arith.mulf %83, %94 : vector<1x64xf32>
    %97 = arith.subf %95, %96 : vector<1x64xf32>
    %98 = vector.broadcast %94 : vector<1x64xf32> to vector<16x64xf32>
    %99 = arith.mulf %76, %98 : vector<16x64xf32>
    %100 = vector.broadcast %97 : vector<1x64xf32> to vector<16x64xf32>
    %101 = arith.addf %99, %100 : vector<16x64xf32>
    %cst_65 = arith.constant 0.00999999977 : f32
    %102 = vector.broadcast %cst_65 : f32 to vector<16x64xf32>
    %103 = arith.mulf %102, %101 : vector<16x64xf32>
    %104 = arith.maximumf %101, %103 : vector<16x64xf32>
    %105 = arith.truncf %104 : vector<16x64xf32> to vector<16x64xbf16>
    %c0_66 = arith.constant 0 : index
    %c0_67 = arith.constant 0 : index
    %c0_68 = arith.constant 0 : index
    %106 = vector.load %arg7[%c0_66, %c0_67, %c0_68] : memref<3x8x16xbf16, #tpu.memory_space<vmem>>, vector<1x8x16xbf16>
    %107 = vector.shape_cast %106 : vector<1x8x16xbf16> to vector<8x16xbf16>
    %cst_69 = arith.constant dense<0.000000e+00> : vector<8x64xf32>
    %108 = tpu.matmul %107, %105, %cst_69 {dimension_numbers = #tpu.dot_dimension_numbers<[1], [0], [0], [1], [0, 0, 1, 1], [], []>} : vector<8x16xbf16>, vector<16x64xbf16>, vector<8x64xf32> -> vector<8x64xf32>
    %109 = arith.truncf %108 : vector<8x64xf32> to vector<8x64xbf16>
    %c0_70 = arith.constant 0 : index
    %c0_71 = arith.constant 0 : index
    %c0_72 = arith.constant 0 : index
    %110 = vector.load %arg8[%c0_70, %c0_71, %c0_72] : memref<3x64x64xbf16, #tpu.memory_space<vmem>>, vector<1x64x64xbf16>
    %111 = vector.shape_cast %110 : vector<1x64x64xbf16> to vector<64x64xbf16>
    %cst_73 = arith.constant dense<0.000000e+00> : vector<8x64xf32>
    %112 = tpu.matmul %109, %111, %cst_73 {dimension_numbers = #tpu.dot_dimension_numbers<[1], [0], [0], [1], [0, 0, 1, 1], [], []>} : vector<8x64xbf16>, vector<64x64xbf16>, vector<8x64xf32> -> vector<8x64xf32>
    %c1_74 = arith.constant 1 : index
    %c0_75 = arith.constant 0 : index
    %c0_76 = arith.constant 0 : index
    %113 = vector.load %arg7[%c1_74, %c0_75, %c0_76] : memref<3x8x16xbf16, #tpu.memory_space<vmem>>, vector<1x8x16xbf16>
    %114 = vector.shape_cast %113 : vector<1x8x16xbf16> to vector<8x16xbf16>
    %cst_77 = arith.constant dense<0.000000e+00> : vector<8x64xf32>
    %115 = tpu.matmul %114, %105, %cst_77 {dimension_numbers = #tpu.dot_dimension_numbers<[1], [0], [0], [1], [0, 0, 1, 1], [], []>} : vector<8x16xbf16>, vector<16x64xbf16>, vector<8x64xf32> -> vector<8x64xf32>
    %116 = arith.truncf %115 : vector<8x64xf32> to vector<8x64xbf16>
    %c1_78 = arith.constant 1 : index
    %c0_79 = arith.constant 0 : index
    %c0_80 = arith.constant 0 : index
    %117 = vector.load %arg8[%c1_78, %c0_79, %c0_80] : memref<3x64x64xbf16, #tpu.memory_space<vmem>>, vector<1x64x64xbf16>
    %118 = vector.shape_cast %117 : vector<1x64x64xbf16> to vector<64x64xbf16>
    %cst_81 = arith.constant dense<0.000000e+00> : vector<8x64xf32>
    %119 = tpu.matmul %116, %118, %cst_81 {dimension_numbers = #tpu.dot_dimension_numbers<[1], [0], [0], [1], [0, 0, 1, 1], [], []>} : vector<8x64xbf16>, vector<64x64xbf16>, vector<8x64xf32> -> vector<8x64xf32>
    %120 = arith.addf %112, %119 : vector<8x64xf32>
    %c2_82 = arith.constant 2 : index
    %c0_83 = arith.constant 0 : index
    %c0_84 = arith.constant 0 : index
    %121 = vector.load %arg7[%c2_82, %c0_83, %c0_84] : memref<3x8x16xbf16, #tpu.memory_space<vmem>>, vector<1x8x16xbf16>
    %122 = vector.shape_cast %121 : vector<1x8x16xbf16> to vector<8x16xbf16>
    %cst_85 = arith.constant dense<0.000000e+00> : vector<8x64xf32>
    %123 = tpu.matmul %122, %105, %cst_85 {dimension_numbers = #tpu.dot_dimension_numbers<[1], [0], [0], [1], [0, 0, 1, 1], [], []>} : vector<8x16xbf16>, vector<16x64xbf16>, vector<8x64xf32> -> vector<8x64xf32>
    %124 = arith.truncf %123 : vector<8x64xf32> to vector<8x64xbf16>
    %c2_86 = arith.constant 2 : index
    %c0_87 = arith.constant 0 : index
    %c0_88 = arith.constant 0 : index
    %125 = vector.load %arg8[%c2_86, %c0_87, %c0_88] : memref<3x64x64xbf16, #tpu.memory_space<vmem>>, vector<1x64x64xbf16>
    %126 = vector.shape_cast %125 : vector<1x64x64xbf16> to vector<64x64xbf16>
    %cst_89 = arith.constant dense<0.000000e+00> : vector<8x64xf32>
    %127 = tpu.matmul %124, %126, %cst_89 {dimension_numbers = #tpu.dot_dimension_numbers<[1], [0], [0], [1], [0, 0, 1, 1], [], []>} : vector<8x64xbf16>, vector<64x64xbf16>, vector<8x64xf32> -> vector<8x64xf32>
    %128 = arith.addf %120, %127 : vector<8x64xf32>
    %cst_90 = arith.constant dense<0.000000e+00> : vector<64xf32>
    %129 = vector.multi_reduction <add>, %128, %cst_90 [0] : vector<8x64xf32> to vector<64xf32>
    %130 = vector.shape_cast %129 : vector<64xf32> to vector<1x64xf32>
    %131 = arith.mulf %128, %128 : vector<8x64xf32>
    %cst_91 = arith.constant dense<0.000000e+00> : vector<64xf32>
    %132 = vector.multi_reduction <add>, %131, %cst_91 [0] : vector<8x64xf32> to vector<64xf32>
    %133 = vector.shape_cast %132 : vector<64xf32> to vector<1x64xf32>
    %c0_92 = arith.constant 0 : index
    %c0_93 = arith.constant 0 : index
    %134 = vector.load %arg9[%c0_92, %c0_93] : memref<66x64xf32, #tpu.memory_space<vmem>>, vector<64x64xf32>
    %cst_94 = arith.constant dense<0.000000e+00> : vector<1x64xf32>
    %135 = tpu.matmul %130, %134, %cst_94 {dimension_numbers = #tpu.dot_dimension_numbers<[1], [0], [0], [1], [0, 0, 1, 1], [], []>} : vector<1x64xf32>, vector<64x64xf32>, vector<1x64xf32> -> vector<1x64xf32>
    %cst_95 = arith.constant dense<0.000000e+00> : vector<1x64xf32>
    %136 = tpu.matmul %133, %134, %cst_95 {dimension_numbers = #tpu.dot_dimension_numbers<[1], [0], [0], [1], [0, 0, 1, 1], [], []>} : vector<1x64xf32>, vector<64x64xf32>, vector<1x64xf32> -> vector<1x64xf32>
    %137 = arith.mulf %135, %135 : vector<1x64xf32>
    %138 = arith.subf %136, %137 : vector<1x64xf32>
    %cst_96 = arith.constant 0.000000e+00 : f32
    %139 = vector.broadcast %cst_96 : f32 to vector<1x64xf32>
    %140 = arith.maximumf %138, %139 : vector<1x64xf32>
    %c64_97 = arith.constant 64 : index
    %c0_98 = arith.constant 0 : index
    %141 = vector.load %arg9[%c64_97, %c0_98] : memref<66x64xf32, #tpu.memory_space<vmem>>, vector<2x64xf32>
    %142 = vector.extract_strided_slice %141 {offsets = [0, 0], sizes = [1, 64], strides = [1, 1]} : vector<2x64xf32> to vector<1x64xf32>
    %cst_99 = arith.constant 9.99999974E-6 : f32
    %143 = vector.broadcast %cst_99 : f32 to vector<1x64xf32>
    %144 = arith.addf %140, %143 : vector<1x64xf32>
    %145 = math.rsqrt %144 : vector<1x64xf32>
    %146 = arith.mulf %142, %145 : vector<1x64xf32>
    %147 = vector.extract_strided_slice %141 {offsets = [1, 0], sizes = [1, 64], strides = [1, 1]} : vector<2x64xf32> to vector<1x64xf32>
    %148 = arith.mulf %135, %146 : vector<1x64xf32>
    %149 = arith.subf %147, %148 : vector<1x64xf32>
    %150 = vector.broadcast %146 : vector<1x64xf32> to vector<8x64xf32>
    %151 = arith.mulf %128, %150 : vector<8x64xf32>
    %152 = vector.broadcast %149 : vector<1x64xf32> to vector<8x64xf32>
    %153 = arith.addf %151, %152 : vector<8x64xf32>
    %cst_100 = arith.constant 0.00999999977 : f32
    %154 = vector.broadcast %cst_100 : f32 to vector<8x64xf32>
    %155 = arith.mulf %154, %153 : vector<8x64xf32>
    %156 = arith.maximumf %153, %155 : vector<8x64xf32>
    %157 = arith.truncf %156 : vector<8x64xf32> to vector<8x64xbf16>
    %c0_101 = arith.constant 0 : index
    %c0_102 = arith.constant 0 : index
    %c0_103 = arith.constant 0 : index
    %158 = vector.load %arg10[%c0_101, %c0_102, %c0_103] : memref<3x4x8xbf16, #tpu.memory_space<vmem>>, vector<1x4x8xbf16>
    %159 = vector.shape_cast %158 : vector<1x4x8xbf16> to vector<4x8xbf16>
    %cst_104 = arith.constant dense<0.000000e+00> : vector<4x64xf32>
    %160 = tpu.matmul %159, %157, %cst_104 {dimension_numbers = #tpu.dot_dimension_numbers<[1], [0], [0], [1], [0, 0, 1, 1], [], []>} : vector<4x8xbf16>, vector<8x64xbf16>, vector<4x64xf32> -> vector<4x64xf32>
    %161 = arith.truncf %160 : vector<4x64xf32> to vector<4x64xbf16>
    %c0_105 = arith.constant 0 : index
    %c0_106 = arith.constant 0 : index
    %c0_107 = arith.constant 0 : index
    %162 = vector.load %arg11[%c0_105, %c0_106, %c0_107] : memref<3x64x32xbf16, #tpu.memory_space<vmem>>, vector<1x64x32xbf16>
    %163 = vector.shape_cast %162 : vector<1x64x32xbf16> to vector<64x32xbf16>
    %cst_108 = arith.constant dense<0.000000e+00> : vector<4x32xf32>
    %164 = tpu.matmul %161, %163, %cst_108 {dimension_numbers = #tpu.dot_dimension_numbers<[1], [0], [0], [1], [0, 0, 1, 1], [], []>} : vector<4x64xbf16>, vector<64x32xbf16>, vector<4x32xf32> -> vector<4x32xf32>
    %c1_109 = arith.constant 1 : index
    %c0_110 = arith.constant 0 : index
    %c0_111 = arith.constant 0 : index
    %165 = vector.load %arg10[%c1_109, %c0_110, %c0_111] : memref<3x4x8xbf16, #tpu.memory_space<vmem>>, vector<1x4x8xbf16>
    %166 = vector.shape_cast %165 : vector<1x4x8xbf16> to vector<4x8xbf16>
    %cst_112 = arith.constant dense<0.000000e+00> : vector<4x64xf32>
    %167 = tpu.matmul %166, %157, %cst_112 {dimension_numbers = #tpu.dot_dimension_numbers<[1], [0], [0], [1], [0, 0, 1, 1], [], []>} : vector<4x8xbf16>, vector<8x64xbf16>, vector<4x64xf32> -> vector<4x64xf32>
    %168 = arith.truncf %167 : vector<4x64xf32> to vector<4x64xbf16>
    %c1_113 = arith.constant 1 : index
    %c0_114 = arith.constant 0 : index
    %c0_115 = arith.constant 0 : index
    %169 = vector.load %arg11[%c1_113, %c0_114, %c0_115] : memref<3x64x32xbf16, #tpu.memory_space<vmem>>, vector<1x64x32xbf16>
    %170 = vector.shape_cast %169 : vector<1x64x32xbf16> to vector<64x32xbf16>
    %cst_116 = arith.constant dense<0.000000e+00> : vector<4x32xf32>
    %171 = tpu.matmul %168, %170, %cst_116 {dimension_numbers = #tpu.dot_dimension_numbers<[1], [0], [0], [1], [0, 0, 1, 1], [], []>} : vector<4x64xbf16>, vector<64x32xbf16>, vector<4x32xf32> -> vector<4x32xf32>
    %172 = arith.addf %164, %171 : vector<4x32xf32>
    %c2_117 = arith.constant 2 : index
    %c0_118 = arith.constant 0 : index
    %c0_119 = arith.constant 0 : index
    %173 = vector.load %arg10[%c2_117, %c0_118, %c0_119] : memref<3x4x8xbf16, #tpu.memory_space<vmem>>, vector<1x4x8xbf16>
    %174 = vector.shape_cast %173 : vector<1x4x8xbf16> to vector<4x8xbf16>
    %cst_120 = arith.constant dense<0.000000e+00> : vector<4x64xf32>
    %175 = tpu.matmul %174, %157, %cst_120 {dimension_numbers = #tpu.dot_dimension_numbers<[1], [0], [0], [1], [0, 0, 1, 1], [], []>} : vector<4x8xbf16>, vector<8x64xbf16>, vector<4x64xf32> -> vector<4x64xf32>
    %176 = arith.truncf %175 : vector<4x64xf32> to vector<4x64xbf16>
    %c2_121 = arith.constant 2 : index
    %c0_122 = arith.constant 0 : index
    %c0_123 = arith.constant 0 : index
    %177 = vector.load %arg11[%c2_121, %c0_122, %c0_123] : memref<3x64x32xbf16, #tpu.memory_space<vmem>>, vector<1x64x32xbf16>
    %178 = vector.shape_cast %177 : vector<1x64x32xbf16> to vector<64x32xbf16>
    %cst_124 = arith.constant dense<0.000000e+00> : vector<4x32xf32>
    %179 = tpu.matmul %176, %178, %cst_124 {dimension_numbers = #tpu.dot_dimension_numbers<[1], [0], [0], [1], [0, 0, 1, 1], [], []>} : vector<4x64xbf16>, vector<64x32xbf16>, vector<4x32xf32> -> vector<4x32xf32>
    %180 = arith.addf %172, %179 : vector<4x32xf32>
    %cst_125 = arith.constant dense<0.000000e+00> : vector<32xf32>
    %181 = vector.multi_reduction <add>, %180, %cst_125 [0] : vector<4x32xf32> to vector<32xf32>
    %182 = vector.shape_cast %181 : vector<32xf32> to vector<1x32xf32>
    %183 = arith.mulf %180, %180 : vector<4x32xf32>
    %cst_126 = arith.constant dense<0.000000e+00> : vector<32xf32>
    %184 = vector.multi_reduction <add>, %183, %cst_126 [0] : vector<4x32xf32> to vector<32xf32>
    %185 = vector.shape_cast %184 : vector<32xf32> to vector<1x32xf32>
    %c0_127 = arith.constant 0 : index
    %c0_128 = arith.constant 0 : index
    %186 = vector.load %arg12[%c0_127, %c0_128] : memref<34x32xf32, #tpu.memory_space<vmem>>, vector<32x32xf32>
    %cst_129 = arith.constant dense<0.000000e+00> : vector<1x32xf32>
    %187 = tpu.matmul %182, %186, %cst_129 {dimension_numbers = #tpu.dot_dimension_numbers<[1], [0], [0], [1], [0, 0, 1, 1], [], []>} : vector<1x32xf32>, vector<32x32xf32>, vector<1x32xf32> -> vector<1x32xf32>
    %cst_130 = arith.constant dense<0.000000e+00> : vector<1x32xf32>
    %188 = tpu.matmul %185, %186, %cst_130 {dimension_numbers = #tpu.dot_dimension_numbers<[1], [0], [0], [1], [0, 0, 1, 1], [], []>} : vector<1x32xf32>, vector<32x32xf32>, vector<1x32xf32> -> vector<1x32xf32>
    %189 = arith.mulf %187, %187 : vector<1x32xf32>
    %190 = arith.subf %188, %189 : vector<1x32xf32>
    %cst_131 = arith.constant 0.000000e+00 : f32
    %191 = vector.broadcast %cst_131 : f32 to vector<1x32xf32>
    %192 = arith.maximumf %190, %191 : vector<1x32xf32>
    %c32 = arith.constant 32 : index
    %c0_132 = arith.constant 0 : index
    %193 = vector.load %arg12[%c32, %c0_132] : memref<34x32xf32, #tpu.memory_space<vmem>>, vector<2x32xf32>
    %194 = vector.extract_strided_slice %193 {offsets = [0, 0], sizes = [1, 32], strides = [1, 1]} : vector<2x32xf32> to vector<1x32xf32>
    %cst_133 = arith.constant 9.99999974E-6 : f32
    %195 = vector.broadcast %cst_133 : f32 to vector<1x32xf32>
    %196 = arith.addf %192, %195 : vector<1x32xf32>
    %197 = math.rsqrt %196 : vector<1x32xf32>
    %198 = arith.mulf %194, %197 : vector<1x32xf32>
    %199 = vector.extract_strided_slice %193 {offsets = [1, 0], sizes = [1, 32], strides = [1, 1]} : vector<2x32xf32> to vector<1x32xf32>
    %200 = arith.mulf %187, %198 : vector<1x32xf32>
    %201 = arith.subf %199, %200 : vector<1x32xf32>
    %202 = vector.broadcast %198 : vector<1x32xf32> to vector<4x32xf32>
    %203 = arith.mulf %180, %202 : vector<4x32xf32>
    %204 = vector.broadcast %201 : vector<1x32xf32> to vector<4x32xf32>
    %205 = arith.addf %203, %204 : vector<4x32xf32>
    %cst_134 = arith.constant 0.00999999977 : f32
    %206 = vector.broadcast %cst_134 : f32 to vector<4x32xf32>
    %207 = arith.mulf %206, %205 : vector<4x32xf32>
    %208 = arith.maximumf %205, %207 : vector<4x32xf32>
    %209 = arith.truncf %208 : vector<4x32xf32> to vector<4x32xbf16>
    %c0_135 = arith.constant 0 : index
    %c0_136 = arith.constant 0 : index
    %c0_137 = arith.constant 0 : index
    %210 = vector.load %arg13[%c0_135, %c0_136, %c0_137] : memref<2x2x4xbf16, #tpu.memory_space<vmem>>, vector<1x2x4xbf16>
    %211 = vector.shape_cast %210 : vector<1x2x4xbf16> to vector<2x4xbf16>
    %cst_138 = arith.constant dense<0.000000e+00> : vector<2x32xf32>
    %212 = tpu.matmul %211, %209, %cst_138 {dimension_numbers = #tpu.dot_dimension_numbers<[1], [0], [0], [1], [0, 0, 1, 1], [], []>} : vector<2x4xbf16>, vector<4x32xbf16>, vector<2x32xf32> -> vector<2x32xf32>
    %213 = arith.truncf %212 : vector<2x32xf32> to vector<2x32xbf16>
    %c0_139 = arith.constant 0 : index
    %c0_140 = arith.constant 0 : index
    %c0_141 = arith.constant 0 : index
    %214 = vector.load %arg14[%c0_139, %c0_140, %c0_141] : memref<2x32x64xbf16, #tpu.memory_space<vmem>>, vector<1x32x64xbf16>
    %215 = vector.shape_cast %214 : vector<1x32x64xbf16> to vector<32x64xbf16>
    %cst_142 = arith.constant dense<0.000000e+00> : vector<2x64xf32>
    %216 = tpu.matmul %213, %215, %cst_142 {dimension_numbers = #tpu.dot_dimension_numbers<[1], [0], [0], [1], [0, 0, 1, 1], [], []>} : vector<2x32xbf16>, vector<32x64xbf16>, vector<2x64xf32> -> vector<2x64xf32>
    %c1_143 = arith.constant 1 : index
    %c0_144 = arith.constant 0 : index
    %c0_145 = arith.constant 0 : index
    %217 = vector.load %arg13[%c1_143, %c0_144, %c0_145] : memref<2x2x4xbf16, #tpu.memory_space<vmem>>, vector<1x2x4xbf16>
    %218 = vector.shape_cast %217 : vector<1x2x4xbf16> to vector<2x4xbf16>
    %cst_146 = arith.constant dense<0.000000e+00> : vector<2x32xf32>
    %219 = tpu.matmul %218, %209, %cst_146 {dimension_numbers = #tpu.dot_dimension_numbers<[1], [0], [0], [1], [0, 0, 1, 1], [], []>} : vector<2x4xbf16>, vector<4x32xbf16>, vector<2x32xf32> -> vector<2x32xf32>
    %220 = arith.truncf %219 : vector<2x32xf32> to vector<2x32xbf16>
    %c1_147 = arith.constant 1 : index
    %c0_148 = arith.constant 0 : index
    %c0_149 = arith.constant 0 : index
    %221 = vector.load %arg14[%c1_147, %c0_148, %c0_149] : memref<2x32x64xbf16, #tpu.memory_space<vmem>>, vector<1x32x64xbf16>
    %222 = vector.shape_cast %221 : vector<1x32x64xbf16> to vector<32x64xbf16>
    %cst_150 = arith.constant dense<0.000000e+00> : vector<2x64xf32>
    %223 = tpu.matmul %220, %222, %cst_150 {dimension_numbers = #tpu.dot_dimension_numbers<[1], [0], [0], [1], [0, 0, 1, 1], [], []>} : vector<2x32xbf16>, vector<32x64xbf16>, vector<2x64xf32> -> vector<2x64xf32>
    %224 = arith.addf %216, %223 : vector<2x64xf32>
    %c0_151 = arith.constant 0 : index
    %c0_152 = arith.constant 0 : index
    %225 = vector.load %arg15[%c0_151, %c0_152] : memref<1x64xf32, #tpu.memory_space<vmem>>, vector<1x64xf32>
    %226 = vector.broadcast %225 : vector<1x64xf32> to vector<2x64xf32>
    %227 = arith.addf %224, %226 : vector<2x64xf32>
    %228 = math.tanh %227 : vector<2x64xf32>
    %c0_153 = arith.constant 0 : index
    %c0_154 = arith.constant 0 : index
    %229 = vector.load %arg35[%c0_153, %c0_154] : memref<2x64xf32, #tpu.memory_space<vmem>>, vector<2x64xf32>
    tpu.vector_store %arg35[%c0_153, %c0_154], %228 {strides = array<i32>} : memref<2x64xf32, #tpu.memory_space<vmem>>, vector<2x64xf32>,
    %230 = arith.truncf %228 : vector<2x64xf32> to vector<2x64xbf16>
    %c0_155 = arith.constant 0 : index
    %c0_156 = arith.constant 0 : index
    %231 = vector.load %arg16[%c0_155, %c0_156] : memref<64x64xbf16, #tpu.memory_space<vmem>>, vector<64x64xbf16>
    %cst_157 = arith.constant dense<0.000000e+00> : vector<2x64xf32>
    %232 = tpu.matmul %230, %231, %cst_157 {dimension_numbers = #tpu.dot_dimension_numbers<[1], [0], [0], [1], [0, 0, 1, 1], [], []>} : vector<2x64xbf16>, vector<64x64xbf16>, vector<2x64xf32> -> vector<2x64xf32>
    %c0_158 = arith.constant 0 : index
    %c0_159 = arith.constant 0 : index
    %233 = vector.load %arg17[%c0_158, %c0_159] : memref<1x64xf32, #tpu.memory_space<vmem>>, vector<1x64xf32>
    %234 = vector.broadcast %233 : vector<1x64xf32> to vector<2x64xf32>
    %235 = arith.addf %232, %234 : vector<2x64xf32>
    %cst_160 = arith.constant 0.000000e+00 : f32
    %236 = vector.broadcast %cst_160 : f32 to vector<2x64xf32>
    %237 = arith.maximumf %235, %236 : vector<2x64xf32>
    %238 = arith.truncf %237 : vector<2x64xf32> to vector<2x64xbf16>
    %c0_161 = arith.constant 0 : index
    %c0_162 = arith.constant 0 : index
    %c0_163 = arith.constant 0 : index
    %239 = vector.load %arg18[%c0_161, %c0_162, %c0_163] : memref<2x64x32xbf16, #tpu.memory_space<vmem>>, vector<1x64x32xbf16>
    %240 = vector.shape_cast %239 : vector<1x64x32xbf16> to vector<64x32xbf16>
    %cst_164 = arith.constant dense<0.000000e+00> : vector<2x32xf32>
    %241 = tpu.matmul %238, %240, %cst_164 {dimension_numbers = #tpu.dot_dimension_numbers<[1], [0], [0], [1], [0, 0, 1, 1], [], []>} : vector<2x64xbf16>, vector<64x32xbf16>, vector<2x32xf32> -> vector<2x32xf32>
    %c0_165 = arith.constant 0 : index
    %c0_166 = arith.constant 0 : index
    %c0_167 = arith.constant 0 : index
    %242 = vector.load %arg19[%c0_165, %c0_166, %c0_167] : memref<2x4x2xbf16, #tpu.memory_space<vmem>>, vector<1x4x2xbf16>
    %243 = vector.shape_cast %242 : vector<1x4x2xbf16> to vector<4x2xbf16>
    %244 = arith.truncf %241 : vector<2x32xf32> to vector<2x32xbf16>
    %cst_168 = arith.constant dense<0.000000e+00> : vector<4x32xf32>
    %245 = tpu.matmul %243, %244, %cst_168 {dimension_numbers = #tpu.dot_dimension_numbers<[1], [0], [0], [1], [0, 0, 1, 1], [], []>} : vector<4x2xbf16>, vector<2x32xbf16>, vector<4x32xf32> -> vector<4x32xf32>
    %c1_169 = arith.constant 1 : index
    %c0_170 = arith.constant 0 : index
    %c0_171 = arith.constant 0 : index
    %246 = vector.load %arg18[%c1_169, %c0_170, %c0_171] : memref<2x64x32xbf16, #tpu.memory_space<vmem>>, vector<1x64x32xbf16>
    %247 = vector.shape_cast %246 : vector<1x64x32xbf16> to vector<64x32xbf16>
    %cst_172 = arith.constant dense<0.000000e+00> : vector<2x32xf32>
    %248 = tpu.matmul %238, %247, %cst_172 {dimension_numbers = #tpu.dot_dimension_numbers<[1], [0], [0], [1], [0, 0, 1, 1], [], []>} : vector<2x64xbf16>, vector<64x32xbf16>, vector<2x32xf32> -> vector<2x32xf32>
    %c1_173 = arith.constant 1 : index
    %c0_174 = arith.constant 0 : index
    %c0_175 = arith.constant 0 : index
    %249 = vector.load %arg19[%c1_173, %c0_174, %c0_175] : memref<2x4x2xbf16, #tpu.memory_space<vmem>>, vector<1x4x2xbf16>
    %250 = vector.shape_cast %249 : vector<1x4x2xbf16> to vector<4x2xbf16>
    %251 = arith.truncf %248 : vector<2x32xf32> to vector<2x32xbf16>
    %cst_176 = arith.constant dense<0.000000e+00> : vector<4x32xf32>
    %252 = tpu.matmul %250, %251, %cst_176 {dimension_numbers = #tpu.dot_dimension_numbers<[1], [0], [0], [1], [0, 0, 1, 1], [], []>} : vector<4x2xbf16>, vector<2x32xbf16>, vector<4x32xf32> -> vector<4x32xf32>
    %253 = arith.addf %245, %252 : vector<4x32xf32>
    %254 = arith.truncf %253 : vector<4x32xf32> to vector<4x32xbf16>
    %c0_177 = arith.constant 0 : index
    %c0_178 = arith.constant 0 : index
    %c0_179 = arith.constant 0 : index
    %255 = vector.load %arg20[%c0_177, %c0_178, %c0_179] : memref<3x8x4xbf16, #tpu.memory_space<vmem>>, vector<1x8x4xbf16>
    %256 = vector.shape_cast %255 : vector<1x8x4xbf16> to vector<8x4xbf16>
    %cst_180 = arith.constant dense<0.000000e+00> : vector<8x32xf32>
    %257 = tpu.matmul %256, %254, %cst_180 {dimension_numbers = #tpu.dot_dimension_numbers<[1], [0], [0], [1], [0, 0, 1, 1], [], []>} : vector<8x4xbf16>, vector<4x32xbf16>, vector<8x32xf32> -> vector<8x32xf32>
    %258 = arith.truncf %257 : vector<8x32xf32> to vector<8x32xbf16>
    %c0_181 = arith.constant 0 : index
    %c0_182 = arith.constant 0 : index
    %c0_183 = arith.constant 0 : index
    %259 = vector.load %arg21[%c0_181, %c0_182, %c0_183] : memref<3x32x64xbf16, #tpu.memory_space<vmem>>, vector<1x32x64xbf16>
    %260 = vector.shape_cast %259 : vector<1x32x64xbf16> to vector<32x64xbf16>
    %cst_184 = arith.constant dense<0.000000e+00> : vector<8x64xf32>
    %261 = tpu.matmul %258, %260, %cst_184 {dimension_numbers = #tpu.dot_dimension_numbers<[1], [0], [0], [1], [0, 0, 1, 1], [], []>} : vector<8x32xbf16>, vector<32x64xbf16>, vector<8x64xf32> -> vector<8x64xf32>
    %c1_185 = arith.constant 1 : index
    %c0_186 = arith.constant 0 : index
    %c0_187 = arith.constant 0 : index
    %262 = vector.load %arg20[%c1_185, %c0_186, %c0_187] : memref<3x8x4xbf16, #tpu.memory_space<vmem>>, vector<1x8x4xbf16>
    %263 = vector.shape_cast %262 : vector<1x8x4xbf16> to vector<8x4xbf16>
    %cst_188 = arith.constant dense<0.000000e+00> : vector<8x32xf32>
    %264 = tpu.matmul %263, %254, %cst_188 {dimension_numbers = #tpu.dot_dimension_numbers<[1], [0], [0], [1], [0, 0, 1, 1], [], []>} : vector<8x4xbf16>, vector<4x32xbf16>, vector<8x32xf32> -> vector<8x32xf32>
    %265 = arith.truncf %264 : vector<8x32xf32> to vector<8x32xbf16>
    %c1_189 = arith.constant 1 : index
    %c0_190 = arith.constant 0 : index
    %c0_191 = arith.constant 0 : index
    %266 = vector.load %arg21[%c1_189, %c0_190, %c0_191] : memref<3x32x64xbf16, #tpu.memory_space<vmem>>, vector<1x32x64xbf16>
    %267 = vector.shape_cast %266 : vector<1x32x64xbf16> to vector<32x64xbf16>
    %cst_192 = arith.constant dense<0.000000e+00> : vector<8x64xf32>
    %268 = tpu.matmul %265, %267, %cst_192 {dimension_numbers = #tpu.dot_dimension_numbers<[1], [0], [0], [1], [0, 0, 1, 1], [], []>} : vector<8x32xbf16>, vector<32x64xbf16>, vector<8x64xf32> -> vector<8x64xf32>
    %269 = arith.addf %261, %268 : vector<8x64xf32>
    %c2_193 = arith.constant 2 : index
    %c0_194 = arith.constant 0 : index
    %c0_195 = arith.constant 0 : index
    %270 = vector.load %arg20[%c2_193, %c0_194, %c0_195] : memref<3x8x4xbf16, #tpu.memory_space<vmem>>, vector<1x8x4xbf16>
    %271 = vector.shape_cast %270 : vector<1x8x4xbf16> to vector<8x4xbf16>
    %cst_196 = arith.constant dense<0.000000e+00> : vector<8x32xf32>
    %272 = tpu.matmul %271, %254, %cst_196 {dimension_numbers = #tpu.dot_dimension_numbers<[1], [0], [0], [1], [0, 0, 1, 1], [], []>} : vector<8x4xbf16>, vector<4x32xbf16>, vector<8x32xf32> -> vector<8x32xf32>
    %273 = arith.truncf %272 : vector<8x32xf32> to vector<8x32xbf16>
    %c2_197 = arith.constant 2 : index
    %c0_198 = arith.constant 0 : index
    %c0_199 = arith.constant 0 : index
    %274 = vector.load %arg21[%c2_197, %c0_198, %c0_199] : memref<3x32x64xbf16, #tpu.memory_space<vmem>>, vector<1x32x64xbf16>
    %275 = vector.shape_cast %274 : vector<1x32x64xbf16> to vector<32x64xbf16>
    %cst_200 = arith.constant dense<0.000000e+00> : vector<8x64xf32>
    %276 = tpu.matmul %273, %275, %cst_200 {dimension_numbers = #tpu.dot_dimension_numbers<[1], [0], [0], [1], [0, 0, 1, 1], [], []>} : vector<8x32xbf16>, vector<32x64xbf16>, vector<8x64xf32> -> vector<8x64xf32>
    %277 = arith.addf %269, %276 : vector<8x64xf32>
    %cst_201 = arith.constant dense<0.000000e+00> : vector<64xf32>
    %278 = vector.multi_reduction <add>, %277, %cst_201 [0] : vector<8x64xf32> to vector<64xf32>
    %279 = vector.shape_cast %278 : vector<64xf32> to vector<1x64xf32>
    %280 = arith.mulf %277, %277 : vector<8x64xf32>
    %cst_202 = arith.constant dense<0.000000e+00> : vector<64xf32>
    %281 = vector.multi_reduction <add>, %280, %cst_202 [0] : vector<8x64xf32> to vector<64xf32>
    %282 = vector.shape_cast %281 : vector<64xf32> to vector<1x64xf32>
    %c0_203 = arith.constant 0 : index
    %c0_204 = arith.constant 0 : index
    %283 = vector.load %arg22[%c0_203, %c0_204] : memref<66x64xf32, #tpu.memory_space<vmem>>, vector<64x64xf32>
    %cst_205 = arith.constant dense<0.000000e+00> : vector<1x64xf32>
    %284 = tpu.matmul %279, %283, %cst_205 {dimension_numbers = #tpu.dot_dimension_numbers<[1], [0], [0], [1], [0, 0, 1, 1], [], []>} : vector<1x64xf32>, vector<64x64xf32>, vector<1x64xf32> -> vector<1x64xf32>
    %cst_206 = arith.constant dense<0.000000e+00> : vector<1x64xf32>
    %285 = tpu.matmul %282, %283, %cst_206 {dimension_numbers = #tpu.dot_dimension_numbers<[1], [0], [0], [1], [0, 0, 1, 1], [], []>} : vector<1x64xf32>, vector<64x64xf32>, vector<1x64xf32> -> vector<1x64xf32>
    %286 = arith.mulf %284, %284 : vector<1x64xf32>
    %287 = arith.subf %285, %286 : vector<1x64xf32>
    %cst_207 = arith.constant 0.000000e+00 : f32
    %288 = vector.broadcast %cst_207 : f32 to vector<1x64xf32>
    %289 = arith.maximumf %287, %288 : vector<1x64xf32>
    %c64_208 = arith.constant 64 : index
    %c0_209 = arith.constant 0 : index
    %290 = vector.load %arg22[%c64_208, %c0_209] : memref<66x64xf32, #tpu.memory_space<vmem>>, vector<2x64xf32>
    %291 = vector.extract_strided_slice %290 {offsets = [0, 0], sizes = [1, 64], strides = [1, 1]} : vector<2x64xf32> to vector<1x64xf32>
    %cst_210 = arith.constant 9.99999974E-6 : f32
    %292 = vector.broadcast %cst_210 : f32 to vector<1x64xf32>
    %293 = arith.addf %289, %292 : vector<1x64xf32>
    %294 = math.rsqrt %293 : vector<1x64xf32>
    %295 = arith.mulf %291, %294 : vector<1x64xf32>
    %296 = vector.extract_strided_slice %290 {offsets = [1, 0], sizes = [1, 64], strides = [1, 1]} : vector<2x64xf32> to vector<1x64xf32>
    %297 = arith.mulf %284, %295 : vector<1x64xf32>
    %298 = arith.subf %296, %297 : vector<1x64xf32>
    %299 = vector.broadcast %295 : vector<1x64xf32> to vector<8x64xf32>
    %300 = arith.mulf %277, %299 : vector<8x64xf32>
    %301 = vector.broadcast %298 : vector<1x64xf32> to vector<8x64xf32>
    %302 = arith.addf %300, %301 : vector<8x64xf32>
    %cst_211 = arith.constant 0.00999999977 : f32
    %303 = vector.broadcast %cst_211 : f32 to vector<8x64xf32>
    %304 = arith.mulf %303, %302 : vector<8x64xf32>
    %305 = arith.maximumf %302, %304 : vector<8x64xf32>
    %306 = arith.truncf %305 : vector<8x64xf32> to vector<8x64xbf16>
    %c0_212 = arith.constant 0 : index
    %c0_213 = arith.constant 0 : index
    %c0_214 = arith.constant 0 : index
    %307 = vector.load %arg23[%c0_212, %c0_213, %c0_214] : memref<3x16x8xbf16, #tpu.memory_space<vmem>>, vector<1x16x8xbf16>
    %308 = vector.shape_cast %307 : vector<1x16x8xbf16> to vector<16x8xbf16>
    %cst_215 = arith.constant dense<0.000000e+00> : vector<16x64xf32>
    %309 = tpu.matmul %308, %306, %cst_215 {dimension_numbers = #tpu.dot_dimension_numbers<[1], [0], [0], [1], [0, 0, 1, 1], [], []>} : vector<16x8xbf16>, vector<8x64xbf16>, vector<16x64xf32> -> vector<16x64xf32>
    %310 = arith.truncf %309 : vector<16x64xf32> to vector<16x64xbf16>
    %c0_216 = arith.constant 0 : index
    %c0_217 = arith.constant 0 : index
    %c0_218 = arith.constant 0 : index
    %311 = vector.load %arg24[%c0_216, %c0_217, %c0_218] : memref<3x64x64xbf16, #tpu.memory_space<vmem>>, vector<1x64x64xbf16>
    %312 = vector.shape_cast %311 : vector<1x64x64xbf16> to vector<64x64xbf16>
    %cst_219 = arith.constant dense<0.000000e+00> : vector<16x64xf32>
    %313 = tpu.matmul %310, %312, %cst_219 {dimension_numbers = #tpu.dot_dimension_numbers<[1], [0], [0], [1], [0, 0, 1, 1], [], []>} : vector<16x64xbf16>, vector<64x64xbf16>, vector<16x64xf32> -> vector<16x64xf32>
    %c1_220 = arith.constant 1 : index
    %c0_221 = arith.constant 0 : index
    %c0_222 = arith.constant 0 : index
    %314 = vector.load %arg23[%c1_220, %c0_221, %c0_222] : memref<3x16x8xbf16, #tpu.memory_space<vmem>>, vector<1x16x8xbf16>
    %315 = vector.shape_cast %314 : vector<1x16x8xbf16> to vector<16x8xbf16>
    %cst_223 = arith.constant dense<0.000000e+00> : vector<16x64xf32>
    %316 = tpu.matmul %315, %306, %cst_223 {dimension_numbers = #tpu.dot_dimension_numbers<[1], [0], [0], [1], [0, 0, 1, 1], [], []>} : vector<16x8xbf16>, vector<8x64xbf16>, vector<16x64xf32> -> vector<16x64xf32>
    %317 = arith.truncf %316 : vector<16x64xf32> to vector<16x64xbf16>
    %c1_224 = arith.constant 1 : index
    %c0_225 = arith.constant 0 : index
    %c0_226 = arith.constant 0 : index
    %318 = vector.load %arg24[%c1_224, %c0_225, %c0_226] : memref<3x64x64xbf16, #tpu.memory_space<vmem>>, vector<1x64x64xbf16>
    %319 = vector.shape_cast %318 : vector<1x64x64xbf16> to vector<64x64xbf16>
    %cst_227 = arith.constant dense<0.000000e+00> : vector<16x64xf32>
    %320 = tpu.matmul %317, %319, %cst_227 {dimension_numbers = #tpu.dot_dimension_numbers<[1], [0], [0], [1], [0, 0, 1, 1], [], []>} : vector<16x64xbf16>, vector<64x64xbf16>, vector<16x64xf32> -> vector<16x64xf32>
    %321 = arith.addf %313, %320 : vector<16x64xf32>
    %c2_228 = arith.constant 2 : index
    %c0_229 = arith.constant 0 : index
    %c0_230 = arith.constant 0 : index
    %322 = vector.load %arg23[%c2_228, %c0_229, %c0_230] : memref<3x16x8xbf16, #tpu.memory_space<vmem>>, vector<1x16x8xbf16>
    %323 = vector.shape_cast %322 : vector<1x16x8xbf16> to vector<16x8xbf16>
    %cst_231 = arith.constant dense<0.000000e+00> : vector<16x64xf32>
    %324 = tpu.matmul %323, %306, %cst_231 {dimension_numbers = #tpu.dot_dimension_numbers<[1], [0], [0], [1], [0, 0, 1, 1], [], []>} : vector<16x8xbf16>, vector<8x64xbf16>, vector<16x64xf32> -> vector<16x64xf32>
    %325 = arith.truncf %324 : vector<16x64xf32> to vector<16x64xbf16>
    %c2_232 = arith.constant 2 : index
    %c0_233 = arith.constant 0 : index
    %c0_234 = arith.constant 0 : index
    %326 = vector.load %arg24[%c2_232, %c0_233, %c0_234] : memref<3x64x64xbf16, #tpu.memory_space<vmem>>, vector<1x64x64xbf16>
    %327 = vector.shape_cast %326 : vector<1x64x64xbf16> to vector<64x64xbf16>
    %cst_235 = arith.constant dense<0.000000e+00> : vector<16x64xf32>
    %328 = tpu.matmul %325, %327, %cst_235 {dimension_numbers = #tpu.dot_dimension_numbers<[1], [0], [0], [1], [0, 0, 1, 1], [], []>} : vector<16x64xbf16>, vector<64x64xbf16>, vector<16x64xf32> -> vector<16x64xf32>
    %329 = arith.addf %321, %328 : vector<16x64xf32>
    %cst_236 = arith.constant dense<0.000000e+00> : vector<64xf32>
    %330 = vector.multi_reduction <add>, %329, %cst_236 [0] : vector<16x64xf32> to vector<64xf32>
    %331 = vector.shape_cast %330 : vector<64xf32> to vector<1x64xf32>
    %332 = arith.mulf %329, %329 : vector<16x64xf32>
    %cst_237 = arith.constant dense<0.000000e+00> : vector<64xf32>
    %333 = vector.multi_reduction <add>, %332, %cst_237 [0] : vector<16x64xf32> to vector<64xf32>
    %334 = vector.shape_cast %333 : vector<64xf32> to vector<1x64xf32>
    %c0_238 = arith.constant 0 : index
    %c0_239 = arith.constant 0 : index
    %335 = vector.load %arg25[%c0_238, %c0_239] : memref<66x64xf32, #tpu.memory_space<vmem>>, vector<64x64xf32>
    %cst_240 = arith.constant dense<0.000000e+00> : vector<1x64xf32>
    %336 = tpu.matmul %331, %335, %cst_240 {dimension_numbers = #tpu.dot_dimension_numbers<[1], [0], [0], [1], [0, 0, 1, 1], [], []>} : vector<1x64xf32>, vector<64x64xf32>, vector<1x64xf32> -> vector<1x64xf32>
    %cst_241 = arith.constant dense<0.000000e+00> : vector<1x64xf32>
    %337 = tpu.matmul %334, %335, %cst_241 {dimension_numbers = #tpu.dot_dimension_numbers<[1], [0], [0], [1], [0, 0, 1, 1], [], []>} : vector<1x64xf32>, vector<64x64xf32>, vector<1x64xf32> -> vector<1x64xf32>
    %338 = arith.mulf %336, %336 : vector<1x64xf32>
    %339 = arith.subf %337, %338 : vector<1x64xf32>
    %cst_242 = arith.constant 0.000000e+00 : f32
    %340 = vector.broadcast %cst_242 : f32 to vector<1x64xf32>
    %341 = arith.maximumf %339, %340 : vector<1x64xf32>
    %c64_243 = arith.constant 64 : index
    %c0_244 = arith.constant 0 : index
    %342 = vector.load %arg25[%c64_243, %c0_244] : memref<66x64xf32, #tpu.memory_space<vmem>>, vector<2x64xf32>
    %343 = vector.extract_strided_slice %342 {offsets = [0, 0], sizes = [1, 64], strides = [1, 1]} : vector<2x64xf32> to vector<1x64xf32>
    %cst_245 = arith.constant 9.99999974E-6 : f32
    %344 = vector.broadcast %cst_245 : f32 to vector<1x64xf32>
    %345 = arith.addf %341, %344 : vector<1x64xf32>
    %346 = math.rsqrt %345 : vector<1x64xf32>
    %347 = arith.mulf %343, %346 : vector<1x64xf32>
    %348 = vector.extract_strided_slice %342 {offsets = [1, 0], sizes = [1, 64], strides = [1, 1]} : vector<2x64xf32> to vector<1x64xf32>
    %349 = arith.mulf %336, %347 : vector<1x64xf32>
    %350 = arith.subf %348, %349 : vector<1x64xf32>
    %351 = vector.broadcast %347 : vector<1x64xf32> to vector<16x64xf32>
    %352 = arith.mulf %329, %351 : vector<16x64xf32>
    %353 = vector.broadcast %350 : vector<1x64xf32> to vector<16x64xf32>
    %354 = arith.addf %352, %353 : vector<16x64xf32>
    %cst_246 = arith.constant 0.00999999977 : f32
    %355 = vector.broadcast %cst_246 : f32 to vector<16x64xf32>
    %356 = arith.mulf %355, %354 : vector<16x64xf32>
    %357 = arith.maximumf %354, %356 : vector<16x64xf32>
    %358 = arith.truncf %357 : vector<16x64xf32> to vector<16x64xbf16>
    %c0_247 = arith.constant 0 : index
    %c0_248 = arith.constant 0 : index
    %c0_249 = arith.constant 0 : index
    %359 = vector.load %arg26[%c0_247, %c0_248, %c0_249] : memref<3x32x16xbf16, #tpu.memory_space<vmem>>, vector<1x32x16xbf16>
    %360 = vector.shape_cast %359 : vector<1x32x16xbf16> to vector<32x16xbf16>
    %cst_250 = arith.constant dense<0.000000e+00> : vector<32x64xf32>
    %361 = tpu.matmul %360, %358, %cst_250 {dimension_numbers = #tpu.dot_dimension_numbers<[1], [0], [0], [1], [0, 0, 1, 1], [], []>} : vector<32x16xbf16>, vector<16x64xbf16>, vector<32x64xf32> -> vector<32x64xf32>
    %362 = arith.truncf %361 : vector<32x64xf32> to vector<32x64xbf16>
    %c0_251 = arith.constant 0 : index
    %c0_252 = arith.constant 0 : index
    %c0_253 = arith.constant 0 : index
    %363 = vector.load %arg27[%c0_251, %c0_252, %c0_253] : memref<3x64x128xbf16, #tpu.memory_space<vmem>>, vector<1x64x128xbf16>
    %364 = vector.shape_cast %363 : vector<1x64x128xbf16> to vector<64x128xbf16>
    %cst_254 = arith.constant dense<0.000000e+00> : vector<32x128xf32>
    %365 = tpu.matmul %362, %364, %cst_254 {dimension_numbers = #tpu.dot_dimension_numbers<[1], [0], [0], [1], [0, 0, 1, 1], [], []>} : vector<32x64xbf16>, vector<64x128xbf16>, vector<32x128xf32> -> vector<32x128xf32>
    %c1_255 = arith.constant 1 : index
    %c0_256 = arith.constant 0 : index
    %c0_257 = arith.constant 0 : index
    %366 = vector.load %arg26[%c1_255, %c0_256, %c0_257] : memref<3x32x16xbf16, #tpu.memory_space<vmem>>, vector<1x32x16xbf16>
    %367 = vector.shape_cast %366 : vector<1x32x16xbf16> to vector<32x16xbf16>
    %cst_258 = arith.constant dense<0.000000e+00> : vector<32x64xf32>
    %368 = tpu.matmul %367, %358, %cst_258 {dimension_numbers = #tpu.dot_dimension_numbers<[1], [0], [0], [1], [0, 0, 1, 1], [], []>} : vector<32x16xbf16>, vector<16x64xbf16>, vector<32x64xf32> -> vector<32x64xf32>
    %369 = arith.truncf %368 : vector<32x64xf32> to vector<32x64xbf16>
    %c1_259 = arith.constant 1 : index
    %c0_260 = arith.constant 0 : index
    %c0_261 = arith.constant 0 : index
    %370 = vector.load %arg27[%c1_259, %c0_260, %c0_261] : memref<3x64x128xbf16, #tpu.memory_space<vmem>>, vector<1x64x128xbf16>
    %371 = vector.shape_cast %370 : vector<1x64x128xbf16> to vector<64x128xbf16>
    %cst_262 = arith.constant dense<0.000000e+00> : vector<32x128xf32>
    %372 = tpu.matmul %369, %371, %cst_262 {dimension_numbers = #tpu.dot_dimension_numbers<[1], [0], [0], [1], [0, 0, 1, 1], [], []>} : vector<32x64xbf16>, vector<64x128xbf16>, vector<32x128xf32> -> vector<32x128xf32>
    %373 = arith.addf %365, %372 : vector<32x128xf32>
    %c2_263 = arith.constant 2 : index
    %c0_264 = arith.constant 0 : index
    %c0_265 = arith.constant 0 : index
    %374 = vector.load %arg26[%c2_263, %c0_264, %c0_265] : memref<3x32x16xbf16, #tpu.memory_space<vmem>>, vector<1x32x16xbf16>
    %375 = vector.shape_cast %374 : vector<1x32x16xbf16> to vector<32x16xbf16>
    %cst_266 = arith.constant dense<0.000000e+00> : vector<32x64xf32>
    %376 = tpu.matmul %375, %358, %cst_266 {dimension_numbers = #tpu.dot_dimension_numbers<[1], [0], [0], [1], [0, 0, 1, 1], [], []>} : vector<32x16xbf16>, vector<16x64xbf16>, vector<32x64xf32> -> vector<32x64xf32>
    %377 = arith.truncf %376 : vector<32x64xf32> to vector<32x64xbf16>
    %c2_267 = arith.constant 2 : index
    %c0_268 = arith.constant 0 : index
    %c0_269 = arith.constant 0 : index
    %378 = vector.load %arg27[%c2_267, %c0_268, %c0_269] : memref<3x64x128xbf16, #tpu.memory_space<vmem>>, vector<1x64x128xbf16>
    %379 = vector.shape_cast %378 : vector<1x64x128xbf16> to vector<64x128xbf16>
    %cst_270 = arith.constant dense<0.000000e+00> : vector<32x128xf32>
    %380 = tpu.matmul %377, %379, %cst_270 {dimension_numbers = #tpu.dot_dimension_numbers<[1], [0], [0], [1], [0, 0, 1, 1], [], []>} : vector<32x64xbf16>, vector<64x128xbf16>, vector<32x128xf32> -> vector<32x128xf32>
    %381 = arith.addf %373, %380 : vector<32x128xf32>
    %cst_271 = arith.constant dense<0.000000e+00> : vector<128xf32>
    %382 = vector.multi_reduction <add>, %381, %cst_271 [0] : vector<32x128xf32> to vector<128xf32>
    %383 = vector.shape_cast %382 : vector<128xf32> to vector<1x128xf32>
    %384 = arith.mulf %381, %381 : vector<32x128xf32>
    %cst_272 = arith.constant dense<0.000000e+00> : vector<128xf32>
    %385 = vector.multi_reduction <add>, %384, %cst_272 [0] : vector<32x128xf32> to vector<128xf32>
    %386 = vector.shape_cast %385 : vector<128xf32> to vector<1x128xf32>
    %c0_273 = arith.constant 0 : index
    %c0_274 = arith.constant 0 : index
    %387 = vector.load %arg28[%c0_273, %c0_274] : memref<130x128xf32, #tpu.memory_space<vmem>>, vector<128x128xf32>
    %cst_275 = arith.constant dense<0.000000e+00> : vector<1x128xf32>
    %388 = tpu.matmul %383, %387, %cst_275 {dimension_numbers = #tpu.dot_dimension_numbers<[1], [0], [0], [1], [0, 0, 1, 1], [], []>} : vector<1x128xf32>, vector<128x128xf32>, vector<1x128xf32> -> vector<1x128xf32>
    %cst_276 = arith.constant dense<0.000000e+00> : vector<1x128xf32>
    %389 = tpu.matmul %386, %387, %cst_276 {dimension_numbers = #tpu.dot_dimension_numbers<[1], [0], [0], [1], [0, 0, 1, 1], [], []>} : vector<1x128xf32>, vector<128x128xf32>, vector<1x128xf32> -> vector<1x128xf32>
    %390 = arith.mulf %388, %388 : vector<1x128xf32>
    %391 = arith.subf %389, %390 : vector<1x128xf32>
    %cst_277 = arith.constant 0.000000e+00 : f32
    %392 = vector.broadcast %cst_277 : f32 to vector<1x128xf32>
    %393 = arith.maximumf %391, %392 : vector<1x128xf32>
    %c128_278 = arith.constant 128 : index
    %c0_279 = arith.constant 0 : index
    %394 = vector.load %arg28[%c128_278, %c0_279] : memref<130x128xf32, #tpu.memory_space<vmem>>, vector<2x128xf32>
    %395 = vector.extract_strided_slice %394 {offsets = [0, 0], sizes = [1, 128], strides = [1, 1]} : vector<2x128xf32> to vector<1x128xf32>
    %cst_280 = arith.constant 9.99999974E-6 : f32
    %396 = vector.broadcast %cst_280 : f32 to vector<1x128xf32>
    %397 = arith.addf %393, %396 : vector<1x128xf32>
    %398 = math.rsqrt %397 : vector<1x128xf32>
    %399 = arith.mulf %395, %398 : vector<1x128xf32>
    %400 = vector.extract_strided_slice %394 {offsets = [1, 0], sizes = [1, 128], strides = [1, 1]} : vector<2x128xf32> to vector<1x128xf32>
    %401 = arith.mulf %388, %399 : vector<1x128xf32>
    %402 = arith.subf %400, %401 : vector<1x128xf32>
    %403 = vector.broadcast %399 : vector<1x128xf32> to vector<32x128xf32>
    %404 = arith.mulf %381, %403 : vector<32x128xf32>
    %405 = vector.broadcast %402 : vector<1x128xf32> to vector<32x128xf32>
    %406 = arith.addf %404, %405 : vector<32x128xf32>
    %cst_281 = arith.constant 0.00999999977 : f32
    %407 = vector.broadcast %cst_281 : f32 to vector<32x128xf32>
    %408 = arith.mulf %407, %406 : vector<32x128xf32>
    %409 = arith.maximumf %406, %408 : vector<32x128xf32>
    %410 = arith.truncf %409 : vector<32x128xf32> to vector<32x128xbf16>
    %c0_282 = arith.constant 0 : index
    %c0_283 = arith.constant 0 : index
    %c0_284 = arith.constant 0 : index
    %411 = vector.load %arg29[%c0_282, %c0_283, %c0_284] : memref<3x64x32xbf16, #tpu.memory_space<vmem>>, vector<1x64x32xbf16>
    %412 = vector.shape_cast %411 : vector<1x64x32xbf16> to vector<64x32xbf16>
    %cst_285 = arith.constant dense<0.000000e+00> : vector<64x128xf32>
    %413 = tpu.matmul %412, %410, %cst_285 {dimension_numbers = #tpu.dot_dimension_numbers<[1], [0], [0], [1], [0, 0, 1, 1], [], []>} : vector<64x32xbf16>, vector<32x128xbf16>, vector<64x128xf32> -> vector<64x128xf32>
    %414 = arith.truncf %413 : vector<64x128xf32> to vector<64x128xbf16>
    %c0_286 = arith.constant 0 : index
    %c0_287 = arith.constant 0 : index
    %c0_288 = arith.constant 0 : index
    %415 = vector.load %arg30[%c0_286, %c0_287, %c0_288] : memref<3x128x256xbf16, #tpu.memory_space<vmem>>, vector<1x128x256xbf16>
    %416 = vector.shape_cast %415 : vector<1x128x256xbf16> to vector<128x256xbf16>
    %cst_289 = arith.constant dense<0.000000e+00> : vector<64x256xf32>
    %417 = tpu.matmul %414, %416, %cst_289 {dimension_numbers = #tpu.dot_dimension_numbers<[1], [0], [0], [1], [0, 0, 1, 1], [], []>} : vector<64x128xbf16>, vector<128x256xbf16>, vector<64x256xf32> -> vector<64x256xf32>
    %c1_290 = arith.constant 1 : index
    %c0_291 = arith.constant 0 : index
    %c0_292 = arith.constant 0 : index
    %418 = vector.load %arg29[%c1_290, %c0_291, %c0_292] : memref<3x64x32xbf16, #tpu.memory_space<vmem>>, vector<1x64x32xbf16>
    %419 = vector.shape_cast %418 : vector<1x64x32xbf16> to vector<64x32xbf16>
    %cst_293 = arith.constant dense<0.000000e+00> : vector<64x128xf32>
    %420 = tpu.matmul %419, %410, %cst_293 {dimension_numbers = #tpu.dot_dimension_numbers<[1], [0], [0], [1], [0, 0, 1, 1], [], []>} : vector<64x32xbf16>, vector<32x128xbf16>, vector<64x128xf32> -> vector<64x128xf32>
    %421 = arith.truncf %420 : vector<64x128xf32> to vector<64x128xbf16>
    %c1_294 = arith.constant 1 : index
    %c0_295 = arith.constant 0 : index
    %c0_296 = arith.constant 0 : index
    %422 = vector.load %arg30[%c1_294, %c0_295, %c0_296] : memref<3x128x256xbf16, #tpu.memory_space<vmem>>, vector<1x128x256xbf16>
    %423 = vector.shape_cast %422 : vector<1x128x256xbf16> to vector<128x256xbf16>
    %cst_297 = arith.constant dense<0.000000e+00> : vector<64x256xf32>
    %424 = tpu.matmul %421, %423, %cst_297 {dimension_numbers = #tpu.dot_dimension_numbers<[1], [0], [0], [1], [0, 0, 1, 1], [], []>} : vector<64x128xbf16>, vector<128x256xbf16>, vector<64x256xf32> -> vector<64x256xf32>
    %425 = arith.addf %417, %424 : vector<64x256xf32>
    %c2_298 = arith.constant 2 : index
    %c0_299 = arith.constant 0 : index
    %c0_300 = arith.constant 0 : index
    %426 = vector.load %arg29[%c2_298, %c0_299, %c0_300] : memref<3x64x32xbf16, #tpu.memory_space<vmem>>, vector<1x64x32xbf16>
    %427 = vector.shape_cast %426 : vector<1x64x32xbf16> to vector<64x32xbf16>
    %cst_301 = arith.constant dense<0.000000e+00> : vector<64x128xf32>
    %428 = tpu.matmul %427, %410, %cst_301 {dimension_numbers = #tpu.dot_dimension_numbers<[1], [0], [0], [1], [0, 0, 1, 1], [], []>} : vector<64x32xbf16>, vector<32x128xbf16>, vector<64x128xf32> -> vector<64x128xf32>
    %429 = arith.truncf %428 : vector<64x128xf32> to vector<64x128xbf16>
    %c2_302 = arith.constant 2 : index
    %c0_303 = arith.constant 0 : index
    %c0_304 = arith.constant 0 : index
    %430 = vector.load %arg30[%c2_302, %c0_303, %c0_304] : memref<3x128x256xbf16, #tpu.memory_space<vmem>>, vector<1x128x256xbf16>
    %431 = vector.shape_cast %430 : vector<1x128x256xbf16> to vector<128x256xbf16>
    %cst_305 = arith.constant dense<0.000000e+00> : vector<64x256xf32>
    %432 = tpu.matmul %429, %431, %cst_305 {dimension_numbers = #tpu.dot_dimension_numbers<[1], [0], [0], [1], [0, 0, 1, 1], [], []>} : vector<64x128xbf16>, vector<128x256xbf16>, vector<64x256xf32> -> vector<64x256xf32>
    %433 = arith.addf %425, %432 : vector<64x256xf32>
    %cst_306 = arith.constant dense<0.000000e+00> : vector<256xf32>
    %434 = vector.multi_reduction <add>, %433, %cst_306 [0] : vector<64x256xf32> to vector<256xf32>
    %435 = vector.shape_cast %434 : vector<256xf32> to vector<1x256xf32>
    %436 = arith.mulf %433, %433 : vector<64x256xf32>
    %cst_307 = arith.constant dense<0.000000e+00> : vector<256xf32>
    %437 = vector.multi_reduction <add>, %436, %cst_307 [0] : vector<64x256xf32> to vector<256xf32>
    %438 = vector.shape_cast %437 : vector<256xf32> to vector<1x256xf32>
    %c0_308 = arith.constant 0 : index
    %c0_309 = arith.constant 0 : index
    %439 = vector.load %arg31[%c0_308, %c0_309] : memref<258x256xf32, #tpu.memory_space<vmem>>, vector<256x256xf32>
    %cst_310 = arith.constant dense<0.000000e+00> : vector<1x256xf32>
    %440 = tpu.matmul %435, %439, %cst_310 {dimension_numbers = #tpu.dot_dimension_numbers<[1], [0], [0], [1], [0, 0, 1, 1], [], []>} : vector<1x256xf32>, vector<256x256xf32>, vector<1x256xf32> -> vector<1x256xf32>
    %cst_311 = arith.constant dense<0.000000e+00> : vector<1x256xf32>
    %441 = tpu.matmul %438, %439, %cst_311 {dimension_numbers = #tpu.dot_dimension_numbers<[1], [0], [0], [1], [0, 0, 1, 1], [], []>} : vector<1x256xf32>, vector<256x256xf32>, vector<1x256xf32> -> vector<1x256xf32>
    %442 = arith.mulf %440, %440 : vector<1x256xf32>
    %443 = arith.subf %441, %442 : vector<1x256xf32>
    %cst_312 = arith.constant 0.000000e+00 : f32
    %444 = vector.broadcast %cst_312 : f32 to vector<1x256xf32>
    %445 = arith.maximumf %443, %444 : vector<1x256xf32>
    %c256 = arith.constant 256 : index
    %c0_313 = arith.constant 0 : index
    %446 = vector.load %arg31[%c256, %c0_313] : memref<258x256xf32, #tpu.memory_space<vmem>>, vector<2x256xf32>
    %447 = vector.extract_strided_slice %446 {offsets = [0, 0], sizes = [1, 256], strides = [1, 1]} : vector<2x256xf32> to vector<1x256xf32>
    %cst_314 = arith.constant 9.99999974E-6 : f32
    %448 = vector.broadcast %cst_314 : f32 to vector<1x256xf32>
    %449 = arith.addf %445, %448 : vector<1x256xf32>
    %450 = math.rsqrt %449 : vector<1x256xf32>
    %451 = arith.mulf %447, %450 : vector<1x256xf32>
    %452 = vector.extract_strided_slice %446 {offsets = [1, 0], sizes = [1, 256], strides = [1, 1]} : vector<2x256xf32> to vector<1x256xf32>
    %453 = arith.mulf %440, %451 : vector<1x256xf32>
    %454 = arith.subf %452, %453 : vector<1x256xf32>
    %455 = vector.broadcast %451 : vector<1x256xf32> to vector<64x256xf32>
    %456 = arith.mulf %433, %455 : vector<64x256xf32>
    %457 = vector.broadcast %454 : vector<1x256xf32> to vector<64x256xf32>
    %458 = arith.addf %456, %457 : vector<64x256xf32>
    %cst_315 = arith.constant 0.00999999977 : f32
    %459 = vector.broadcast %cst_315 : f32 to vector<64x256xf32>
    %460 = arith.mulf %459, %458 : vector<64x256xf32>
    %461 = arith.maximumf %458, %460 : vector<64x256xf32>
    %462 = arith.truncf %461 : vector<64x256xf32> to vector<64x256xbf16>
    %c0_316 = arith.constant 0 : index
    %c0_317 = arith.constant 0 : index
    %c0_318 = arith.constant 0 : index
    %463 = vector.load %arg32[%c0_316, %c0_317, %c0_318] : memref<5x56x64xbf16, #tpu.memory_space<vmem>>, vector<1x56x64xbf16>
    %464 = vector.shape_cast %463 : vector<1x56x64xbf16> to vector<56x64xbf16>
    %cst_319 = arith.constant dense<0.000000e+00> : vector<56x256xf32>
    %465 = tpu.matmul %464, %462, %cst_319 {dimension_numbers = #tpu.dot_dimension_numbers<[1], [0], [0], [1], [0, 0, 1, 1], [], []>} : vector<56x64xbf16>, vector<64x256xbf16>, vector<56x256xf32> -> vector<56x256xf32>
    %466 = arith.truncf %465 : vector<56x256xf32> to vector<56x256xbf16>
    %c0_320 = arith.constant 0 : index
    %c0_321 = arith.constant 0 : index
    %c0_322 = arith.constant 0 : index
    %467 = vector.load %arg33[%c0_320, %c0_321, %c0_322] : memref<5x256x28xbf16, #tpu.memory_space<vmem>>, vector<1x256x28xbf16>
    %468 = vector.shape_cast %467 : vector<1x256x28xbf16> to vector<256x28xbf16>
    %cst_323 = arith.constant dense<0.000000e+00> : vector<56x28xf32>
    %469 = tpu.matmul %466, %468, %cst_323 {dimension_numbers = #tpu.dot_dimension_numbers<[1], [0], [0], [1], [0, 0, 1, 1], [], []>} : vector<56x256xbf16>, vector<256x28xbf16>, vector<56x28xf32> -> vector<56x28xf32>
    %c1_324 = arith.constant 1 : index
    %c0_325 = arith.constant 0 : index
    %c0_326 = arith.constant 0 : index
    %470 = vector.load %arg32[%c1_324, %c0_325, %c0_326] : memref<5x56x64xbf16, #tpu.memory_space<vmem>>, vector<1x56x64xbf16>
    %471 = vector.shape_cast %470 : vector<1x56x64xbf16> to vector<56x64xbf16>
    %cst_327 = arith.constant dense<0.000000e+00> : vector<56x256xf32>
    %472 = tpu.matmul %471, %462, %cst_327 {dimension_numbers = #tpu.dot_dimension_numbers<[1], [0], [0], [1], [0, 0, 1, 1], [], []>} : vector<56x64xbf16>, vector<64x256xbf16>, vector<56x256xf32> -> vector<56x256xf32>
    %473 = arith.truncf %472 : vector<56x256xf32> to vector<56x256xbf16>
    %c1_328 = arith.constant 1 : index
    %c0_329 = arith.constant 0 : index
    %c0_330 = arith.constant 0 : index
    %474 = vector.load %arg33[%c1_328, %c0_329, %c0_330] : memref<5x256x28xbf16, #tpu.memory_space<vmem>>, vector<1x256x28xbf16>
    %475 = vector.shape_cast %474 : vector<1x256x28xbf16> to vector<256x28xbf16>
    %cst_331 = arith.constant dense<0.000000e+00> : vector<56x28xf32>
    %476 = tpu.matmul %473, %475, %cst_331 {dimension_numbers = #tpu.dot_dimension_numbers<[1], [0], [0], [1], [0, 0, 1, 1], [], []>} : vector<56x256xbf16>, vector<256x28xbf16>, vector<56x28xf32> -> vector<56x28xf32>
    %477 = arith.addf %469, %476 : vector<56x28xf32>
    %c2_332 = arith.constant 2 : index
    %c0_333 = arith.constant 0 : index
    %c0_334 = arith.constant 0 : index
    %478 = vector.load %arg32[%c2_332, %c0_333, %c0_334] : memref<5x56x64xbf16, #tpu.memory_space<vmem>>, vector<1x56x64xbf16>
    %479 = vector.shape_cast %478 : vector<1x56x64xbf16> to vector<56x64xbf16>
    %cst_335 = arith.constant dense<0.000000e+00> : vector<56x256xf32>
    %480 = tpu.matmul %479, %462, %cst_335 {dimension_numbers = #tpu.dot_dimension_numbers<[1], [0], [0], [1], [0, 0, 1, 1], [], []>} : vector<56x64xbf16>, vector<64x256xbf16>, vector<56x256xf32> -> vector<56x256xf32>
    %481 = arith.truncf %480 : vector<56x256xf32> to vector<56x256xbf16>
    %c2_336 = arith.constant 2 : index
    %c0_337 = arith.constant 0 : index
    %c0_338 = arith.constant 0 : index
    %482 = vector.load %arg33[%c2_336, %c0_337, %c0_338] : memref<5x256x28xbf16, #tpu.memory_space<vmem>>, vector<1x256x28xbf16>
    %483 = vector.shape_cast %482 : vector<1x256x28xbf16> to vector<256x28xbf16>
    %cst_339 = arith.constant dense<0.000000e+00> : vector<56x28xf32>
    %484 = tpu.matmul %481, %483, %cst_339 {dimension_numbers = #tpu.dot_dimension_numbers<[1], [0], [0], [1], [0, 0, 1, 1], [], []>} : vector<56x256xbf16>, vector<256x28xbf16>, vector<56x28xf32> -> vector<56x28xf32>
    %485 = arith.addf %477, %484 : vector<56x28xf32>
    %c3 = arith.constant 3 : index
    %c0_340 = arith.constant 0 : index
    %c0_341 = arith.constant 0 : index
    %486 = vector.load %arg32[%c3, %c0_340, %c0_341] : memref<5x56x64xbf16, #tpu.memory_space<vmem>>, vector<1x56x64xbf16>
    %487 = vector.shape_cast %486 : vector<1x56x64xbf16> to vector<56x64xbf16>
    %cst_342 = arith.constant dense<0.000000e+00> : vector<56x256xf32>
    %488 = tpu.matmul %487, %462, %cst_342 {dimension_numbers = #tpu.dot_dimension_numbers<[1], [0], [0], [1], [0, 0, 1, 1], [], []>} : vector<56x64xbf16>, vector<64x256xbf16>, vector<56x256xf32> -> vector<56x256xf32>
    %489 = arith.truncf %488 : vector<56x256xf32> to vector<56x256xbf16>
    %c3_343 = arith.constant 3 : index
    %c0_344 = arith.constant 0 : index
    %c0_345 = arith.constant 0 : index
    %490 = vector.load %arg33[%c3_343, %c0_344, %c0_345] : memref<5x256x28xbf16, #tpu.memory_space<vmem>>, vector<1x256x28xbf16>
    %491 = vector.shape_cast %490 : vector<1x256x28xbf16> to vector<256x28xbf16>
    %cst_346 = arith.constant dense<0.000000e+00> : vector<56x28xf32>
    %492 = tpu.matmul %489, %491, %cst_346 {dimension_numbers = #tpu.dot_dimension_numbers<[1], [0], [0], [1], [0, 0, 1, 1], [], []>} : vector<56x256xbf16>, vector<256x28xbf16>, vector<56x28xf32> -> vector<56x28xf32>
    %493 = arith.addf %485, %492 : vector<56x28xf32>
    %c4 = arith.constant 4 : index
    %c0_347 = arith.constant 0 : index
    %c0_348 = arith.constant 0 : index
    %494 = vector.load %arg32[%c4, %c0_347, %c0_348] : memref<5x56x64xbf16, #tpu.memory_space<vmem>>, vector<1x56x64xbf16>
    %495 = vector.shape_cast %494 : vector<1x56x64xbf16> to vector<56x64xbf16>
    %cst_349 = arith.constant dense<0.000000e+00> : vector<56x256xf32>
    %496 = tpu.matmul %495, %462, %cst_349 {dimension_numbers = #tpu.dot_dimension_numbers<[1], [0], [0], [1], [0, 0, 1, 1], [], []>} : vector<56x64xbf16>, vector<64x256xbf16>, vector<56x256xf32> -> vector<56x256xf32>
    %497 = arith.truncf %496 : vector<56x256xf32> to vector<56x256xbf16>
    %c4_350 = arith.constant 4 : index
    %c0_351 = arith.constant 0 : index
    %c0_352 = arith.constant 0 : index
    %498 = vector.load %arg33[%c4_350, %c0_351, %c0_352] : memref<5x256x28xbf16, #tpu.memory_space<vmem>>, vector<1x256x28xbf16>
    %499 = vector.shape_cast %498 : vector<1x256x28xbf16> to vector<256x28xbf16>
    %cst_353 = arith.constant dense<0.000000e+00> : vector<56x28xf32>
    %500 = tpu.matmul %497, %499, %cst_353 {dimension_numbers = #tpu.dot_dimension_numbers<[1], [0], [0], [1], [0, 0, 1, 1], [], []>} : vector<56x256xbf16>, vector<256x28xbf16>, vector<56x28xf32> -> vector<56x28xf32>
    %501 = arith.addf %493, %500 : vector<56x28xf32>
    %c0_354 = arith.constant 0 : index
    %c0_355 = arith.constant 0 : index
    %502 = vector.load %arg34[%c0_354, %c0_355] : memref<1x28xf32, #tpu.memory_space<vmem>>, vector<1x28xf32>
    %503 = vector.broadcast %502 : vector<1x28xf32> to vector<56x28xf32>
    %504 = arith.addf %501, %503 : vector<56x28xf32>
    %cst_356 = arith.constant 0.000000e+00 : f32
    %505 = vector.broadcast %cst_356 : f32 to vector<56x28xf32>
    %506 = arith.subf %505, %504 : vector<56x28xf32>
    %507 = math.exp %506 : vector<56x28xf32>
    %cst_357 = arith.constant 1.000000e+00 : f32
    %508 = vector.broadcast %cst_357 : f32 to vector<56x28xf32>
    %509 = arith.addf %508, %507 : vector<56x28xf32>
    %510 = tpu.reciprocal %509 {approx = true} : vector<56x28xf32> -> vector<56x28xf32>
    %cst_358 = arith.constant 0.000000e+00 : f32
    %cst_359 = arith.constant 1.000000e+00 : f32
    %511 = vector.broadcast %cst_358 : f32 to vector<56x28xf32>
    %512 = arith.maximumf %511, %510 : vector<56x28xf32>
    %513 = vector.broadcast %cst_359 : f32 to vector<56x28xf32>
    %514 = arith.minimumf %513, %512 : vector<56x28xf32>
    %c0_360 = arith.constant 0 : index
    %c0_361 = arith.constant 0 : index
    %515 = vector.load %arg36[%c0_360, %c0_361] : memref<56x28xf32, #tpu.memory_space<vmem>>, vector<56x28xf32>
    tpu.vector_store %arg36[%c0_360, %c0_361], %514 {strides = array<i32>} : memref<56x28xf32, #tpu.memory_space<vmem>>, vector<56x28xf32>,
    return
  }
}

</mosaic_0001>

<bundles_post_ra>
// kernel: fused_forward.1
= control target key start
LH: loop header
LB: loop body
LE: loop exit
PB: predicated region body
PF: predicated region fallthrough
CT: control target
= control target key end

     0   :  { %s10843_s6 = smov 1   ;;  %s10844_s10 = smov 2   ;;  %s12375_s0 = inlined_call_operand.smem [shape: u32[37], index: -1, kind: input, shape index: {}] }
   0x1   :  { %s10910_s5 = sld [smem:[%s12375_s0]]   ;;  %s10845_s14 = smov 3  }
   0x2   :  { %s10915_s9 = sld [smem:[%s12375_s0 + %s10843_s6]]   ;;  %s10846_s18 = smov 4  }
   0x3   :  { %s10920_s13 = sld [smem:[%s12375_s0 + %s10844_s10]]   ;;  %s10847_s22 = smov 5  }
   0x4   :  { %s10925_s17 = sld [smem:[%s12375_s0 + %s10845_s14]]   ;;  %s10848_s26 = smov 6  }
   0x5   :  { %s10930_s21 = sld [smem:[%s12375_s0 + %s10846_s18]]   ;;  %s10849_s30 = smov 7  }
   0x6   :  { %s10935_s25 = sld [smem:[%s12375_s0 + %s10847_s22]]   ;;  %s10850_s4 = smov 8  }
   0x7   :  { %s10940_s29 = sld [smem:[%s12375_s0 + %s10848_s26]]   ;;  %s10851_s10 = smov 9  }
   0x8   :  { %s10945_s3 = sld [smem:[%s12375_s0 + %s10849_s30]]   ;;  %s10852_s15 = smov 10  }
   0x9   :  { %s10950_s8 = sld [smem:[%s12375_s0 + %s10850_s4]]   ;;  %s10853_s20 = smov 11  }
   0xa   :  { %s10955_s14 = sld [smem:[%s12375_s0 + %s10851_s10]]   ;;  %s10854_s26 = smov 12  }
   0xb   :  { %s10960_s19 = sld [smem:[%s12375_s0 + %s10852_s15]]   ;;  %s10855_s1 = smov 13  }
   0xc   :  { %s10965_s24 = sld [smem:[%s12375_s0 + %s10853_s20]]   ;;  %s10856_s7 = smov 14  }
   0xd   :  { %s10970_s30 = sld [smem:[%s12375_s0 + %s10854_s26]]   ;;  %s10857_s15 = smov 15  }
   0xe   :  { %s10975_s6 = sld [smem:[%s12375_s0 + %s10855_s1]]   ;;  %s10858_s22 = smov 16  }
   0xf   :  { %12395 = sst [smem:[#allocation30_spill]] %s10950_s8  ;;  %s10859_s28 = smov 17  }
  0x10   :  { %12396 = sst [smem:[#allocation31_spill]] %s10955_s14 }
  0x11   :  { %s10980_s12 = sld [smem:[%s12375_s0 + %s10856_s7]]   ;;  %s10860_s7 = smov 18  }
  0x12   :  { %12397 = sst [smem:[#allocation32_spill]] %s10965_s24 }
  0x13   :  { %12398 = sst [smem:[#allocation33_spill]] %s10970_s30 }
  0x14   :  { %s10985_s20 = sld [smem:[%s12375_s0 + %s10857_s15]]   ;;  %s10861_s15 = smov 19  }
  0x15   :  { %s10990_s27 = sld [smem:[%s12375_s0 + %s10858_s22]]   ;;  %s10862_s22 = smov 20  }
  0x16   :  { %s10995_s4 = sld [smem:[%s12375_s0 + %s10859_s28]]   ;;  %s10863_s28 = smov 21  }
  0x17   :  { %s11000_s30 = sld [smem:[%s12375_s0 + %s10860_s7]]   ;;  %s10864_s7 = smov 22  }
  0x18   :  { %s11005_s24 = sld [smem:[%s12375_s0 + %s10861_s15]]   ;;  %s10865_s15 = smov 23  }
  0x19   :  { %s11010_s14 = sld [smem:[%s12375_s0 + %s10862_s22]]   ;;  %s10866_s22 = smov 24  }
  0x1a   :  { %s11015_s8 = sld [smem:[%s12375_s0 + %s10863_s28]]   ;;  %s10867_s28 = smov 25  }
  0x1d   :  { %12399 = sst [smem:[#allocation34_spill]] %s11000_s30 }
  0x1e   :  { %12400 = sst [smem:[#allocation35_spill]] %s11005_s24 }
  0x1f   :  { %12401 = sst [smem:[#allocation36_spill]] %s11010_s14 }
  0x20   :  { %12402 = sst [smem:[#allocation37_spill]] %s11015_s8 }
  0x21   :  { %s11020_s30 = sld [smem:[%s12375_s0 + %s10864_s7]]   ;;  %s10868_s7 = smov 26  }
  0x22   :  { %s11025_s24 = sld [smem:[%s12375_s0 + %s10865_s15]]   ;;  %s10869_s15 = smov 27  }
  0x23   :  { %s11030_s14 = sld [smem:[%s12375_s0 + %s10866_s22]]   ;;  %s10870_s22 = smov 28  }
  0x24   :  { %s11035_s8 = sld [smem:[%s12375_s0 + %s10867_s28]]   ;;  %s10871_s28 = smov 29  }
  0x27   :  { %12403 = sst [smem:[#allocation38_spill]] %s11020_s30 }
  0x28   :  { %12404 = sst [smem:[#allocation39_spill]] %s11025_s24 }
  0x29   :  { %12405 = sst [smem:[#allocation40_spill]] %s11030_s14 }
  0x2a   :  { %12406 = sst [smem:[#allocation41_spill]] %s11035_s8 }
  0x2b   :  { %s11040_s30 = sld [smem:[%s12375_s0 + %s10868_s7]]   ;;  %s10872_s7 = smov 30  }
  0x2c   :  { %s11045_s24 = sld [smem:[%s12375_s0 + %s10869_s15]]   ;;  %s10873_s15 = smov 31  }
  0x2d   :  { %s11050_s14 = sld [smem:[%s12375_s0 + %s10870_s22]]   ;;  %s10874_s22 = smov 32  }
  0x2e   :  { %s11055_s8 = sld [smem:[%s12375_s0 + %s10871_s28]]   ;;  %s10875_s28 = smov 33  }
  0x31   :  { %12407 = sst [smem:[#allocation42_spill]] %s11040_s30 }
  0x32   :  { %12408 = sst [smem:[#allocation43_spill]] %s11045_s24 }
  0x33   :  { %12409 = sst [smem:[#allocation44_spill]] %s11050_s14 }
  0x34   :  { %12410 = sst [smem:[#allocation45_spill]] %s11055_s8 }
  0x35   :  { %s11060_s30 = sld [smem:[%s12375_s0 + %s10872_s7]]   ;;  %s10876_s7 = smov 34  }
  0x36   :  { %s11065_s24 = sld [smem:[%s12375_s0 + %s10873_s15]]   ;;  %s10877_s15 = smov 35  }
  0x37   :  { %s11070_s14 = sld [smem:[%s12375_s0 + %s10874_s22]]   ;;  %s10878_s22 = smov 36  }
  0x38   :  { %s11075_s8 = sld [smem:[%s12375_s0 + %s10875_s28]]  }
  0x3b   :  { %12411 = sst [smem:[#allocation46_spill]] %s11060_s30 }
  0x3c   :  { %12412 = sst [smem:[#allocation47_spill]] %s11065_s24 }
  0x3d   :  { %12413 = sst [smem:[#allocation48_spill]] %s11070_s14 }
  0x3e   :  { %s11080_s30 = sld [smem:[%s12375_s0 + %s10876_s7]]  }
  0x3f   :  { %s11085_s24 = sld [smem:[%s12375_s0 + %s10877_s15]]  }
  0x40   :  { %s11090_s14 = sld [smem:[%s12375_s0 + %s10878_s22]]  }
  0x41   :  { %79 = vsyncpa [#allocation3], 0 }
  0x42   :  { %80 = vsyncpa [#allocation6], 0 }
  0x43   :  { %81 = vsyncpa [#allocation9], 0 }
  0x44   :  { %82 = vsyncpa [#allocation12], 0 }
  0x45   :  { %83 = vsyncpa [#allocation15], 0 }
  0x46   :  { %84 = vsyncpa [#allocation18], 0 }
  0x47   :  { %85 = vsyncpa [#allocation4], 0 }
  0x48   :  { %86 = vsyncpa [#allocation21], 0  ;;  %s10879_s28 = smov [#allocation5]   ;;  %s10880_s2 = smov [#allocation8]  }
  0x49   :  { %s106_s1 = sshll.u32 %s10879_s28, 4  ;;  %s136_s7 = sshll.u32 %s10880_s2, 4  ;;  %s107_s1 = int_to_ptr.vmem [resolvable:$true] %s106_s1  ;;  %s137_s7 = int_to_ptr.vmem [resolvable:$true] %s136_s7 }
  0x4a   :  { %s10595_s10 = scalar_lea.vmem %s107_s1, 768  ;;  %p10600_p1 = scmp.lt.s32.totalorder %s107_s1, %s107_s1 }
  0x4b   :  { %p10596_p0 = scmp.ne.s32.totalorder %s107_s1, %s10595_s10  ;;  %p10601_p2 = scmp.lt.s32.totalorder %s10595_s10, %s10595_s10 }
  0x4d   :  { %p10602_p3 = por %p10601_p2, %p10600_p1 }
  0x4f   :  { %p10603_p4 = pnand %p10602_p3, %p10596_p0 }
  0x51   :  { %10606 = shalt.err (!%p10603_p4)
}
  0x52   :  { %s10881_s0 = smov 64   ;;  %s10882_s11 = smov 4  }
  0x53   :  { %112 = dma.hbm_to_vmem [thread:$0]  %s10920_s13, 768, %s107_s1, [#allocation6], %s10881_s0, %s10881_s0, %s10882_s11  }
  0x54   :  { %s10615_s15 = scalar_lea.vmem %s137_s7, 192  ;;  %p10620_p6 = scmp.lt.s32.totalorder %s137_s7, %s137_s7 }
  0x55   :  { %p10616_p5 = scmp.ne.s32.totalorder %s137_s7, %s10615_s15  ;;  %p10621_p7 = scmp.lt.s32.totalorder %s10615_s15, %s10615_s15 }
  0x57   :  { %p10622_p8 = por %p10621_p7, %p10620_p6 }
  0x59   :  { %p10623_p9 = pnand %p10622_p8, %p10616_p5 }
  0x5b   :  { %10626 = shalt.err (!%p10623_p9)
}
  0x5c   :  { %142 = dma.hbm_to_vmem [thread:$0]  %s10945_s3, 192, %s137_s7, [#allocation9], %s10881_s0, %s10881_s0, %s10882_s11  }
  0x5d   :  { %s10883_s16 = smov [#allocation11]  }
  0x5e   :  { %s168_s18 = sshll.u32 %s10883_s16, 4  ;;  %s169_s18 = int_to_ptr.vmem [resolvable:$true] %s168_s18 }
  0x5f   :  { %s10635_s22 = scalar_lea.vmem %s169_s18, 32  ;;  %p10640_p11 = scmp.lt.s32.totalorder %s169_s18, %s169_s18 }
  0x60   :  { %p10636_p10 = scmp.ne.s32.totalorder %s169_s18, %s10635_s22  ;;  %p10641_p12 = scmp.lt.s32.totalorder %s10635_s22, %s10635_s22 }
  0x62   :  { %p10642_p13 = por %p10641_p12, %p10640_p11 }
  0x64   :  { %p10643_p0 = pnand %p10642_p13, %p10636_p10 }
  0x66   :  { %10646 = shalt.err (!%p10643_p0)
}
  0x67   :  { %s10884_s13 = smov 16   ;;  %s10885_s23 = smov 1  }
  0x68   :  { %174 = dma.hbm_to_vmem [thread:$0]  %s10975_s6, 32, %s169_s18, [#allocation12], %s10884_s13, %s10884_s13, %s10885_s23  }
  0x69   :  { %s10886_s26 = smov [#allocation14]   ;;  %s10887_s1 = smov [#allocation2]  }
  0x6a   :  { %s193_s28 = sshll.u32 %s10886_s26, 4  ;;  %s94_s2 = sshll.u32 %s10887_s1, 4  ;;  %s194_s28 = int_to_ptr.vmem [resolvable:$true] %s193_s28  ;;  %s95_s2 = int_to_ptr.vmem [resolvable:$true] %s94_s2 }
  0x6b   :  { %s10655_s3 = scalar_lea.vmem %s194_s28, 16  ;;  %s10659_s7 = scalar_lea.vmem %s194_s28, 32 }
  0x6c   :  { %p10656_p1 = scmp.ne.s32.totalorder %s194_s28, %s10655_s3  ;;  %p10660_p2 = scmp.lt.s32.totalorder %s194_s28, %s194_s28 }
  0x6d   :  { %p10661_p3 = scmp.lt.s32.totalorder %s10659_s7, %s10655_s3 }
  0x6f   :  { %p10662_p4 = por %p10661_p3, %p10660_p2 }
  0x71   :  { %p10663_p5 = pnand %p10662_p4, %p10656_p1 }
  0x73   :  { %10666 = shalt.err (!%p10663_p5)
}
  0x74   :  { %196 = dma.hbm_to_vmem [thread:$0]  %s10985_s20, 16, %s194_s28, [#allocation15]  }
  0x75   :  { %s10675_s10 = scalar_lea.vmem %s95_s2, 768  ;;  %p10680_p7 = scmp.lt.s32.totalorder %s95_s2, %s95_s2 }
  0x76   :  { %p10676_p6 = scmp.ne.s32.totalorder %s95_s2, %s10675_s10  ;;  %p10681_p8 = scmp.lt.s32.totalorder %s10675_s10, %s10675_s10 }
  0x78   :  { %p10682_p9 = por %p10681_p8, %p10680_p7 }
  0x7a   :  { %p10683_p10 = pnand %p10682_p9, %p10676_p6 }
  0x7c   :  { %10686 = shalt.err (!%p10683_p10)
}
  0x7d   :  { %100 = dma.hbm_to_vmem [thread:$0]  %s10915_s9, 768, %s95_s2, [#allocation3], %s10881_s0, %s10881_s0, %s10882_s11  }
  0x7e   :  { %s10888_s6 = smov [#allocation7]   ;;  %s10889_s16 = smov [#allocation10]  }
  0x7f   :  { %s120_s15 = sshll.u32 %s10888_s6, 4  ;;  %s152_s18 = sshll.u32 %s10889_s16, 4  ;;  %s121_s15 = int_to_ptr.vmem [resolvable:$true] %s120_s15  ;;  %s153_s18 = int_to_ptr.vmem [resolvable:$true] %s152_s18 }
  0x80   :  { %s10695_s22 = scalar_lea.vmem %s121_s15, 384  ;;  %p10700_p12 = scmp.lt.s32.totalorder %s121_s15, %s121_s15 }
  0x81   :  { %p10696_p11 = scmp.ne.s32.totalorder %s121_s15, %s10695_s22  ;;  %p10701_p13 = scmp.lt.s32.totalorder %s10695_s22, %s10695_s22 }
  0x83   :  { %p10702_p0 = por %p10701_p13, %p10700_p12 }
  0x85   :  { %p10703_p1 = pnand %p10702_p0, %p10696_p11 }
  0x87   :  { %10706 = shalt.err (!%p10703_p1)
}
  0x88   :  { %126 = dma.hbm_to_vmem [thread:$0]  %s10930_s21, 384, %s121_s15, [#allocation6], %s10881_s0, %s10881_s0, %s10882_s11  }
  0x89   :  { %s10715_s20 = scalar_lea.vmem %s153_s18, 96  ;;  %p10720_p3 = scmp.lt.s32.totalorder %s153_s18, %s153_s18 }
  0x8a   :  { %p10716_p2 = scmp.ne.s32.totalorder %s153_s18, %s10715_s20  ;;  %p10721_p4 = scmp.lt.s32.totalorder %s10715_s20, %s10715_s20 }
  0x8c   :  { %p10722_p5 = por %p10721_p4, %p10720_p3 }
  0x8e   :  { %p10723_p6 = pnand %p10722_p5, %p10716_p2 }
  0x90   :  { %10726 = shalt.err (!%p10723_p6)
}
  0x91   :  { %s10890_s9 = smov 32   ;;  %s10891_s13 = smov 2  }
  0x92   :  { %158 = dma.hbm_to_vmem [thread:$0]  %s10960_s19, 96, %s153_s18, [#allocation9], %s10890_s9, %s10890_s9, %s10891_s13  }
  0x93   :  { %s10892_s23 = smov [#allocation13]   ;;  %s10893_s28 = smov [#allocation16]  }
  0x94   :  { %s180_s26 = sshll.u32 %s10892_s23, 4  ;;  %s202_s1 = sshll.u32 %s10893_s28, 4  ;;  %s181_s26 = int_to_ptr.vmem [resolvable:$true] %s180_s26  ;;  %s203_s1 = int_to_ptr.vmem [resolvable:$true] %s202_s1 }
  0x95   :  { %s10735_s2 = scalar_lea.vmem %s181_s26, 512  ;;  %p10740_p8 = scmp.lt.s32.totalorder %s181_s26, %s181_s26 }
  0x96   :  { %p10736_p7 = scmp.ne.s32.totalorder %s181_s26, %s10735_s2  ;;  %p10741_p9 = scmp.lt.s32.totalorder %s10735_s2, %s10735_s2 }
  0x98   :  { %p10742_p10 = por %p10741_p9, %p10740_p8 }
  0x9a   :  { %p10743_p11 = pnand %p10742_p10, %p10736_p7 }
  0x9c   :  { %10746 = shalt.err (!%p10743_p11)
}
  0x9d   :  { %186 = dma.hbm_to_vmem [thread:$0]  %s10980_s12, 512, %s181_s26, [#allocation12], %s10881_s0, %s10881_s0, %s10882_s11  }
  0x9e   :  { %s10755_s21 = scalar_lea.vmem %s203_s1, 512  ;;  %p10760_p13 = scmp.lt.s32.totalorder %s203_s1, %s203_s1 }
  0x9f   :  { %p10756_p12 = scmp.ne.s32.totalorder %s203_s1, %s10755_s21  ;;  %p10761_p0 = scmp.lt.s32.totalorder %s10755_s21, %s10755_s21 }
  0xa1   :  { %p10762_p1 = por %p10761_p0, %p10760_p13 }
  0xa3   :  { %p10763_p2 = pnand %p10762_p1, %p10756_p12 }
  0xa5   :  { %10766 = shalt.err (!%p10763_p2)
}
  0xa6   :  { %208 = dma.hbm_to_vmem [thread:$0]  %s10990_s27, 512, %s203_s1, [#allocation15], %s10881_s0, %s10881_s0, %s10882_s11  }
  0xa7   :  { %s10894_s19 = smov [#allocation17]  }
  0xa8   :  { %s215_s3 = sshll.u32 %s10894_s19, 4  ;;  %s216_s3 = int_to_ptr.vmem [resolvable:$true] %s215_s3 }
  0xa9   :  { %s10775_s7 = scalar_lea.vmem %s216_s3, 16  ;;  %s10779_s10 = scalar_lea.vmem %s216_s3, 32 }
  0xaa   :  { %p10776_p3 = scmp.ne.s32.totalorder %s216_s3, %s10775_s7  ;;  %p10780_p4 = scmp.lt.s32.totalorder %s216_s3, %s216_s3 }
  0xab   :  { %p10781_p5 = scmp.lt.s32.totalorder %s10779_s10, %s10775_s7 }
  0xad   :  { %p10782_p6 = por %p10781_p5, %p10780_p4 }
  0xaf   :  { %p10783_p7 = pnand %p10782_p6, %p10776_p3 }
  0xb1   :  { %10786 = shalt.err (!%p10783_p7)
}
  0xb2   :  { %218 = dma.hbm_to_vmem [thread:$0]  %s10995_s4, 16, %s216_s3, [#allocation18]  }
  0xb3   :  { %10827 = dma.done.wait [#allocation3], 768  }
  0xb4   :  { %10828 = vsyncadd [#allocation3], 4294966528 }
  0xb5   :  { %10829 = dma.done.wait [#allocation6], 1152  }
  0xb6   :  { %10830 = vsyncadd [#allocation6], 4294966144 }
  0xb7   :  { %10831 = dma.done.wait [#allocation9], 288  }
  0xb8   :  { %10832 = vsyncadd [#allocation9], 4294967008 }
  0xb9   :  { %10833 = dma.done.wait [#allocation12], 544  }
  0xba   :  { %10834 = vsyncadd [#allocation12], 4294966752 }
  0xbb   :  { %10835 = dma.done.wait [#allocation15], 528  }
  0xbc   :  { %10836 = vsyncadd [#allocation15], 4294966768 }
  0xbd   :  { %10837 = dma.done.wait [#allocation18], 16  }
  0xbe   :  { %10838 = vsyncadd [#allocation18], 4294967280  ;;  %v290_v0 = vld [vmem:[%s10910_s5 + $0x30] sm:$0xff]  ;;  %v291_v1 = vld [vmem:[%s10910_s5 + $0x38] sm:$0xff]  ;;  %vm310_vm0 = vcmask 523264   ;;  %vm461_vm1 = vcmask 261120  }
  0xbf   :  { %v288_v2 = vld [vmem:[%s10910_s5 + $0x20] sm:$0xff]  ;;  %v11123_v3 = vpack.c.bf16 %v291_v1, %v290_v0  ;;  %v289_v4 = vld [vmem:[%s10910_s5 + $0x28] sm:$0xff]  ;;  %v286_v6 = vld [vmem:[%s10910_s5 + $0x10] sm:$0xff]  ;;  %v10895_v36 = vmov 0.0   ;;  %vm10896_vm2 = vmmov 0   ;;  %vm1629_vm3 = vcmask 130048  }
  0xc0   :  { %v11126_v5 = vpack.c.bf16 %v289_v4, %v288_v2  ;;  %v287_v7 = vld [vmem:[%s10910_s5 + $0x18] sm:$0xff]  ;;  %v10237_v8 = vld [vmem:[#allocation2] sm:$0xff]   ;;  %v10238_v9 = vld [vmem:[#allocation2 + $0x10] sm:$0xff]   ;;  %vm2193_vm4 = vcmask 1043456   ;;  %vm2189_vm5 = vcmask 64512   ;;  %vm2558_vm6 = vcmask 257024  }
  0xc1   :  { %9350 = vmatprep.subr.bf16.mxu0 %v11123_v3  ;;  %9362 = vmatprep.subr.bf16.mxu1 %v11123_v3  ;;  %v293_v10 = vpack.c.bf16 %v287_v7, %v286_v6  ;;  %v284_v11 = vld [vmem:[%s10910_s5] sm:$0xff]  ;;  %v285_v12 = vld [vmem:[%s10910_s5 + $0x8] sm:$0xff]  ;;  %v10240_v15 = vld [vmem:[#allocation2 + $0x18] sm:$0xff]   ;;  %s12414_s5 = sld [smem:[#allocation30_spill]]  ;;  %vm2754_vm7 = vcmask 1041408   ;;  %vm2750_vm8 = vcmask 31744  }
  0xc2   :  { %9351 = vmatpush3.bf16.msra.mxu0 %v11123_v3  ;;  %9363 = vmatpush3.bf16.msra.mxu1 %v11123_v3  ;;  %v292_v13 = vpack.c.bf16 %v285_v12, %v284_v11  ;;  %v10239_v14 = vld [vmem:[#allocation2 + $0x8] sm:$0xff]   ;;  %v10242_v17 = vld [vmem:[#allocation5 + $0x8] sm:$0xff]   ;;  %v10243_v18 = vld [vmem:[#allocation5 + $0x10] sm:$0xff]   ;;  %s12418_s12 = sld [smem:[#allocation34_spill]]  ;;  %vm2973_vm9 = vcmask 517120   ;;  %vm3217_vm10 = vcmask 1040384  }
  0xc3   :  { %9352 = vmatprep.subr.bf16.mxu0 %v11126_v5  ;;  %9364 = vmatprep.subr.bf16.mxu1 %v11126_v5  ;;  %v10241_v16 = vld [vmem:[#allocation5 + $0x18] sm:$0xff]   ;;  %v10244_v19 = vld [vmem:[#allocation5] sm:$0xff]   ;;  %v10245_v31 = vld [vmem:[#allocation2 + $0x20] sm:$0xff]   ;;  %s12419_s27 = sld [smem:[#allocation35_spill]]  ;;  %vm3213_vm11 = vcmask 15360  }
  0xc4   :  { %9358 = vmatprep.mubr.msk.bf16.mxu0 %vm310_vm0, %v10237_v8  ;;  %9370 = vmatprep.mubr.msk.bf16.mxu1 %vm310_vm0, %v10238_v9  ;;  %v10246_v33 = vld [vmem:[#allocation2 + $0x28] sm:$0xff]   ;;  %v10247_v34 = vld [vmem:[#allocation5 + $0x28] sm:$0xff]   ;;  %v10248_v35 = vld [vmem:[#allocation5 + $0x20] sm:$0xff]   ;;  %s12420_s4 = sld [smem:[#allocation36_spill]] }
  0xc5   :  { %v769_v37 = vld [vmem:[%s10925_s17 + $0x78] sm:$0xff]  ;;  %v768_v38 = vld [vmem:[%s10925_s17 + $0x70] sm:$0xff]  ;;  %v767_v49 = vld [vmem:[%s10925_s17 + $0x68] sm:$0xff]  ;;  %s12421_s0 = sld [smem:[#allocation37_spill]] }
  0xc6   :  { %9353 = vmatpush3.bf16.msra.mxu0 %v11126_v5  ;;  %9365 = vmatpush3.bf16.msra.mxu1 %v11126_v5  ;;  %v766_v50 = vld [vmem:[%s10925_s17 + $0x60] sm:$0xff]  ;;  %v765_v51 = vld [vmem:[%s10925_s17 + $0x58] sm:$0xff]  ;;  %v764_v52 = vld [vmem:[%s10925_s17 + $0x50] sm:$0xff]  ;;  %s12422_s11 = sld [smem:[#allocation38_spill]] }
  0xc7   :  { %9354 = vmatprep.subr.bf16.mxu0 %v293_v10  ;;  %9366 = vmatprep.subr.bf16.mxu1 %v293_v10  ;;  %v763_v53 = vld [vmem:[%s10925_s17 + $0x48] sm:$0xff]  ;;  %v762_v54 = vld [vmem:[%s10925_s17 + $0x40] sm:$0xff]  ;;  %v761_v55 = vld [vmem:[%s10925_s17 + $0x38] sm:$0xff]  ;;  %s12423_s6 = sld [smem:[#allocation39_spill]] }
  0xc8   :  { %v760_v56 = vld [vmem:[%s10925_s17 + $0x30] sm:$0xff]  ;;  %v759_v57 = vld [vmem:[%s10925_s17 + $0x28] sm:$0xff]  ;;  %v758_v58 = vld [vmem:[%s10925_s17 + $0x20] sm:$0xff]  ;;  %s12424_s15 = sld [smem:[#allocation40_spill]] }
  0xc9   :  { %v757_v59 = vld [vmem:[%s10925_s17 + $0x18] sm:$0xff]  ;;  %v756_v60 = vld [vmem:[%s10925_s17 + $0x10] sm:$0xff]  ;;  %v755_v61 = vld [vmem:[%s10925_s17 + $0x8] sm:$0xff]  ;;  %s12425_s16 = sld [smem:[#allocation41_spill]] }
  0xca   :  { %9355 = vmatpush3.bf16.msra.mxu0 %v293_v10  ;;  %9367 = vmatpush3.bf16.msra.mxu1 %v293_v10  ;;  %v754_v62 = vld [vmem:[%s10925_s17] sm:$0xff]  ;;  %s12426_s18 = sld [smem:[#allocation43_spill]] }
  0xcb   :  { %9356 = vmatprep.subr.bf16.mxu0 %v292_v13  ;;  %9368 = vmatprep.subr.bf16.mxu1 %v292_v13  ;;  %s12427_s22 = sld [smem:[#allocation42_spill]] }
  0xcc   :  { %s12428_s20 = sld [smem:[#allocation44_spill]] }
  0xcd   :  { %s12429_s9 = sld [smem:[#allocation45_spill]] }
  0xce   :  { %9357 = vmatpush3.bf16.msra.mxu0 %v292_v13  ;;  %9369 = vmatpush3.bf16.msra.mxu1 %v292_v13  ;;  %s12430_s13 = sld [smem:[#allocation46_spill]] }
  0xcf   :  { %9374 = vmatprep.subr.bf16.mxu0 %v10241_v16  ;;  %9382 = vmatprep.subr.bf16.mxu1 %v10242_v17  ;;  %s12431_s23 = sld [smem:[#allocation47_spill]] }
  0xd0   :  { %s12432_s26 = sld [smem:[#allocation48_spill]] }
  0xd1   :  { %9359 = vmatmul.mubr.msk.bf16.vlgmr.msra.gmra.mxu0 %vm310_vm0, %v10239_v14  ;;  %9371 = vmatmul.mubr.msk.bf16.vlgmr.msra.gmra.mxu1 %vm310_vm0, %v10240_v15 }
  0xd2   :  { %9375 = vmatpush3.bf16.msra.mxu0 %v10241_v16  ;;  %9383 = vmatpush3.bf16.msra.mxu1 %v10242_v17 }
  0xd3   :  { %9376 = vmatprep.subr.bf16.mxu0 %v10243_v18  ;;  %9384 = vmatprep.subr.bf16.mxu1 %v10244_v19 }
  0xd6   :  { %9377 = vmatpush3.bf16.msra.mxu0 %v10243_v18  ;;  %9385 = vmatpush3.bf16.msra.mxu1 %v10244_v19 }
  0xd7   :  { %9390 = vmatprep.subr.bf16.mxu0 %v11123_v3  ;;  %9402 = vmatprep.subr.bf16.mxu1 %v10247_v34 }
 0x191   :  { %v9360_v20 = vpop.f32.mrf.mxu0  ;;  %v9372_v21 = vpop.f32.mrf.mxu1 }
 0x193   :  { %v351_v22 = vpop.f32.mrf.mxu0  ;;  %v427_v23 = vpop.f32.mrf.mxu1 }
 0x195   :  { %v9361_v24 = vpop.f32.mrf.mxu0  ;;  %v9373_v25 = vpop.f32.mrf.mxu1 }
 0x196   :  { %v367_v26 = vpack.c.bf16 %v9361_v24, %v9360_v20  ;;  %v443_v32 = vpack.c.bf16 %v9373_v25, %v9372_v21 }
 0x197   :  { %v354_v27 = vpop.f32.mrf.mxu0  ;;  %v430_v28 = vpop.f32.mrf.mxu1 }
 0x198   :  { %v366_v29 = vpack.c.bf16 %v354_v27, %v351_v22  ;;  %v442_v30 = vpack.c.bf16 %v430_v28, %v427_v23 }
 0x19a   :  { %9378 = vmatprep.mubr.msk.bf16.mxu0 %vm461_vm1, %v442_v30  ;;  %9386 = vmatprep.mubr.msk.bf16.mxu1 %vm461_vm1, %v366_v29 }
 0x19b   :  { %9379 = vmatmul.mubr.msk.bf16.vlgmr.msra.gmra.mxu0 %vm461_vm1, %v443_v32  ;;  %9387 = vmatmul.mubr.msk.bf16.vlgmr.msra.gmra.mxu1 %vm461_vm1, %v367_v26 }
 0x19c   :  { %9391 = vmatpush3.bf16.msra.mxu0 %v11123_v3  ;;  %9398 = vmatprep.mubr.msk.bf16.mxu0 %vm310_vm0, %v10245_v31 }
 0x19d   :  { %9392 = vmatprep.subr.bf16.mxu0 %v11126_v5  ;;  %9403 = vmatpush3.bf16.msra.mxu1 %v10247_v34 }
 0x19e   :  { %9404 = vmatprep.subr.bf16.mxu1 %v10248_v35 }
 0x1a0   :  { %9393 = vmatpush3.bf16.msra.mxu0 %v11126_v5 }
 0x1a1   :  { %9394 = vmatprep.subr.bf16.mxu0 %v293_v10  ;;  %9405 = vmatpush3.bf16.msra.mxu1 %v10248_v35 }
 0x1a2   :  { %9410 = vmatprep.subr.mxu1 %v10895_v36 }
 0x1a4   :  { %9395 = vmatpush3.bf16.msra.mxu0 %v293_v10 }
 0x1a5   :  { %9396 = vmatprep.subr.bf16.mxu0 %v292_v13 }
 0x1a8   :  { %9397 = vmatpush3.bf16.msra.mxu0 %v292_v13 }
 0x1a9   :  { %9445 = vmatprep.subr.mxu0 %v10895_v36 }
 0x1ab   :  { %9399 = vmatmul.mubr.msk.bf16.vlgmr.msra.gmra.mxu0 %vm310_vm0, %v10246_v33 }
 0x1ac   :  { %9446 = vmatpush3.msra.mxu0 %v769_v37  ;;  %9477 = vmatprep.mubr.msk.f32.mxu0 %vm10896_vm2, %v10895_v36 }
 0x1ad   :  { %9447 = vmatprep.subr.mxu0 %v10895_v36 }
 0x1ae   :  { %9448 = vmatpush3.msra.mxu0 %v768_v38 }
 0x1af   :  { %9449 = vmatprep.subr.mxu0 %v10895_v36 }
 0x1b0   :  { %9450 = vmatpush3.msra.mxu0 %v767_v49 }
 0x1b1   :  { %9451 = vmatprep.subr.mxu0 %v10895_v36 }
 0x1b2   :  { %9452 = vmatpush3.msra.mxu0 %v766_v50 }
 0x1b3   :  { %9453 = vmatprep.subr.mxu0 %v10895_v36 }
 0x1b4   :  { %9454 = vmatpush3.msra.mxu0 %v765_v51 }
 0x1b5   :  { %9455 = vmatprep.subr.mxu0 %v10895_v36 }
 0x1b6   :  { %9456 = vmatpush3.msra.mxu0 %v764_v52 }
 0x1b7   :  { %9457 = vmatprep.subr.mxu0 %v10895_v36 }
 0x1b8   :  { %9458 = vmatpush3.msra.mxu0 %v763_v53 }
 0x1b9   :  { %9459 = vmatprep.subr.mxu0 %v10895_v36 }
 0x1ba   :  { %9460 = vmatpush3.msra.mxu0 %v762_v54 }
 0x1bb   :  { %9461 = vmatprep.subr.mxu0 %v10895_v36 }
 0x1bc   :  { %9462 = vmatpush3.msra.mxu0 %v761_v55 }
 0x1bd   :  { %9463 = vmatprep.subr.mxu0 %v10895_v36 }
 0x1be   :  { %9464 = vmatpush3.msra.mxu0 %v760_v56 }
 0x1bf   :  { %9465 = vmatprep.subr.mxu0 %v10895_v36 }
 0x1c0   :  { %9466 = vmatpush3.msra.mxu0 %v759_v57 }
 0x1c1   :  { %9467 = vmatprep.subr.mxu0 %v10895_v36 }
 0x1c2   :  { %9468 = vmatpush3.msra.mxu0 %v758_v58 }
 0x1c3   :  { %9469 = vmatprep.subr.mxu0 %v10895_v36 }
 0x1c4   :  { %9470 = vmatpush3.msra.mxu0 %v757_v59 }
 0x1c5   :  { %9471 = vmatprep.subr.mxu0 %v10895_v36 }
 0x1c6   :  { %9472 = vmatpush3.msra.mxu0 %v756_v60 }
 0x1c7   :  { %9473 = vmatprep.subr.mxu0 %v10895_v36 }
 0x1c8   :  { %9474 = vmatpush3.msra.mxu0 %v755_v61 }
 0x1c9   :  { %9475 = vmatprep.subr.mxu0 %v10895_v36 }
 0x1ca   :  { %9476 = vmatpush3.msra.mxu0 %v754_v62 }
 0x1cb   :  { %9488 = vmatprep.subr.bf16.mxu0 %v10895_v36 }
 0x25b   :  { %v11160_v39 = vpop.f32.mrf.mxu0  ;;  %v9388_v63 = vpop.f32.mrf.mxu1 }
 0x25c   :  { %v578_v7 = vadd.f32 %v9388_v63, %v11160_v39 }
 0x25d   :  { %v11162_v40 = vpop.f32.mrf.mxu0  ;;  %v569_v0 = vpop.f32.mrf.mxu1 }
 0x25e   :  { %v570_v5 = vadd.f32 %v569_v0, %v11162_v40 }
 0x25f   :  { %v11164_v41 = vpop.f32.mrf.mxu0  ;;  %v9389_v1 = vpop.f32.mrf.mxu1 }
 0x260   :  { %v581_v11 = vadd.f32 %v9389_v1, %v11164_v41 }
 0x261   :  { %v11166_v42 = vpop.f32.mrf.mxu0  ;;  %v572_v2 = vpop.f32.mrf.mxu1 }
 0x262   :  { %v573_v8 = vadd.f32 %v572_v2, %v11166_v42 }
 0x26b   :  { %v9400_v43 = vpop.f32.mrf.mxu0 }
 0x26d   :  { %v639_v44 = vpop.f32.mrf.mxu0 }
 0x26f   :  { %v9401_v45 = vpop.f32.mrf.mxu0 }
 0x270   :  { %v655_v48 = vpack.c.bf16 %v9401_v45, %v9400_v43 }
 0x271   :  { %v642_v46 = vpop.f32.mrf.mxu0 }
 0x272   :  { %v654_v47 = vpack.c.bf16 %v642_v46, %v639_v44  ;;  %v922_v46 = vlaneseq }
 0x274   :  { %9406 = vmatprep.mubr.msk.bf16.mxu1 %vm461_vm1, %v654_v47  ;;  %v923_v47 = vshrl.u32 %v922_v46, 7  ;;  %v10272_v46 = vld [vmem:[%s10935_s25 + $0x98] sm:$0xff]  }
 0x275   :  { %9407 = vmatmul.mubr.msk.bf16.vlgmr.msra.gmra.mxu1 %vm461_vm1, %v655_v48  ;;  %v913_v48 = vld [vmem:[%s10925_s17 + $0x80] sm:$0x3]  ;;  %s12415_s17 = sld [smem:[#allocation31_spill]] }
 0x276   :  { %9411 = vmatpush3.msra.mxu1 %v769_v37  ;;  %9442 = vmatprep.mubr.msk.f32.mxu1 %vm10896_vm2, %v10895_v36 }
 0x277   :  { %9412 = vmatprep.subr.mxu1 %v10895_v36 }
 0x278   :  { %9413 = vmatpush3.msra.mxu1 %v768_v38 }
 0x279   :  { %9414 = vmatprep.subr.mxu1 %v10895_v36 }
 0x27a   :  { %9415 = vmatpush3.msra.mxu1 %v767_v49 }
 0x27b   :  { %9416 = vmatprep.subr.mxu1 %v10895_v36 }
 0x27c   :  { %9417 = vmatpush3.msra.mxu1 %v766_v50  ;;  %v11227_v50 = vsub.s32 0, %v923_v47 }
 0x27d   :  { %9418 = vmatprep.subr.mxu1 %v10895_v36 }
 0x27e   :  { %9419 = vmatpush3.msra.mxu1 %v765_v51 }
 0x27f   :  { %9420 = vmatprep.subr.mxu1 %v10895_v36 }
 0x280   :  { %9421 = vmatpush3.msra.mxu1 %v764_v52 }
 0x281   :  { %9422 = vmatprep.subr.mxu1 %v10895_v36 }
 0x282   :  { %9423 = vmatpush3.msra.mxu1 %v763_v53 }
 0x283   :  { %9424 = vmatprep.subr.mxu1 %v10895_v36 }
 0x284   :  { %9425 = vmatpush3.msra.mxu1 %v762_v54 }
 0x285   :  { %9426 = vmatprep.subr.mxu1 %v10895_v36 }
 0x286   :  { %9427 = vmatpush3.msra.mxu1 %v761_v55  ;;  %v11230_v55 = vsub.s32 1, %v923_v47  ;;  %v10273_v47 = vld [vmem:[%s10935_s25 + $0x90] sm:$0xff]  }
 0x287   :  { %9428 = vmatprep.subr.mxu1 %v10895_v36 }
 0x288   :  { %9429 = vmatpush3.msra.mxu1 %v760_v56 }
 0x289   :  { %9430 = vmatprep.subr.mxu1 %v10895_v36 }
 0x28a   :  { %9431 = vmatpush3.msra.mxu1 %v759_v57 }
 0x28b   :  { %9432 = vmatprep.subr.mxu1 %v10895_v36 }
 0x28c   :  { %9433 = vmatpush3.msra.mxu1 %v758_v58 }
 0x28d   :  { %9434 = vmatprep.subr.mxu1 %v10895_v36 }
 0x28e   :  { %9435 = vmatpush3.msra.mxu1 %v757_v59 }
 0x28f   :  { %9436 = vmatprep.subr.mxu1 %v10895_v36 }
 0x290   :  { %9437 = vmatpush3.msra.mxu1 %v756_v60 }
 0x291   :  { %9438 = vmatprep.subr.mxu1 %v10895_v36 }
 0x292   :  { %9439 = vmatpush3.msra.mxu1 %v755_v61 }
 0x293   :  { %9440 = vmatprep.subr.mxu1 %v10895_v36 }
 0x294   :  { %9441 = vmatpush3.msra.mxu1 %v754_v62 }
 0x295   :  { %9480 = vmatprep.subr.bf16.mxu1 %v10895_v36 }
 0x335   :  { %v9408_v3 = vpop.f32.mrf.mxu1 }
 0x336   :  { %v730_v12 = vadd.f32 %v9408_v3, %v578_v7 }
 0x337   :  { %v713_v4 = vpop.f32.mrf.mxu1 }
 0x338   :  { %v728_v9 = vadd.f32 %v713_v4, %v570_v5  ;;  %v743_v18 = vmul.f32 %v730_v12, %v730_v12 }
 0x339   :  { %v9409_v6 = vpop.f32.mrf.mxu1 }
 0x33a   :  { %v741_v14 = vmul.f32 %v728_v9, %v728_v9  ;;  %v731_v15 = vadd.f32 %v9409_v6, %v581_v11 }
 0x33b   :  { %v716_v10 = vpop.f32.mrf.mxu1 }
 0x33c   :  { %v729_v13 = vadd.f32 %v716_v10, %v573_v8  ;;  %v744_v21 = vmul.f32 %v731_v15, %v731_v15 }
 0x33e   :  { %v732_v16 = vadd.f32 %v729_v13, %v728_v9  ;;  %v742_v17 = vmul.f32 %v729_v13, %v729_v13 }
 0x340   :  { %v733_v19 = vadd.f32 %v732_v16, %v730_v12  ;;  %v745_v20 = vadd.f32 %v742_v17, %v741_v14  ;;  %v10251_v14 = vld [vmem:[%s10935_s25 + $0x78] sm:$0xff]   ;;  %v10253_v16 = vld [vmem:[%s10935_s25 + $0x70] sm:$0xff]  }
 0x341   :  { %v10254_v17 = vld [vmem:[%s10935_s25 + $0x30] sm:$0xff]  }
 0x342   :  { %v734_v22 = vadd.f32 %v733_v19, %v731_v15  ;;  %v746_v23 = vadd.f32 %v745_v20, %v743_v18  ;;  %v10255_v18 = vld [vmem:[%s10935_s25 + $0x68] sm:$0xff]   ;;  %v10257_v20 = vld [vmem:[%s10935_s25 + $0x60] sm:$0xff]  }
 0x343   :  { %v10256_v19 = vld [vmem:[%s10935_s25 + $0x28] sm:$0xff]  }
 0x344   :  { %v735_v24 = vrot.slane %v734_v22, 4  ;;  %v747_v25 = vadd.f32 %v746_v23, %v744_v21  ;;  %v10258_v21 = vld [vmem:[%s10935_s25 + $0x20] sm:$0xff]   ;;  %v10260_v23 = vld [vmem:[%s10935_s25 + $0x18] sm:$0xff]  }
 0x346   :  { %v736_v26 = vadd.f32 %v735_v24, %v734_v22  ;;  %v748_v27 = vrot.slane %v747_v25, 4  ;;  %v10259_v22 = vld [vmem:[%s10935_s25 + $0x58] sm:$0xff]   ;;  %v10261_v24 = vld [vmem:[%s10935_s25 + $0x50] sm:$0xff]  }
 0x348   :  { %v737_v28 = vrot.slane %v736_v26, 2  ;;  %v749_v29 = vadd.f32 %v748_v27, %v747_v25  ;;  %v10262_v25 = vld [vmem:[%s10935_s25 + $0x10] sm:$0xff]   ;;  %v10264_v27 = vld [vmem:[%s10935_s25 + $0x8] sm:$0xff]  }
 0x34a   :  { %v738_v30 = vadd.f32 %v737_v28, %v736_v26  ;;  %v750_v31 = vrot.slane %v749_v29, 2  ;;  %v10263_v26 = vld [vmem:[%s10935_s25 + $0x48] sm:$0xff]   ;;  %v10265_v28 = vld [vmem:[%s10935_s25 + $0x40] sm:$0xff]  }
 0x34c   :  { %v739_v32 = vrot.slane %v738_v30, 1  ;;  %v751_v33 = vadd.f32 %v750_v31, %v749_v29  ;;  %v10266_v29 = vld [vmem:[%s10935_s25] sm:$0xff]  }
 0x34e   :  { %v740_v34 = vadd.f32 %v739_v32, %v738_v30  ;;  %v752_v35 = vrot.slane %v751_v33, 1 }
 0x350   :  { %9443 = vmatmul.mubr.f32.vlgmr.msra.gmra.mxu1 %v740_v34  ;;  %v753_v37 = vadd.f32 %v752_v35, %v751_v33 }
 0x351   :  { %9484 = vmatprep.mubr.msk.bf16.mxu1 %vm10896_vm2, %v10895_v36 }
 0x352   :  { %9478 = vmatmul.mubr.f32.vlgmr.msra.gmra.mxu0 %v753_v37 }
 0x353   :  { %9492 = vmatprep.mubr.msk.bf16.mxu0 %vm10896_vm2, %v10895_v36 }
 0x410   :  { %v836_v38 = vpop.f32.mrf.mxu1 }
 0x411   :  { %v910_v39 = vmul.f32 %v836_v38, %v836_v38 }
 0x412   :  { %v9444_v40 = vpop.f32.mrf.mxu1  ;;  %v906_v41 = vpop.f32.mrf.mxu0 }
 0x413   :  { %v911_v42 = vsub.f32 %v906_v41, %v910_v39  ;;  %v10268_v39 = vld [vmem:[%s10935_s25 + $0xb8] sm:$0xff]  }
 0x414   :  { %v9479_v43 = vpop.f32.mrf.mxu0 }
 0x415   :  { %v912_v44 = vmax.f32 %v911_v42, 0.0  ;;  %v10269_v42 = vld [vmem:[%s10935_s25 + $0xb0] sm:$0xff]  }
 0x416   :  { %v10267_v43 = vld [vmem:[#allocation7 + $0x10] sm:$0xff]  }
 0x417   :  { %v914_v45 = vadd.f32 1e-05, %v912_v44  ;;  %v10270_v44 = vld [vmem:[%s10935_s25 + $0xa8] sm:$0xff]  }
 0x419   :  { %10539 = vrsqrt.f32 %v914_v45  ;;  %v10271_v45 = vld [vmem:[%s10935_s25 + $0xa0] sm:$0xff]  }
 0x426   :  { %v10540_v49 = vpop.eup %10539 }
 0x427   :  { %v916_v51 = vmul.f32 %v10540_v49, %v913_v48  ;;  %v10275_v49 = vld [vmem:[%s10935_s25 + $0x80] sm:$0xff]  }
 0x429   :  { %v917_v52 = vmul.f32 %v916_v51, %v836_v38  ;;  %v925_v53 = vrot.slane %v916_v51, %v11227_v50 }
 0x42b   :  { %v919_v54 = vrot.slane %v917_v52, 7  ;;  %v928_v57 = vmul.f32 %v925_v53, %v730_v12  ;;  %v929_v58 = vmul.f32 %v925_v53, %v731_v15  ;;  %v926_v60 = vmul.f32 %v925_v53, %v728_v9  ;;  %v10249_v12 = vld [vmem:[#allocation7] sm:$0xff]   ;;  %v10252_v15 = vld [vmem:[%s10935_s25 + $0x38] sm:$0xff]  }
 0x42c   :  { %v927_v61 = vmul.f32 %v925_v53, %v729_v13  ;;  %v10250_v13 = vld [vmem:[#allocation7 + $0x8] sm:$0xff]  }
 0x42d   :  { %v921_v56 = vsub.f32 %v913_v48, %v919_v54  ;;  %v10274_v48 = vld [vmem:[%s10935_s25 + $0x88] sm:$0xff]   ;;  %s12416_s25 = sld [smem:[#allocation32_spill]] }
 0x42f   :  { %v933_v59 = vrot.slane %v921_v56, %v11230_v55 }
 0x431   :  { %v936_v62 = vadd.f32 %v933_v59, %v928_v57  ;;  %v937_v63 = vadd.f32 %v933_v59, %v929_v58  ;;  %v934_v0 = vadd.f32 %v933_v59, %v926_v60  ;;  %v935_v1 = vadd.f32 %v933_v59, %v927_v61 }
 0x433   :  { %v940_v2 = vmul.f32 0.01, %v936_v62  ;;  %v941_v3 = vmul.f32 0.01, %v937_v63  ;;  %v938_v4 = vmul.f32 0.01, %v934_v0 }
 0x434   :  { %v939_v5 = vmul.f32 0.01, %v935_v1 }
 0x435   :  { %v944_v6 = vmax.f32 %v936_v62, %v940_v2  ;;  %v945_v7 = vmax.f32 %v937_v63, %v941_v3  ;;  %v942_v10 = vmax.f32 %v934_v0, %v938_v4  ;;  %v1452_v3 = vld [vmem:[%s10940_s29 + $0x38] sm:$0xff]  ;;  %v1451_v4 = vld [vmem:[%s10940_s29 + $0x30] sm:$0xff] }
 0x436   :  { %v943_v11 = vmax.f32 %v935_v1, %v939_v5  ;;  %v1450_v5 = vld [vmem:[%s10940_s29 + $0x28] sm:$0xff] }
 0x437   :  { %v11233_v8 = vpack.c.bf16 %v945_v7, %v944_v6  ;;  %v1449_v6 = vld [vmem:[%s10940_s29 + $0x20] sm:$0xff]  ;;  %v1448_v7 = vld [vmem:[%s10940_s29 + $0x18] sm:$0xff] }
 0x438   :  { %v11239_v9 = vpack.c.bf16 %v943_v11, %v942_v10  ;;  %v1446_v10 = vld [vmem:[%s10940_s29 + $0x8] sm:$0xff]  ;;  %v1445_v11 = vld [vmem:[%s10940_s29] sm:$0xff] }
 0x439   :  { %9481 = vmatpush3.bf16.msra.mxu1 %v11233_v8  ;;  %9489 = vmatpush3.bf16.msra.mxu0 %v11233_v8 }
 0x43a   :  { %9482 = vmatprep.subr.bf16.mxu1 %v10895_v36  ;;  %9490 = vmatprep.subr.bf16.mxu0 %v10895_v36 }
 0x43d   :  { %9483 = vmatpush3.bf16.msra.mxu1 %v11239_v9  ;;  %9491 = vmatpush3.bf16.msra.mxu0 %v11239_v9 }
 0x43e   :  { %9496 = vmatprep.subr.bf16.mxu1 %v10895_v36  ;;  %9516 = vmatprep.subr.bf16.mxu0 %v10895_v36 }
 0x440   :  { %9485 = vmatmul.mubr.msk.bf16.vlgmr.msra.gmra.mxu1 %vm461_vm1, %v10249_v12  ;;  %9493 = vmatmul.mubr.msk.bf16.vlgmr.msra.gmra.mxu0 %vm461_vm1, %v10250_v13 }
 0x441   :  { %9497 = vmatpush3.bf16.msra.mxu1 %v10251_v14  ;;  %9517 = vmatpush3.bf16.msra.mxu0 %v10252_v15 }
 0x442   :  { %9498 = vmatprep.subr.bf16.mxu1 %v10895_v36  ;;  %9518 = vmatprep.subr.bf16.mxu0 %v10895_v36 }
 0x443   :  { %9512 = vmatprep.mubr.msk.bf16.mxu1 %vm10896_vm2, %v10895_v36  ;;  %9532 = vmatprep.mubr.msk.bf16.mxu0 %vm10896_vm2, %v10895_v36 }
 0x445   :  { %9499 = vmatpush3.bf16.msra.mxu1 %v10253_v16  ;;  %9519 = vmatpush3.bf16.msra.mxu0 %v10254_v17 }
 0x446   :  { %9500 = vmatprep.subr.bf16.mxu1 %v10895_v36  ;;  %9520 = vmatprep.subr.bf16.mxu0 %v10895_v36 }
 0x449   :  { %9501 = vmatpush3.bf16.msra.mxu1 %v10255_v18  ;;  %9521 = vmatpush3.bf16.msra.mxu0 %v10256_v19 }
 0x44a   :  { %9502 = vmatprep.subr.bf16.mxu1 %v10895_v36  ;;  %9522 = vmatprep.subr.bf16.mxu0 %v10895_v36 }
 0x44d   :  { %9503 = vmatpush3.bf16.msra.mxu1 %v10257_v20  ;;  %9523 = vmatpush3.bf16.msra.mxu0 %v10258_v21 }
 0x44e   :  { %9504 = vmatprep.subr.bf16.mxu1 %v10895_v36  ;;  %9524 = vmatprep.subr.bf16.mxu0 %v10895_v36 }
 0x451   :  { %9505 = vmatpush3.bf16.msra.mxu1 %v10259_v22  ;;  %9525 = vmatpush3.bf16.msra.mxu0 %v10260_v23 }
 0x452   :  { %9506 = vmatprep.subr.bf16.mxu1 %v10895_v36  ;;  %9526 = vmatprep.subr.bf16.mxu0 %v10895_v36 }
 0x455   :  { %9507 = vmatpush3.bf16.msra.mxu1 %v10261_v24  ;;  %9527 = vmatpush3.bf16.msra.mxu0 %v10262_v25 }
 0x456   :  { %9508 = vmatprep.subr.bf16.mxu1 %v10895_v36  ;;  %9528 = vmatprep.subr.bf16.mxu0 %v10895_v36 }
 0x459   :  { %9509 = vmatpush3.bf16.msra.mxu1 %v10263_v26  ;;  %9529 = vmatpush3.bf16.msra.mxu0 %v10264_v27 }
 0x45a   :  { %9510 = vmatprep.subr.bf16.mxu1 %v10895_v36  ;;  %9530 = vmatprep.subr.bf16.mxu0 %v10895_v36 }
 0x45d   :  { %9511 = vmatpush3.bf16.msra.mxu1 %v10265_v28  ;;  %9531 = vmatpush3.bf16.msra.mxu0 %v10266_v29 }
 0x45e   :  { %9536 = vmatprep.subr.bf16.mxu1 %v10895_v36  ;;  %9544 = vmatprep.subr.bf16.mxu0 %v10895_v36 }
 0x500   :  { %v992_v30 = vpop.f32.mrf.mxu1  ;;  %v1061_v31 = vpop.f32.mrf.mxu0 }
 0x502   :  { %v9486_v32 = vpop.f32.mrf.mxu1  ;;  %v9494_v33 = vpop.f32.mrf.mxu0 }
 0x504   :  { %v995_v34 = vpop.f32.mrf.mxu1  ;;  %v1064_v35 = vpop.f32.mrf.mxu0 }
 0x505   :  { %v999_v37 = vpack.c.bf16 %v995_v34, %v992_v30  ;;  %v1068_v38 = vpack.c.bf16 %v1064_v35, %v1061_v31 }
 0x506   :  { %v9495_v40 = vpop.f32.mrf.mxu0  ;;  %v9487_v41 = vpop.f32.mrf.mxu1 }
 0x507   :  { %9513 = vmatmul.mubr.bf16.vlgmr.msra.gmra.mxu1 %v1068_v38  ;;  %9533 = vmatmul.mubr.bf16.vlgmr.msra.gmra.mxu0 %v999_v37 }
 0x508   :  { %9537 = vmatpush3.bf16.msra.mxu1 %v11233_v8  ;;  %9540 = vmatprep.mubr.msk.bf16.mxu1 %vm10896_vm2, %v10895_v36  ;;  %v1447_v8 = vld [vmem:[%s10940_s29 + $0x10] sm:$0xff] }
 0x509   :  { %9538 = vmatprep.subr.bf16.mxu1 %v10895_v36  ;;  %9545 = vmatpush3.bf16.msra.mxu0 %v10268_v39 }
 0x50a   :  { %9546 = vmatprep.subr.bf16.mxu0 %v10895_v36  ;;  %9560 = vmatprep.mubr.msk.bf16.mxu0 %vm10896_vm2, %v10895_v36 }
 0x50c   :  { %9539 = vmatpush3.bf16.msra.mxu1 %v11239_v9 }
 0x50d   :  { %9547 = vmatpush3.bf16.msra.mxu0 %v10269_v42  ;;  %9564 = vmatprep.subr.mxu1 %v10895_v36 }
 0x50e   :  { %9548 = vmatprep.subr.bf16.mxu0 %v10895_v36 }
 0x50f   :  { %9541 = vmatmul.mubr.msk.bf16.vlgmr.msra.gmra.mxu1 %vm461_vm1, %v10267_v43 }
 0x510   :  { %9580 = vmatprep.mubr.msk.f32.mxu1 %vm10896_vm2, %v10895_v36  ;;  %9565 = vmatpush3.msra.mxu1 %v1452_v3 }
 0x511   :  { %9549 = vmatpush3.bf16.msra.mxu0 %v10270_v44  ;;  %9566 = vmatprep.subr.mxu1 %v10895_v36 }
 0x512   :  { %9550 = vmatprep.subr.bf16.mxu0 %v10895_v36  ;;  %9567 = vmatpush3.msra.mxu1 %v1451_v4 }
 0x513   :  { %9568 = vmatprep.subr.mxu1 %v10895_v36 }
 0x514   :  { %9569 = vmatpush3.msra.mxu1 %v1450_v5 }
 0x515   :  { %9551 = vmatpush3.bf16.msra.mxu0 %v10271_v45  ;;  %9570 = vmatprep.subr.mxu1 %v10895_v36 }
 0x516   :  { %9552 = vmatprep.subr.bf16.mxu0 %v10895_v36  ;;  %9571 = vmatpush3.msra.mxu1 %v1449_v6 }
 0x517   :  { %9572 = vmatprep.subr.mxu1 %v10895_v36 }
 0x518   :  { %9573 = vmatpush3.msra.mxu1 %v1448_v7 }
 0x519   :  { %9553 = vmatpush3.bf16.msra.mxu0 %v10272_v46  ;;  %9574 = vmatprep.subr.mxu1 %v10895_v36  ;;  %v1602_v46 = vld [vmem:[%s10940_s29 + $0x40] sm:$0x3]  ;;  %s12417_s29 = sld [smem:[#allocation33_spill]] }
 0x51a   :  { %9554 = vmatprep.subr.bf16.mxu0 %v10895_v36  ;;  %9575 = vmatpush3.msra.mxu1 %v1447_v8 }
 0x51b   :  { %9576 = vmatprep.subr.mxu1 %v10895_v36 }
 0x51c   :  { %9577 = vmatpush3.msra.mxu1 %v1446_v10 }
 0x51d   :  { %9555 = vmatpush3.bf16.msra.mxu0 %v10273_v47  ;;  %9578 = vmatprep.subr.mxu1 %v10895_v36 }
 0x51e   :  { %9556 = vmatprep.subr.bf16.mxu0 %v10895_v36  ;;  %9579 = vmatpush3.msra.mxu1 %v1445_v11 }
 0x51f   :  { %9583 = vmatprep.subr.mxu1 %v10895_v36 }
 0x521   :  { %9557 = vmatpush3.bf16.msra.mxu0 %v10274_v48 }
 0x522   :  { %9558 = vmatprep.subr.bf16.mxu0 %v10895_v36 }
 0x525   :  { %9559 = vmatpush3.bf16.msra.mxu0 %v10275_v49 }
 0x526   :  { %9608 = vmatprep.subr.bf16.mxu0 %v10895_v36 }
 0x5c7   :  { %v1168_v51 = vpop.f32.mrf.mxu1  ;;  %v1257_v52 = vpop.f32.mrf.mxu0 }
 0x5c8   :  { %v1258_v53 = vadd.f32 %v1257_v52, %v1168_v51 }
 0x5c9   :  { %v9514_v54 = vpop.f32.mrf.mxu1  ;;  %v9534_v56 = vpop.f32.mrf.mxu0 }
 0x5cb   :  { %v1171_v57 = vpop.f32.mrf.mxu1  ;;  %v1260_v58 = vpop.f32.mrf.mxu0 }
 0x5cc   :  { %v1261_v59 = vadd.f32 %v1260_v58, %v1171_v57 }
 0x5cd   :  { %v9515_v60 = vpop.f32.mrf.mxu1  ;;  %v9535_v61 = vpop.f32.mrf.mxu0 }
 0x5cf   :  { %v1309_v62 = vpop.f32.mrf.mxu1 }
 0x5d1   :  { %v9542_v63 = vpop.f32.mrf.mxu1 }
 0x5d3   :  { %v1312_v0 = vpop.f32.mrf.mxu1 }
 0x5d4   :  { %v1316_v1 = vpack.c.bf16 %v1312_v0, %v1309_v62 }
 0x5d5   :  { %v9543_v2 = vpop.f32.mrf.mxu1 }
 0x5d6   :  { %9561 = vmatmul.mubr.bf16.vlgmr.msra.gmra.mxu0 %v1316_v1  ;;  %v1628_v1 = vld [vmem:[#allocation8] sm:$0xf]  ;;  %v1683_v2 = vld [vmem:[#allocation8 + $0x4] sm:$0xf] }
 0x5d7   :  { %9610 = vmatprep.mubr.msk.bf16.mxu0 %vm10896_vm2, %v10895_v36 }
 0x696   :  { %v1416_v9 = vpop.f32.mrf.mxu0 }
 0x697   :  { %v1423_v13 = vadd.f32 %v1416_v9, %v1258_v53 }
 0x698   :  { %v9562_v12 = vpop.f32.mrf.mxu0 }
 0x699   :  { %v1425_v17 = vsel %vm310_vm0, %v1423_v13, 0.0  ;;  %v1434_v18 = vmul.f32 %v1423_v13, %v1423_v13 }
 0x69a   :  { %v1419_v14 = vpop.f32.mrf.mxu0 }
 0x69b   :  { %v1424_v15 = vadd.f32 %v1419_v14, %v1261_v59  ;;  %v1436_v24 = vsel %vm310_vm0, %v1434_v18, 0.0 }
 0x69c   :  { %v9563_v16 = vpop.f32.mrf.mxu0 }
 0x69d   :  { %v1426_v19 = vsel %vm310_vm0, %v1424_v15, 0.0  ;;  %v1435_v20 = vmul.f32 %v1424_v15, %v1424_v15 }
 0x69e   :  { %v1427_v21 = vadd.f32 %v1426_v19, %v1425_v17 }
 0x69f   :  { %v1437_v22 = vsel %vm310_vm0, %v1435_v20, 0.0 }
 0x6a0   :  { %v1428_v23 = vrot.slane %v1427_v21, 4  ;;  %v1438_v26 = vadd.f32 %v1437_v22, %v1436_v24  ;;  %v1872_v22 = vld [vmem:[#allocation8 + $0x8] sm:$0xf]  ;;  %v10286_v24 = vld [vmem:[%s12414_s5 + $0x48] sm:$0xff]  }
 0x6a2   :  { %v1429_v25 = vadd.f32 %v1428_v23, %v1427_v21  ;;  %v1439_v29 = vrot.slane %v1438_v26, 4  ;;  %v10285_v23 = vld [vmem:[%s12414_s5 + $0x50] sm:$0xff]  }
 0x6a4   :  { %v1430_v27 = vrot.slane %v1429_v25, 2  ;;  %v1440_v31 = vadd.f32 %v1439_v29, %v1438_v26 }
 0x6a6   :  { %v1431_v28 = vadd.f32 %v1430_v27, %v1429_v25  ;;  %v1441_v33 = vrot.slane %v1440_v31, 2  ;;  %v10287_v25 = vld [vmem:[%s12414_s5 + $0x40] sm:$0xff]  }
 0x6a8   :  { %v1432_v30 = vrot.slane %v1431_v28, 1  ;;  %v1442_v34 = vadd.f32 %v1441_v33, %v1440_v31 }
 0x6aa   :  { %v1433_v32 = vadd.f32 %v1432_v30, %v1431_v28  ;;  %v1443_v35 = vrot.slane %v1442_v34, 1 }
 0x6ac   :  { %9581 = vmatmul.mubr.msk.f32.vlgmr.msra.gmra.mxu1 %vm310_vm0, %v1433_v32  ;;  %v1444_v37 = vadd.f32 %v1443_v35, %v1442_v34 }
 0x6ad   :  { %9584 = vmatpush3.msra.mxu1 %v1452_v3  ;;  %9599 = vmatprep.mubr.msk.f32.mxu1 %vm10896_vm2, %v10895_v36  ;;  %v10276_v3 = vld [vmem:[%s12414_s5 + $0x38] sm:$0xff]  }
 0x6ae   :  { %9585 = vmatprep.subr.mxu1 %v10895_v36 }
 0x6af   :  { %9586 = vmatpush3.msra.mxu1 %v1451_v4  ;;  %v10277_v4 = vld [vmem:[%s12414_s5 + $0x18] sm:$0xff]  }
 0x6b0   :  { %9587 = vmatprep.subr.mxu1 %v10895_v36 }
 0x6b1   :  { %9588 = vmatpush3.msra.mxu1 %v1450_v5  ;;  %v10278_v5 = vld [vmem:[%s12414_s5 + $0x30] sm:$0xff]  }
 0x6b2   :  { %9589 = vmatprep.subr.mxu1 %v10895_v36 }
 0x6b3   :  { %9590 = vmatpush3.msra.mxu1 %v1449_v6  ;;  %v10279_v6 = vld [vmem:[%s12414_s5 + $0x10] sm:$0xff]  }
 0x6b4   :  { %9591 = vmatprep.subr.mxu1 %v10895_v36 }
 0x6b5   :  { %9592 = vmatpush3.msra.mxu1 %v1448_v7  ;;  %v10280_v7 = vld [vmem:[%s12414_s5 + $0x28] sm:$0xff]  }
 0x6b6   :  { %9593 = vmatprep.subr.mxu1 %v10895_v36 }
 0x6b7   :  { %9594 = vmatpush3.msra.mxu1 %v1447_v8  ;;  %v10281_v8 = vld [vmem:[%s12414_s5 + $0x8] sm:$0xff]  }
 0x6b8   :  { %9595 = vmatprep.subr.mxu1 %v10895_v36 }
 0x6b9   :  { %9596 = vmatpush3.msra.mxu1 %v1446_v10  ;;  %v10282_v10 = vld [vmem:[%s12414_s5 + $0x20] sm:$0xff]  }
 0x6ba   :  { %9597 = vmatprep.subr.mxu1 %v10895_v36 }
 0x6bb   :  { %9598 = vmatpush3.msra.mxu1 %v1445_v11  ;;  %v10283_v11 = vld [vmem:[%s12414_s5] sm:$0xff]  }
 0x6bc   :  { %9600 = vmatmul.mubr.msk.f32.vlgmr.msra.gmra.mxu1 %vm310_vm0, %v1444_v37  ;;  %9602 = vmatprep.subr.bf16.mxu1 %v10895_v36 }
 0x6bd   :  { %9604 = vmatprep.mubr.msk.bf16.mxu1 %vm10896_vm2, %v10895_v36 }
 0x76c   :  { %v1522_v38 = vpop.f32.mrf.mxu1 }
 0x76d   :  { %v1599_v40 = vmul.f32 %v1522_v38, %v1522_v38 }
 0x76e   :  { %v9582_v39 = vpop.f32.mrf.mxu1 }
 0x77c   :  { %v1595_v41 = vpop.f32.mrf.mxu1 }
 0x77d   :  { %v1600_v42 = vsub.f32 %v1595_v41, %v1599_v40  ;;  %v2016_v41 = vld [vmem:[%s12415_s17 + $0x38] sm:$0xff] }
 0x77e   :  { %v9601_v43 = vpop.f32.mrf.mxu1 }
 0x77f   :  { %v1601_v44 = vmax.f32 %v1600_v42, 0.0  ;;  %v2015_v42 = vld [vmem:[%s12415_s17 + $0x30] sm:$0xff]  ;;  %v2014_v43 = vld [vmem:[%s12415_s17 + $0x28] sm:$0xff] }
 0x781   :  { %v1603_v45 = vadd.f32 1e-05, %v1601_v44  ;;  %v2013_v44 = vld [vmem:[%s12415_s17 + $0x20] sm:$0xff] }
 0x783   :  { %10541 = vrsqrt.f32 %v1603_v45  ;;  %v2012_v45 = vld [vmem:[%s12415_s17 + $0x18] sm:$0xff] }
 0x790   :  { %v10542_v47 = vpop.eup %10541 }
 0x791   :  { %v1605_v48 = vmul.f32 %v10542_v47, %v1602_v46  ;;  %v2010_v47 = vld [vmem:[%s12415_s17 + $0x8] sm:$0xff] }
 0x793   :  { %v1606_v49 = vmul.f32 %v1605_v48, %v1522_v38  ;;  %v1614_v52 = vrot.slane %v1605_v48, %v11227_v50  ;;  %v2009_v48 = vld [vmem:[%s12415_s17] sm:$0xff] }
 0x795   :  { %v1608_v51 = vrot.slane %v1606_v49, 7  ;;  %v1615_v54 = vmul.f32 %v1614_v52, %v1423_v13  ;;  %v1616_v56 = vmul.f32 %v1614_v52, %v1424_v15  ;;  %v10284_v15 = vld [vmem:[%s12414_s5 + $0x58] sm:$0xff]  }
 0x797   :  { %v1610_v53 = vsub.f32 %v1602_v46, %v1608_v51  ;;  %v2011_v46 = vld [vmem:[%s12415_s17 + $0x10] sm:$0xff] }
 0x799   :  { %v1620_v57 = vrot.slane %v1610_v53, %v11230_v55 }
 0x79b   :  { %v1621_v58 = vadd.f32 %v1620_v57, %v1615_v54  ;;  %v1622_v59 = vadd.f32 %v1620_v57, %v1616_v56 }
 0x79d   :  { %v1623_v60 = vmul.f32 0.01, %v1621_v58  ;;  %v1624_v61 = vmul.f32 0.01, %v1622_v59 }
 0x79f   :  { %v1625_v62 = vmax.f32 %v1621_v58, %v1623_v60  ;;  %v1626_v63 = vmax.f32 %v1622_v59, %v1624_v61 }
 0x7a1   :  { %v1627_v0 = vpack.c.bf16 %v1626_v63, %v1625_v62 }
 0x7a3   :  { %9603 = vmatpush3.bf16.msra.mxu1 %v1627_v0  ;;  %9609 = vmatpush3.bf16.msra.mxu0 %v1627_v0 }
 0x7a4   :  { %9614 = vmatprep.subr.bf16.mxu1 %v10895_v36  ;;  %9626 = vmatprep.subr.bf16.mxu0 %v10895_v36 }
 0x7a6   :  { %9605 = vmatmul.mubr.msk.bf16.vlgmr.msra.gmra.mxu1 %vm1629_vm3, %v1628_v1  ;;  %9611 = vmatmul.mubr.msk.bf16.vlgmr.msra.gmra.mxu0 %vm1629_vm3, %v1683_v2 }
 0x7a7   :  { %9615 = vmatpush3.bf16.msra.mxu1 %v10276_v3  ;;  %9627 = vmatpush3.bf16.msra.mxu0 %v10277_v4 }
 0x7a8   :  { %9616 = vmatprep.subr.bf16.mxu1 %v10895_v36  ;;  %9628 = vmatprep.subr.bf16.mxu0 %v10895_v36 }
 0x7a9   :  { %9622 = vmatprep.mubr.msk.bf16.mxu1 %vm10896_vm2, %v10895_v36  ;;  %9634 = vmatprep.mubr.msk.bf16.mxu0 %vm10896_vm2, %v10895_v36 }
 0x7ab   :  { %9617 = vmatpush3.bf16.msra.mxu1 %v10278_v5  ;;  %9629 = vmatpush3.bf16.msra.mxu0 %v10279_v6 }
 0x7ac   :  { %9618 = vmatprep.subr.bf16.mxu1 %v10895_v36  ;;  %9630 = vmatprep.subr.bf16.mxu0 %v10895_v36 }
 0x7af   :  { %9619 = vmatpush3.bf16.msra.mxu1 %v10280_v7  ;;  %9631 = vmatpush3.bf16.msra.mxu0 %v10281_v8 }
 0x7b0   :  { %9620 = vmatprep.subr.bf16.mxu1 %v10895_v36  ;;  %9632 = vmatprep.subr.bf16.mxu0 %v10895_v36 }
 0x7b3   :  { %9621 = vmatpush3.bf16.msra.mxu1 %v10282_v10  ;;  %9633 = vmatpush3.bf16.msra.mxu0 %v10283_v11 }
 0x7b4   :  { %9638 = vmatprep.subr.bf16.mxu1 %v10895_v36  ;;  %9644 = vmatprep.subr.bf16.mxu0 %v10895_v36 }
 0x866   :  { %v1667_v9 = vpop.f32.mrf.mxu1  ;;  %v1721_v12 = vpop.f32.mrf.mxu0 }
 0x867   :  { %v1673_v13 = vpack.c.bf16 %v1667_v9, %v1667_v9  ;;  %v1727_v14 = vpack.c.bf16 %v1721_v12, %v1721_v12 }
 0x868   :  { %v9612_v16 = vpop.f32.mrf.mxu0  ;;  %v9606_v17 = vpop.f32.mrf.mxu1 }
 0x869   :  { %9623 = vmatmul.mubr.msk.bf16.vlgmr.msra.gmra.mxu1 %vm310_vm0, %v1727_v14  ;;  %9635 = vmatmul.mubr.msk.bf16.vlgmr.msra.gmra.mxu0 %vm310_vm0, %v1673_v13 }
 0x86a   :  { %9639 = vmatpush3.bf16.msra.mxu1 %v1627_v0  ;;  %v1724_v18 = vpop.f32.mrf.mxu0  ;;  %9640 = vmatprep.mubr.msk.bf16.mxu1 %vm10896_vm2, %v10895_v36  ;;  %v1670_v19 = vpop.f32.mrf.mxu1 }
 0x86b   :  { %9645 = vmatpush3.bf16.msra.mxu0 %v10284_v15  ;;  %9652 = vmatprep.mubr.msk.bf16.mxu0 %vm10896_vm2, %v10895_v36  ;;  %v2166_v15 = vld [vmem:[%s12415_s17 + $0x40] sm:$0x3] }
 0x86c   :  { %v9613_v20 = vpop.f32.mrf.mxu0  ;;  %v9607_v21 = vpop.f32.mrf.mxu1  ;;  %9646 = vmatprep.subr.bf16.mxu0 %v10895_v36  ;;  %9656 = vmatprep.subr.mxu1 %v10895_v36 }
 0x86f   :  { %9647 = vmatpush3.bf16.msra.mxu0 %v10285_v23 }
 0x870   :  { %9648 = vmatprep.subr.bf16.mxu0 %v10895_v36 }
 0x871   :  { %9641 = vmatmul.mubr.msk.bf16.vlgmr.msra.gmra.mxu1 %vm1629_vm3, %v1872_v22 }
 0x872   :  { %9672 = vmatprep.mubr.msk.f32.mxu1 %vm10896_vm2, %v10895_v36  ;;  %9657 = vmatpush3.msra.mxu1 %v2016_v41 }
 0x873   :  { %9649 = vmatpush3.bf16.msra.mxu0 %v10286_v24  ;;  %9658 = vmatprep.subr.mxu1 %v10895_v36 }
 0x874   :  { %9650 = vmatprep.subr.bf16.mxu0 %v10895_v36  ;;  %9659 = vmatpush3.msra.mxu1 %v2015_v42 }
 0x875   :  { %9660 = vmatprep.subr.mxu1 %v10895_v36 }
 0x876   :  { %9661 = vmatpush3.msra.mxu1 %v2014_v43 }
 0x877   :  { %9651 = vmatpush3.bf16.msra.mxu0 %v10287_v25  ;;  %9662 = vmatprep.subr.mxu1 %v10895_v36 }
 0x878   :  { %9675 = vmatprep.subr.mxu0 %v10895_v36  ;;  %9663 = vmatpush3.msra.mxu1 %v2013_v44 }
 0x879   :  { %9664 = vmatprep.subr.mxu1 %v10895_v36 }
 0x87a   :  { %9665 = vmatpush3.msra.mxu1 %v2012_v45 }
 0x87b   :  { %9666 = vmatprep.subr.mxu1 %v10895_v36 }
 0x87c   :  { %9667 = vmatpush3.msra.mxu1 %v2011_v46 }
 0x87d   :  { %9668 = vmatprep.subr.mxu1 %v10895_v36 }
 0x87e   :  { %9669 = vmatpush3.msra.mxu1 %v2010_v47 }
 0x87f   :  { %9670 = vmatprep.subr.mxu1 %v10895_v36 }
 0x880   :  { %9671 = vmatpush3.msra.mxu1 %v2009_v48 }
 0x881   :  { %9700 = vmatprep.subr.bf16.mxu1 %v10895_v36 }
 0x929   :  { %v1798_v26 = vpop.f32.mrf.mxu1  ;;  %v1865_v27 = vpop.f32.mrf.mxu0 }
 0x92a   :  { %v1866_v28 = vadd.f32 %v1865_v27, %v1798_v26 }
 0x92b   :  { %v9624_v29 = vpop.f32.mrf.mxu1  ;;  %v9636_v30 = vpop.f32.mrf.mxu0 }
 0x92c   :  { %v2188_v29 = vld [vmem:[#allocation10] sm:$0x3]  ;;  %v2247_v30 = vld [vmem:[#allocation10 + $0x2] sm:$0x3] }
 0x92d   :  { %v1801_v31 = vpop.f32.mrf.mxu1  ;;  %v1868_v32 = vpop.f32.mrf.mxu0 }
 0x92e   :  { %v10288_v31 = vld [vmem:[%s12416_s25 + $0x38] sm:$0xff]  }
 0x92f   :  { %v9625_v33 = vpop.f32.mrf.mxu1  ;;  %v9637_v34 = vpop.f32.mrf.mxu0  ;;  %v10289_v32 = vld [vmem:[%s12416_s25 + $0x18] sm:$0xff]  }
 0x930   :  { %v10290_v33 = vld [vmem:[%s12416_s25 + $0x30] sm:$0xff]  }
 0x931   :  { %v1910_v35 = vpop.f32.mrf.mxu1  ;;  %v10291_v34 = vld [vmem:[%s12416_s25 + $0x10] sm:$0xff]  }
 0x932   :  { %v1916_v37 = vpack.c.bf16 %v1910_v35, %v1910_v35  ;;  %v10292_v35 = vld [vmem:[%s12416_s25 + $0x28] sm:$0xff]  }
 0x933   :  { %v9642_v38 = vpop.f32.mrf.mxu1 }
 0x934   :  { %9653 = vmatmul.mubr.msk.bf16.vlgmr.msra.gmra.mxu0 %vm310_vm0, %v1916_v37  ;;  %v10293_v37 = vld [vmem:[%s12416_s25 + $0x8] sm:$0xff]   ;;  %v10294_v38 = vld [vmem:[%s12416_s25 + $0x20] sm:$0xff]  }
 0x935   :  { %v1913_v39 = vpop.f32.mrf.mxu1  ;;  %9691 = vmatprep.mubr.msk.f32.mxu0 %vm10896_vm2, %v10895_v36  ;;  %9676 = vmatpush3.msra.mxu0 %v2016_v41 }
 0x936   :  { %9677 = vmatprep.subr.mxu0 %v10895_v36  ;;  %v10295_v39 = vld [vmem:[%s12416_s25] sm:$0xff]  }
 0x937   :  { %v9643_v40 = vpop.f32.mrf.mxu1  ;;  %9678 = vmatpush3.msra.mxu0 %v2015_v42 }
 0x938   :  { %9679 = vmatprep.subr.mxu0 %v10895_v36 }
 0x939   :  { %9680 = vmatpush3.msra.mxu0 %v2014_v43 }
 0x93a   :  { %9681 = vmatprep.subr.mxu0 %v10895_v36 }
 0x93b   :  { %9682 = vmatpush3.msra.mxu0 %v2013_v44  ;;  %v10296_v44 = vld [vmem:[%s12416_s25 + $0x58] sm:$0xff]  }
 0x93c   :  { %9683 = vmatprep.subr.mxu0 %v10895_v36 }
 0x93d   :  { %9684 = vmatpush3.msra.mxu0 %v2012_v45 }
 0x93e   :  { %9685 = vmatprep.subr.mxu0 %v10895_v36 }
 0x93f   :  { %9686 = vmatpush3.msra.mxu0 %v2011_v46 }
 0x940   :  { %9687 = vmatprep.subr.mxu0 %v10895_v36 }
 0x941   :  { %9688 = vmatpush3.msra.mxu0 %v2010_v47 }
 0x942   :  { %9689 = vmatprep.subr.mxu0 %v10895_v36 }
 0x943   :  { %9690 = vmatpush3.msra.mxu0 %v2009_v48 }
 0x944   :  { %9694 = vmatprep.subr.bf16.mxu0 %v10895_v36 }
 0x9f4   :  { %v1987_v49 = vpop.f32.mrf.mxu0 }
 0x9f5   :  { %v1993_v51 = vadd.f32 %v1987_v49, %v1866_v28 }
 0x9f6   :  { %v9654_v52 = vpop.f32.mrf.mxu0 }
 0x9f7   :  { %v1994_v53 = vsel %vm310_vm0, %v1993_v51, 0.0  ;;  %v2001_v54 = vmul.f32 %v1993_v51, %v1993_v51  ;;  %v2436_v52 = vld [vmem:[#allocation10 + $0x4] sm:$0x3] }
 0x9f8   :  { %v1995_v56 = vrot.slane %v1994_v53, 4  ;;  %v1990_v57 = vpop.f32.mrf.mxu0 }
 0x9f9   :  { %v2002_v58 = vsel %vm310_vm0, %v2001_v54, 0.0  ;;  %v10298_v54 = vld [vmem:[%s12416_s25 + $0x48] sm:$0xff]  }
 0x9fa   :  { %v1996_v59 = vadd.f32 %v1995_v56, %v1994_v53  ;;  %v2003_v60 = vrot.slane %v2002_v58, 4  ;;  %v9655_v61 = vpop.f32.mrf.mxu0  ;;  %v10297_v53 = vld [vmem:[%s12416_s25 + $0x50] sm:$0xff]   ;;  %v10299_v56 = vld [vmem:[%s12416_s25 + $0x40] sm:$0xff]  }
 0x9fc   :  { %v1997_v62 = vrot.slane %v1996_v59, 2  ;;  %v2004_v63 = vadd.f32 %v2003_v60, %v2002_v58 }
 0x9fe   :  { %v1998_v0 = vadd.f32 %v1997_v62, %v1996_v59  ;;  %v2005_v1 = vrot.slane %v2004_v63, 2 }
 0xa00   :  { %v1999_v2 = vrot.slane %v1998_v0, 1  ;;  %v2006_v3 = vadd.f32 %v2005_v1, %v2004_v63 }
 0xa02   :  { %v2000_v4 = vadd.f32 %v1999_v2, %v1998_v0  ;;  %v2007_v5 = vrot.slane %v2006_v3, 1 }
 0xa04   :  { %9673 = vmatmul.mubr.msk.f32.vlgmr.msra.gmra.mxu1 %vm310_vm0, %v2000_v4  ;;  %v2008_v6 = vadd.f32 %v2007_v5, %v2006_v3 }
 0xa05   :  { %9702 = vmatprep.mubr.msk.bf16.mxu1 %vm10896_vm2, %v10895_v36 }
 0xa06   :  { %9692 = vmatmul.mubr.msk.f32.vlgmr.msra.gmra.mxu0 %vm310_vm0, %v2008_v6 }
 0xa07   :  { %9696 = vmatprep.mubr.msk.bf16.mxu0 %vm10896_vm2, %v10895_v36 }
 0xac4   :  { %v2086_v7 = vpop.f32.mrf.mxu1 }
 0xac5   :  { %v2163_v8 = vmul.f32 %v2086_v7, %v2086_v7 }
 0xac6   :  { %v9674_v10 = vpop.f32.mrf.mxu1  ;;  %v2159_v11 = vpop.f32.mrf.mxu0 }
 0xac7   :  { %v2164_v9 = vsub.f32 %v2159_v11, %v2163_v8  ;;  %v2576_v8 = vld [vmem:[%s12417_s29 + $0x10] sm:$0xff]  ;;  %v2575_v10 = vld [vmem:[%s12417_s29 + $0x8] sm:$0xff]  ;;  %v2574_v11 = vld [vmem:[%s12417_s29] sm:$0xff] }
 0xac8   :  { %v9693_v12 = vpop.f32.mrf.mxu0 }
 0xac9   :  { %v2165_v13 = vmax.f32 %v2164_v9, 0.0 }
 0xacb   :  { %v2167_v14 = vadd.f32 1e-05, %v2165_v13 }
 0xacd   :  { %10543 = vrsqrt.f32 %v2167_v14 }
 0xada   :  { %v10544_v16 = vpop.eup %10543 }
 0xadb   :  { %v2169_v17 = vmul.f32 %v10544_v16, %v2166_v15 }
 0xadd   :  { %v2170_v18 = vmul.f32 %v2169_v17, %v2086_v7  ;;  %v2178_v20 = vrot.slane %v2169_v17, %v11227_v50  ;;  %v2577_v7 = vld [vmem:[%s12417_s29 + $0x18] sm:$0xff] }
 0xadf   :  { %v2172_v19 = vrot.slane %v2170_v18, 7  ;;  %v2179_v22 = vmul.f32 %v2178_v20, %v1993_v51 }
 0xae1   :  { %v2174_v21 = vsub.f32 %v2166_v15, %v2172_v19 }
 0xae3   :  { %v2183_v23 = vrot.slane %v2174_v21, %v11230_v55 }
 0xae5   :  { %v2184_v24 = vadd.f32 %v2183_v23, %v2179_v22 }
 0xae7   :  { %v2185_v25 = vmul.f32 0.01, %v2184_v24 }
 0xae9   :  { %v2186_v26 = vmax.f32 %v2184_v24, %v2185_v25 }
 0xaeb   :  { %v2187_v27 = vpack.c.bf16 %v2186_v26, %v2186_v26 }
 0xaed   :  { %v2195_v28 = vsel %vm2193_vm4, %v2187_v27, 0 }
 0xaee   :  { %9695 = vmatpush3.bf16.msra.mxu0 %v2195_v28  ;;  %9701 = vmatpush3.bf16.msra.mxu1 %v2195_v28 }
 0xaef   :  { %9706 = vmatprep.subr.bf16.mxu0 %v10895_v36  ;;  %9718 = vmatprep.subr.bf16.mxu1 %v10895_v36 }
 0xaf1   :  { %9697 = vmatmul.mubr.msk.bf16.vlgmr.msra.gmra.mxu0 %vm2189_vm5, %v2188_v29  ;;  %9703 = vmatmul.mubr.msk.bf16.vlgmr.msra.gmra.mxu1 %vm2189_vm5, %v2247_v30 }
 0xaf2   :  { %9707 = vmatpush3.bf16.msra.mxu0 %v10288_v31  ;;  %9719 = vmatpush3.bf16.msra.mxu1 %v10289_v32 }
 0xaf3   :  { %9708 = vmatprep.subr.bf16.mxu0 %v10895_v36  ;;  %9720 = vmatprep.subr.bf16.mxu1 %v10895_v36 }
 0xaf4   :  { %9714 = vmatprep.mubr.msk.bf16.mxu0 %vm10896_vm2, %v10895_v36  ;;  %9726 = vmatprep.mubr.msk.bf16.mxu1 %vm10896_vm2, %v10895_v36 }
 0xaf6   :  { %9709 = vmatpush3.bf16.msra.mxu0 %v10290_v33  ;;  %9721 = vmatpush3.bf16.msra.mxu1 %v10291_v34 }
 0xaf7   :  { %9710 = vmatprep.subr.bf16.mxu0 %v10895_v36  ;;  %9722 = vmatprep.subr.bf16.mxu1 %v10895_v36 }
 0xafa   :  { %9711 = vmatpush3.bf16.msra.mxu0 %v10292_v35  ;;  %9723 = vmatpush3.bf16.msra.mxu1 %v10293_v37 }
 0xafb   :  { %9712 = vmatprep.subr.bf16.mxu0 %v10895_v36  ;;  %9724 = vmatprep.subr.bf16.mxu1 %v10895_v36 }
 0xafe   :  { %9713 = vmatpush3.bf16.msra.mxu0 %v10294_v38  ;;  %9725 = vmatpush3.bf16.msra.mxu1 %v10295_v39 }
 0xaff   :  { %9730 = vmatprep.subr.bf16.mxu0 %v10895_v36  ;;  %9736 = vmatprep.subr.bf16.mxu1 %v10895_v36 }
 0xbb1   :  { %v2231_v40 = vpop.f32.mrf.mxu0  ;;  %v2285_v41 = vpop.f32.mrf.mxu1 }
 0xbb2   :  { %v2237_v42 = vpack.c.bf16 %v2231_v40, %v2231_v40  ;;  %v2291_v43 = vpack.c.bf16 %v2285_v41, %v2285_v41  ;;  %v2727_v40 = vld [vmem:[%s12417_s29 + $0x20] sm:$0x3] }
 0xbb3   :  { %v9704_v45 = vpop.f32.mrf.mxu1  ;;  %v9698_v46 = vpop.f32.mrf.mxu0 }
 0xbb4   :  { %9715 = vmatmul.mubr.msk.bf16.vlgmr.msra.gmra.mxu0 %vm310_vm0, %v2291_v43  ;;  %9727 = vmatmul.mubr.msk.bf16.vlgmr.msra.gmra.mxu1 %vm310_vm0, %v2237_v42 }
 0xbb5   :  { %9731 = vmatpush3.bf16.msra.mxu0 %v2195_v28  ;;  %v2288_v47 = vpop.f32.mrf.mxu1  ;;  %9732 = vmatprep.mubr.msk.bf16.mxu0 %vm10896_vm2, %v10895_v36  ;;  %v2234_v48 = vpop.f32.mrf.mxu0 }
 0xbb6   :  { %9737 = vmatpush3.bf16.msra.mxu1 %v10296_v44  ;;  %9744 = vmatprep.mubr.msk.bf16.mxu1 %vm10896_vm2, %v10895_v36 }
 0xbb7   :  { %v9705_v49 = vpop.f32.mrf.mxu1  ;;  %v9699_v51 = vpop.f32.mrf.mxu0  ;;  %9738 = vmatprep.subr.bf16.mxu1 %v10895_v36  ;;  %9748 = vmatprep.subr.mxu0 %v10895_v36 }
 0xbba   :  { %9739 = vmatpush3.bf16.msra.mxu1 %v10297_v53 }
 0xbbb   :  { %9740 = vmatprep.subr.bf16.mxu1 %v10895_v36 }
 0xbbc   :  { %9733 = vmatmul.mubr.msk.bf16.vlgmr.msra.gmra.mxu0 %vm2189_vm5, %v2436_v52 }
 0xbbd   :  { %9756 = vmatprep.mubr.msk.f32.mxu0 %vm10896_vm2, %v10895_v36  ;;  %9749 = vmatpush3.msra.mxu0 %v2577_v7 }
 0xbbe   :  { %9741 = vmatpush3.bf16.msra.mxu1 %v10298_v54  ;;  %9750 = vmatprep.subr.mxu0 %v10895_v36 }
 0xbbf   :  { %9742 = vmatprep.subr.bf16.mxu1 %v10895_v36  ;;  %9751 = vmatpush3.msra.mxu0 %v2576_v8 }
 0xbc0   :  { %9752 = vmatprep.subr.mxu0 %v10895_v36 }
 0xbc1   :  { %9753 = vmatpush3.msra.mxu0 %v2575_v10 }
 0xbc2   :  { %9743 = vmatpush3.bf16.msra.mxu1 %v10299_v56  ;;  %9754 = vmatprep.subr.mxu0 %v10895_v36  ;;  %v2749_v56 = vld [vmem:[#allocation11] sm:$0x1] }
 0xbc3   :  { %9770 = vmatprep.subr.bf16.mxu1 %v10895_v36  ;;  %9755 = vmatpush3.msra.mxu0 %v2574_v11 }
 0xbc4   :  { %9759 = vmatprep.subr.mxu0 %v10895_v36 }
 0xc74   :  { %v2362_v57 = vpop.f32.mrf.mxu0  ;;  %v2429_v58 = vpop.f32.mrf.mxu1 }
 0xc75   :  { %v2430_v59 = vadd.f32 %v2429_v58, %v2362_v57  ;;  %v2804_v57 = vld [vmem:[#allocation11 + $0x1] sm:$0x1] }
 0xc76   :  { %v9716_v60 = vpop.f32.mrf.mxu0  ;;  %v9728_v61 = vpop.f32.mrf.mxu1  ;;  %v10300_v58 = vld [vmem:[#allocation13 + $0x18] sm:$0xff]  }
 0xc77   :  { %v10302_v60 = vld [vmem:[#allocation13 + $0x10] sm:$0xff]   ;;  %v10303_v61 = vld [vmem:[#allocation13] sm:$0xff]  }
 0xc78   :  { %v2365_v62 = vpop.f32.mrf.mxu0  ;;  %v2432_v63 = vpop.f32.mrf.mxu1 }
 0xc7a   :  { %v9717_v0 = vpop.f32.mrf.mxu0  ;;  %v9729_v1 = vpop.f32.mrf.mxu1 }
 0xc7c   :  { %v2474_v2 = vpop.f32.mrf.mxu0 }
 0xc7d   :  { %v2480_v3 = vpack.c.bf16 %v2474_v2, %v2474_v2 }
 0xc7e   :  { %v9734_v4 = vpop.f32.mrf.mxu0 }
 0xc7f   :  { %9745 = vmatmul.mubr.msk.bf16.vlgmr.msra.gmra.mxu1 %vm310_vm0, %v2480_v3 }
 0xc80   :  { %v2477_v5 = vpop.f32.mrf.mxu0  ;;  %9772 = vmatprep.mubr.msk.bf16.mxu1 %vm10896_vm2, %v10895_v36 }
 0xc82   :  { %v9735_v6 = vpop.f32.mrf.mxu0 }
 0xd3f   :  { %v2551_v9 = vpop.f32.mrf.mxu1 }
 0xd40   :  { %v2557_v12 = vadd.f32 %v2551_v9, %v2430_v59  ;;  %v10301_v59 = vld [vmem:[#allocation13 + $0x8] sm:$0xff]  }
 0xd41   :  { %v9746_v13 = vpop.f32.mrf.mxu1  ;;  %v10307_v9 = vld [vmem:[#allocation16] sm:$0xff]  }
 0xd42   :  { %v2559_v14 = vsel %vm2558_vm6, %v2557_v12, 0.0  ;;  %v2566_v15 = vmul.f32 %v2557_v12, %v2557_v12  ;;  %v10310_v13 = vld [vmem:[%s12418_s12 + $0x10] sm:$0xff]  }
 0xd43   :  { %v2560_v16 = vrot.slane %v2559_v14, 4  ;;  %v2554_v17 = vpop.f32.mrf.mxu1 }
 0xd44   :  { %v2567_v18 = vsel %vm2558_vm6, %v2566_v15, 0.0 }
 0xd45   :  { %v2561_v19 = vadd.f32 %v2560_v16, %v2559_v14  ;;  %v2568_v20 = vrot.slane %v2567_v18, 4  ;;  %v9747_v21 = vpop.f32.mrf.mxu1  ;;  %v8236_v16 = vld [vmem:[#allocation14] ss:$0 sm:$0xff] }
 0xd47   :  { %v2562_v22 = vrot.slane %v2561_v19, 2  ;;  %v2569_v23 = vadd.f32 %v2568_v20, %v2567_v18 }
 0xd49   :  { %v2563_v24 = vadd.f32 %v2562_v22, %v2561_v19  ;;  %v2570_v25 = vrot.slane %v2569_v23, 2 }
 0xd4b   :  { %v2564_v26 = vrot.slane %v2563_v24, 1  ;;  %v2571_v28 = vadd.f32 %v2570_v25, %v2569_v23 }
 0xd4d   :  { %v2565_v27 = vadd.f32 %v2564_v26, %v2563_v24  ;;  %v2572_v29 = vrot.slane %v2571_v28, 1  ;;  %v10309_v26 = vld [vmem:[%s12418_s12 + $0x38] sm:$0xff]  }
 0xd4f   :  { %9757 = vmatmul.mubr.msk.f32.vlgmr.msra.gmra.mxu0 %vm461_vm1, %v2565_v27  ;;  %v2573_v30 = vadd.f32 %v2572_v29, %v2571_v28  ;;  %v10311_v28 = vld [vmem:[%s12418_s12 + $0x30] sm:$0xff]   ;;  %v10312_v29 = vld [vmem:[%s12418_s12 + $0x8] sm:$0xff]  }
 0xd50   :  { %9760 = vmatpush3.msra.mxu0 %v2577_v7  ;;  %9767 = vmatprep.mubr.msk.f32.mxu0 %vm10896_vm2, %v10895_v36 }
 0xd51   :  { %9761 = vmatprep.subr.mxu0 %v10895_v36 }
 0xd52   :  { %9762 = vmatpush3.msra.mxu0 %v2576_v8  ;;  %v10304_v8 = vld [vmem:[#allocation16 + $0x18] sm:$0xff]  }
 0xd53   :  { %9763 = vmatprep.subr.mxu0 %v10895_v36 }
 0xd54   :  { %9764 = vmatpush3.msra.mxu0 %v2575_v10  ;;  %v10305_v10 = vld [vmem:[#allocation16 + $0x10] sm:$0xff]  }
 0xd55   :  { %9765 = vmatprep.subr.mxu0 %v10895_v36 }
 0xd56   :  { %9766 = vmatpush3.msra.mxu0 %v2574_v11  ;;  %v10306_v11 = vld [vmem:[#allocation16 + $0x8] sm:$0xff]  }
 0xd57   :  { %9768 = vmatmul.mubr.msk.f32.vlgmr.msra.gmra.mxu0 %vm461_vm1, %v2573_v30  ;;  %9776 = vmatprep.subr.bf16.mxu0 %v10895_v36  ;;  %v10313_v30 = vld [vmem:[%s12418_s12 + $0x28] sm:$0xff]  }
 0xd58   :  { %9778 = vmatprep.mubr.msk.bf16.mxu0 %vm10896_vm2, %v10895_v36 }
 0xe0f   :  { %v2647_v31 = vpop.f32.mrf.mxu0 }
 0xe10   :  { %v2724_v33 = vmul.f32 %v2647_v31, %v2647_v31 }
 0xe11   :  { %v9758_v32 = vpop.f32.mrf.mxu0 }
 0xe12   :  { %v10315_v32 = vld [vmem:[%s12418_s12 + $0x20] sm:$0xff]  }
 0xe17   :  { %v2720_v34 = vpop.f32.mrf.mxu0 }
 0xe18   :  { %v2725_v35 = vsub.f32 %v2720_v34, %v2724_v33  ;;  %v8237_v33 = vld [vmem:[#allocation17] ss:$0 sm:$0xff] }
 0xe19   :  { %v9769_v37 = vpop.f32.mrf.mxu0 }
 0xe1a   :  { %v2726_v38 = vmax.f32 %v2725_v35, 0.0 }
 0xe1c   :  { %v2728_v39 = vadd.f32 1e-05, %v2726_v38 }
 0xe1e   :  { %10545 = vrsqrt.f32 %v2728_v39 }
 0xe2b   :  { %v10546_v41 = vpop.eup %10545 }
 0xe2c   :  { %v2730_v42 = vmul.f32 %v10546_v41, %v2727_v40 }
 0xe2e   :  { %v2731_v43 = vmul.f32 %v2730_v42, %v2647_v31  ;;  %v2739_v45 = vrot.slane %v2730_v42, %v11227_v50  ;;  %v10314_v31 = vld [vmem:[%s12418_s12] sm:$0xff]  }
 0xe30   :  { %v2733_v44 = vrot.slane %v2731_v43, 7  ;;  %v2740_v47 = vmul.f32 %v2739_v45, %v2557_v12  ;;  %v10308_v12 = vld [vmem:[%s12418_s12 + $0x18] sm:$0xff]  }
 0xe32   :  { %v2735_v46 = vsub.f32 %v2727_v40, %v2733_v44 }
 0xe34   :  { %v2744_v48 = vrot.slane %v2735_v46, %v11230_v55 }
 0xe36   :  { %v2745_v49 = vadd.f32 %v2744_v48, %v2740_v47 }
 0xe38   :  { %v2746_v51 = vmul.f32 0.01, %v2745_v49 }
 0xe3a   :  { %v2747_v52 = vmax.f32 %v2745_v49, %v2746_v51 }
 0xe3c   :  { %v2748_v53 = vpack.c.bf16 %v2747_v52, %v2747_v52  ;;  %v8261_v52 = vld [vmem:[%s12419_s27 + $0x2] sm:$0x3] }
 0xe3e   :  { %v2756_v54 = vsel %vm2754_vm7, %v2748_v53, 0 }
 0xe3f   :  { %9771 = vmatpush3.bf16.msra.mxu1 %v2756_v54  ;;  %9777 = vmatpush3.bf16.msra.mxu0 %v2756_v54 }
 0xe40   :  { %9782 = vmatprep.subr.bf16.mxu1 %v10895_v36  ;;  %9790 = vmatprep.subr.bf16.mxu0 %v10895_v36 }
 0xe42   :  { %9773 = vmatmul.mubr.msk.bf16.vlgmr.msra.gmra.mxu1 %vm2750_vm8, %v2749_v56  ;;  %9779 = vmatmul.mubr.msk.bf16.vlgmr.msra.gmra.mxu0 %vm2750_vm8, %v2804_v57  ;;  %v3135_v57 = vld [vmem:[%s12419_s27] sm:$0x3] }
 0xe43   :  { %9783 = vmatpush3.bf16.msra.mxu1 %v10300_v58  ;;  %9791 = vmatpush3.bf16.msra.mxu0 %v10301_v59 }
 0xe44   :  { %9784 = vmatprep.subr.bf16.mxu1 %v10895_v36  ;;  %9792 = vmatprep.subr.bf16.mxu0 %v10895_v36 }
 0xe45   :  { %9786 = vmatprep.mubr.msk.bf16.mxu1 %vm10896_vm2, %v10895_v36  ;;  %9794 = vmatprep.mubr.msk.bf16.mxu0 %vm10896_vm2, %v10895_v36 }
 0xe47   :  { %9785 = vmatpush3.bf16.msra.mxu1 %v10302_v60  ;;  %9793 = vmatpush3.bf16.msra.mxu0 %v10303_v61 }
 0xe48   :  { %9798 = vmatprep.subr.bf16.mxu1 %v10895_v36  ;;  %9810 = vmatprep.subr.bf16.mxu0 %v10895_v36 }
 0xf02   :  { %v2792_v62 = vpop.f32.mrf.mxu1  ;;  %v2842_v63 = vpop.f32.mrf.mxu0 }
 0xf03   :  { %v2798_v0 = vpack.c.bf16 %v2792_v62, %v2792_v62  ;;  %v2848_v1 = vpack.c.bf16 %v2842_v63, %v2842_v63 }
 0xf04   :  { %v9774_v2 = vpop.f32.mrf.mxu1  ;;  %v9780_v3 = vpop.f32.mrf.mxu0 }
 0xf05   :  { %9787 = vmatmul.mubr.msk.bf16.vlgmr.msra.gmra.mxu1 %vm461_vm1, %v2848_v1  ;;  %9795 = vmatmul.mubr.msk.bf16.vlgmr.msra.gmra.mxu0 %vm461_vm1, %v2798_v0 }
 0xf06   :  { %v2795_v4 = vpop.f32.mrf.mxu1  ;;  %v2845_v5 = vpop.f32.mrf.mxu0  ;;  %9806 = vmatprep.mubr.msk.bf16.mxu1 %vm10896_vm2, %v10895_v36  ;;  %9818 = vmatprep.mubr.msk.bf16.mxu0 %vm10896_vm2, %v10895_v36 }
 0xf07   :  { %9799 = vmatpush3.bf16.msra.mxu1 %v10304_v8  ;;  %9811 = vmatpush3.bf16.msra.mxu0 %v10308_v12  ;;  %v8265_v5 = vld [vmem:[%s12420_s4 + $0x4] sm:$0xf]  ;;  %v10317_v8 = vld [vmem:[%s12421_s0 + $0x10] sm:$0xff]  }
 0xf08   :  { %v9775_v6 = vpop.f32.mrf.mxu1  ;;  %v9781_v7 = vpop.f32.mrf.mxu0  ;;  %9800 = vmatprep.subr.bf16.mxu1 %v10895_v36  ;;  %9812 = vmatprep.subr.bf16.mxu0 %v10895_v36 }
 0xf09   :  { %v3308_v6 = vld [vmem:[%s12420_s4] sm:$0xf]  ;;  %v10316_v7 = vld [vmem:[%s12421_s0 + $0x18] sm:$0xff]  }
 0xf0b   :  { %9801 = vmatpush3.bf16.msra.mxu1 %v10305_v10  ;;  %9813 = vmatpush3.bf16.msra.mxu0 %v10310_v13  ;;  %v10318_v10 = vld [vmem:[%s12421_s0 + $0x8] sm:$0xff]  }
 0xf0c   :  { %9802 = vmatprep.subr.bf16.mxu1 %v10895_v36  ;;  %9814 = vmatprep.subr.bf16.mxu0 %v10895_v36 }
 0xf0f   :  { %9803 = vmatpush3.bf16.msra.mxu1 %v10306_v11  ;;  %9815 = vmatpush3.bf16.msra.mxu0 %v10312_v29  ;;  %v10319_v11 = vld [vmem:[%s12421_s0] sm:$0xff]  }
 0xf10   :  { %9804 = vmatprep.subr.bf16.mxu1 %v10895_v36  ;;  %9816 = vmatprep.subr.bf16.mxu0 %v10895_v36 }
 0xf13   :  { %9805 = vmatpush3.bf16.msra.mxu1 %v10307_v9  ;;  %9817 = vmatpush3.bf16.msra.mxu0 %v10314_v31 }
 0xf14   :  { %9822 = vmatprep.subr.bf16.mxu1 %v10895_v36  ;;  %9834 = vmatprep.subr.bf16.mxu0 %v10895_v36 }
 0xfc5   :  { %v2903_v14 = vpop.f32.mrf.mxu1  ;;  %v2958_v15 = vpop.f32.mrf.mxu0 }
 0xfc6   :  { %v2959_v17 = vadd.f32 %v2958_v15, %v2903_v14 }
 0xfc7   :  { %v9788_v18 = vpop.f32.mrf.mxu1  ;;  %v9796_v19 = vpop.f32.mrf.mxu0 }
 0xfc8   :  { %v2971_v20 = vadd.f32 %v8236_v16, %v2959_v17 }
 0xfc9   :  { %v2906_v21 = vpop.f32.mrf.mxu1  ;;  %v2961_v22 = vpop.f32.mrf.mxu0 }
 0xfca   :  { %10547 = vtanh.f32 %v2971_v20  ;;  %v8277_v21 = vld [vmem:[%s12420_s4 + $0x8] sm:$0xf] }
 0xfcb   :  { %v9789_v23 = vpop.f32.mrf.mxu1  ;;  %v9797_v24 = vpop.f32.mrf.mxu0  ;;  %v10320_v22 = vld [vmem:[%s12421_s0 + $0x28] sm:$0xff]  }
 0xfcc   :  { %v10321_v23 = vld [vmem:[%s12421_s0 + $0x20] sm:$0xff]  }
 0xfd7   :  { %v10548_v25 = vpop.eup %10547 }
 0xfd8   :  { %v2975_v27 = vpack.c.bf16 %v10548_v25, %v10548_v25  ;;  %2974 = vst.msk [vmem:[#allocation19] sm:$0x3] %vm2973_vm9, %v10548_v25 }
 0xfda   :  { %9807 = vmatmul.mubr.msk.bf16.vlgmr.msra.gmra.mxu1 %vm310_vm0, %v2975_v27 }
 0xfdb   :  { %9823 = vmatpush3.bf16.msra.mxu1 %v10309_v26  ;;  %9830 = vmatprep.mubr.msk.bf16.mxu1 %vm10896_vm2, %v10895_v36 }
 0xfdc   :  { %9824 = vmatprep.subr.bf16.mxu1 %v10895_v36 }
 0xfdf   :  { %9825 = vmatpush3.bf16.msra.mxu1 %v10311_v28 }
 0xfe0   :  { %9826 = vmatprep.subr.bf16.mxu1 %v10895_v36 }
 0xfe3   :  { %9827 = vmatpush3.bf16.msra.mxu1 %v10313_v30 }
 0xfe4   :  { %9828 = vmatprep.subr.bf16.mxu1 %v10895_v36 }
 0xfe7   :  { %9829 = vmatpush3.bf16.msra.mxu1 %v10315_v32 }
 0xfe8   :  { %9846 = vmatprep.subr.bf16.mxu1 %v10895_v36 }
0x109a   :  { %v3052_v34 = vpop.f32.mrf.mxu1 }
0x109b   :  { %v3053_v35 = vadd.f32 %v8237_v33, %v3052_v34 }
0x109c   :  { %v9808_v37 = vpop.f32.mrf.mxu1 }
0x109d   :  { %v3058_v38 = vmax.f32 %v3053_v35, 0.0 }
0x109e   :  { %v3055_v39 = vpop.f32.mrf.mxu1 }
0x109f   :  { %v3059_v40 = vpack.c.bf16 %v3058_v38, %v3058_v38  ;;  %v3650_v39 = vld [vmem:[%s12422_s11 + $0x38] sm:$0xff] }
0x10a0   :  { %v9809_v41 = vpop.f32.mrf.mxu1 }
0x10a1   :  { %9819 = vmatmul.mubr.msk.bf16.vlgmr.msra.gmra.mxu0 %vm310_vm0, %v3059_v40  ;;  %9831 = vmatmul.mubr.msk.bf16.vlgmr.msra.gmra.mxu1 %vm310_vm0, %v3059_v40  ;;  %v3649_v40 = vld [vmem:[%s12422_s11 + $0x30] sm:$0xff]  ;;  %v3648_v41 = vld [vmem:[%s12422_s11 + $0x28] sm:$0xff] }
0x10a2   :  { %9836 = vmatprep.mubr.msk.bf16.mxu0 %vm10896_vm2, %v10895_v36  ;;  %9848 = vmatprep.mubr.msk.bf16.mxu1 %vm10896_vm2, %v10895_v36 }
0x1161   :  { %v3129_v42 = vpop.f32.mrf.mxu0  ;;  %v3204_v43 = vpop.f32.mrf.mxu1 }
0x1162   :  { %v3212_v44 = vpack.c.bf16 %v3204_v43, %v3204_v43  ;;  %v3136_v47 = vpack.c.bf16 %v3129_v42, %v3129_v42  ;;  %v3647_v42 = vld [vmem:[%s12422_s11 + $0x20] sm:$0xff]  ;;  %v3646_v43 = vld [vmem:[%s12422_s11 + $0x18] sm:$0xff] }
0x1163   :  { %v9820_v45 = vpop.f32.mrf.mxu0  ;;  %v9832_v46 = vpop.f32.mrf.mxu1 }
0x1164   :  { %v3219_v48 = vsel %vm3217_vm10, %v3212_v44, 0  ;;  %v3265_v56 = vsel %vm3217_vm10, %v3136_v47, 0  ;;  %v3645_v44 = vld [vmem:[%s12422_s11 + $0x10] sm:$0xff]  ;;  %v3644_v45 = vld [vmem:[%s12422_s11 + $0x8] sm:$0xff]  ;;  %v3643_v46 = vld [vmem:[%s12422_s11] sm:$0xff] }
0x1165   :  { %v3132_v49 = vpop.f32.mrf.mxu0  ;;  %v3207_v51 = vpop.f32.mrf.mxu1  ;;  %9835 = vmatpush3.bf16.msra.mxu0 %v3219_v48 }
0x1166   :  { %9840 = vmatprep.subr.bf16.mxu0 %v10895_v36 }
0x1167   :  { %v9821_v53 = vpop.f32.mrf.mxu0  ;;  %v9833_v54 = vpop.f32.mrf.mxu1 }
0x1168   :  { %9837 = vmatmul.mubr.msk.bf16.vlgmr.msra.gmra.mxu0 %vm3213_vm11, %v8261_v52 }
0x1169   :  { %9841 = vmatpush3.bf16.msra.mxu0 %v3265_v56  ;;  %9842 = vmatprep.mubr.msk.bf16.mxu0 %vm10896_vm2, %v10895_v36 }
0x116a   :  { %9852 = vmatprep.subr.bf16.mxu0 %v10895_v36 }
0x1170   :  { %9843 = vmatmul.mubr.msk.bf16.vlgmr.msra.gmra.mxu0 %vm3213_vm11, %v3135_v57 }
0x1171   :  { %9854 = vmatprep.mubr.msk.bf16.mxu0 %vm10896_vm2, %v10895_v36 }
0x1228   :  { %v3255_v58 = vpop.f32.mrf.mxu0 }
0x122a   :  { %v9838_v59 = vpop.f32.mrf.mxu0 }
0x122c   :  { %v3258_v60 = vpop.f32.mrf.mxu0 }
0x122e   :  { %v9839_v61 = vpop.f32.mrf.mxu0 }
0x1230   :  { %v3301_v62 = vpop.f32.mrf.mxu0 }
0x1231   :  { %v3302_v63 = vadd.f32 %v3301_v62, %v3255_v58 }
0x1232   :  { %v9844_v0 = vpop.f32.mrf.mxu0 }
0x1233   :  { %v3307_v1 = vpack.c.bf16 %v3302_v63, %v3302_v63 }
0x1234   :  { %v3304_v2 = vpop.f32.mrf.mxu0 }
0x1235   :  { %v3313_v3 = vsel %vm2754_vm7, %v3307_v1, 0 }
0x1236   :  { %v9845_v4 = vpop.f32.mrf.mxu0  ;;  %9847 = vmatpush3.bf16.msra.mxu1 %v3313_v3  ;;  %9853 = vmatpush3.bf16.msra.mxu0 %v3313_v3 }
0x1237   :  { %9858 = vmatprep.subr.bf16.mxu1 %v10895_v36  ;;  %9866 = vmatprep.subr.bf16.mxu0 %v10895_v36 }
0x1239   :  { %9855 = vmatmul.mubr.msk.bf16.vlgmr.msra.gmra.mxu0 %vm2750_vm8, %v8265_v5  ;;  %9849 = vmatmul.mubr.msk.bf16.vlgmr.msra.gmra.mxu1 %vm2750_vm8, %v3308_v6 }
0x123a   :  { %9859 = vmatpush3.bf16.msra.mxu1 %v10316_v7  ;;  %9862 = vmatprep.mubr.msk.bf16.mxu1 %vm10896_vm2, %v10895_v36 }
0x123b   :  { %9860 = vmatprep.subr.bf16.mxu1 %v10895_v36  ;;  %9870 = vmatprep.mubr.msk.bf16.mxu0 %vm10896_vm2, %v10895_v36 }
0x123c   :  { %9867 = vmatpush3.bf16.msra.mxu0 %v10318_v10 }
0x123d   :  { %9868 = vmatprep.subr.bf16.mxu0 %v10895_v36 }
0x123e   :  { %9861 = vmatpush3.bf16.msra.mxu1 %v10317_v8 }
0x123f   :  { %9874 = vmatprep.subr.bf16.mxu1 %v10895_v36 }
0x1240   :  { %9869 = vmatpush3.bf16.msra.mxu0 %v10319_v11 }
0x1241   :  { %9880 = vmatprep.subr.bf16.mxu0 %v10895_v36 }
0x12f9   :  { %v3399_v9 = vpop.f32.mrf.mxu0  ;;  %v3349_v12 = vpop.f32.mrf.mxu1 }
0x12fa   :  { %v3405_v13 = vpack.c.bf16 %v3399_v9, %v3399_v9  ;;  %v3355_v14 = vpack.c.bf16 %v3349_v12, %v3349_v12 }
0x12fb   :  { %v9856_v15 = vpop.f32.mrf.mxu0  ;;  %v9850_v16 = vpop.f32.mrf.mxu1 }
0x12fc   :  { %9863 = vmatmul.mubr.msk.bf16.vlgmr.msra.gmra.mxu1 %vm461_vm1, %v3405_v13  ;;  %9871 = vmatmul.mubr.msk.bf16.vlgmr.msra.gmra.mxu0 %vm461_vm1, %v3355_v14  ;;  %v3800_v13 = vld [vmem:[%s12422_s11 + $0x40] sm:$0x3] }
0x12fd   :  { %9875 = vmatpush3.bf16.msra.mxu1 %v3313_v3  ;;  %v3402_v17 = vpop.f32.mrf.mxu0  ;;  %9876 = vmatprep.mubr.msk.bf16.mxu1 %vm10896_vm2, %v10895_v36  ;;  %v3352_v18 = vpop.f32.mrf.mxu1 }
0x12fe   :  { %9884 = vmatprep.mubr.msk.bf16.mxu0 %vm10896_vm2, %v10895_v36  ;;  %9888 = vmatprep.subr.mxu1 %v10895_v36 }
0x12ff   :  { %v9857_v19 = vpop.f32.mrf.mxu0  ;;  %v9851_v20 = vpop.f32.mrf.mxu1  ;;  %9881 = vmatpush3.bf16.msra.mxu0 %v10320_v22 }
0x1300   :  { %9882 = vmatprep.subr.bf16.mxu0 %v10895_v36 }
0x1303   :  { %9883 = vmatpush3.bf16.msra.mxu0 %v10321_v23 }
0x1304   :  { %9877 = vmatmul.mubr.msk.bf16.vlgmr.msra.gmra.mxu1 %vm2750_vm8, %v8277_v21  ;;  %9907 = vmatprep.subr.mxu0 %v10895_v36 }
0x1305   :  { %9904 = vmatprep.mubr.msk.f32.mxu1 %vm10896_vm2, %v10895_v36  ;;  %9889 = vmatpush3.msra.mxu1 %v3650_v39 }
0x1306   :  { %9890 = vmatprep.subr.mxu1 %v10895_v36 }
0x1307   :  { %9891 = vmatpush3.msra.mxu1 %v3649_v40 }
0x1308   :  { %9892 = vmatprep.subr.mxu1 %v10895_v36 }
0x1309   :  { %9893 = vmatpush3.msra.mxu1 %v3648_v41 }
0x130a   :  { %9894 = vmatprep.subr.mxu1 %v10895_v36 }
0x130b   :  { %9895 = vmatpush3.msra.mxu1 %v3647_v42 }
0x130c   :  { %9896 = vmatprep.subr.mxu1 %v10895_v36 }
0x130d   :  { %9897 = vmatpush3.msra.mxu1 %v3646_v43 }
0x130e   :  { %9898 = vmatprep.subr.mxu1 %v10895_v36 }
0x130f   :  { %9899 = vmatpush3.msra.mxu1 %v3645_v44 }
0x1310   :  { %9900 = vmatprep.subr.mxu1 %v10895_v36 }
0x1311   :  { %9901 = vmatpush3.msra.mxu1 %v3644_v45 }
0x1312   :  { %9902 = vmatprep.subr.mxu1 %v10895_v36 }
0x1313   :  { %9903 = vmatpush3.msra.mxu1 %v3643_v46 }
0x1314   :  { %9926 = vmatprep.subr.bf16.mxu1 %v10895_v36 }
0x13bc   :  { %v3460_v24 = vpop.f32.mrf.mxu1  ;;  %v3515_v25 = vpop.f32.mrf.mxu0 }
0x13bd   :  { %v3516_v26 = vadd.f32 %v3515_v25, %v3460_v24 }
0x13be   :  { %v9864_v27 = vpop.f32.mrf.mxu1  ;;  %v9872_v28 = vpop.f32.mrf.mxu0 }
0x13bf   :  { %v10322_v27 = vld [vmem:[%s12423_s6] sm:$0xff]   ;;  %v10323_v28 = vld [vmem:[%s12423_s6 + $0x8] sm:$0xff]  }
0x13c0   :  { %v3463_v29 = vpop.f32.mrf.mxu1  ;;  %v3518_v30 = vpop.f32.mrf.mxu0 }
0x13c1   :  { %v10324_v29 = vld [vmem:[%s12424_s15 + $0x38] sm:$0xff]  }
0x13c2   :  { %v9865_v31 = vpop.f32.mrf.mxu1  ;;  %v9873_v32 = vpop.f32.mrf.mxu0  ;;  %v10325_v30 = vld [vmem:[%s12424_s15 + $0x18] sm:$0xff]  }
0x13c3   :  { %v10326_v31 = vld [vmem:[%s12424_s15 + $0x30] sm:$0xff]  }
0x13c4   :  { %v3560_v33 = vpop.f32.mrf.mxu1  ;;  %v10327_v32 = vld [vmem:[%s12424_s15 + $0x10] sm:$0xff]  }
0x13c5   :  { %v3566_v34 = vpack.c.bf16 %v3560_v33, %v3560_v33  ;;  %v10328_v33 = vld [vmem:[%s12424_s15 + $0x28] sm:$0xff]  }
0x13c6   :  { %v9878_v35 = vpop.f32.mrf.mxu1 }
0x13c7   :  { %9885 = vmatmul.mubr.msk.bf16.vlgmr.msra.gmra.mxu0 %vm461_vm1, %v3566_v34  ;;  %v10329_v34 = vld [vmem:[%s12424_s15 + $0x8] sm:$0xff]   ;;  %v10330_v35 = vld [vmem:[%s12424_s15 + $0x20] sm:$0xff]  }
0x13c8   :  { %v3563_v37 = vpop.f32.mrf.mxu1  ;;  %9923 = vmatprep.mubr.msk.f32.mxu0 %vm10896_vm2, %v10895_v36  ;;  %9908 = vmatpush3.msra.mxu0 %v3650_v39 }
0x13c9   :  { %9909 = vmatprep.subr.mxu0 %v10895_v36  ;;  %v10331_v37 = vld [vmem:[%s12424_s15] sm:$0xff]  }
0x13ca   :  { %v9879_v38 = vpop.f32.mrf.mxu1  ;;  %9910 = vmatpush3.msra.mxu0 %v3649_v40 }
0x13cb   :  { %9911 = vmatprep.subr.mxu0 %v10895_v36 }
0x13cc   :  { %9912 = vmatpush3.msra.mxu0 %v3648_v41 }
0x13cd   :  { %9913 = vmatprep.subr.mxu0 %v10895_v36 }
0x13ce   :  { %9914 = vmatpush3.msra.mxu0 %v3647_v42 }
0x13cf   :  { %9915 = vmatprep.subr.mxu0 %v10895_v36 }
0x13d0   :  { %9916 = vmatpush3.msra.mxu0 %v3646_v43 }
0x13d1   :  { %9917 = vmatprep.subr.mxu0 %v10895_v36 }
0x13d2   :  { %9918 = vmatpush3.msra.mxu0 %v3645_v44 }
0x13d3   :  { %9919 = vmatprep.subr.mxu0 %v10895_v36 }
0x13d4   :  { %9920 = vmatpush3.msra.mxu0 %v3644_v45 }
0x13d5   :  { %9921 = vmatprep.subr.mxu0 %v10895_v36 }
0x13d6   :  { %9922 = vmatpush3.msra.mxu0 %v3643_v46 }
0x13d7   :  { %9932 = vmatprep.subr.bf16.mxu0 %v10895_v36 }
0x1487   :  { %v3621_v47 = vpop.f32.mrf.mxu0 }
0x1488   :  { %v3627_v48 = vadd.f32 %v3621_v47, %v3516_v26 }
0x1489   :  { %v9886_v49 = vpop.f32.mrf.mxu0 }
0x148a   :  { %v3628_v51 = vsel %vm310_vm0, %v3627_v48, 0.0  ;;  %v3635_v52 = vmul.f32 %v3627_v48, %v3627_v48  ;;  %v10333_v49 = vld [vmem:[%s12424_s15 + $0x58] sm:$0xff]  }
0x148b   :  { %v3629_v53 = vrot.slane %v3628_v51, 4  ;;  %v3624_v54 = vpop.f32.mrf.mxu0 }
0x148c   :  { %v3636_v56 = vsel %vm310_vm0, %v3635_v52, 0.0  ;;  %v10335_v52 = vld [vmem:[%s12424_s15 + $0x48] sm:$0xff]  }
0x148d   :  { %v3630_v57 = vadd.f32 %v3629_v53, %v3628_v51  ;;  %v3637_v58 = vrot.slane %v3636_v56, 4  ;;  %v9887_v59 = vpop.f32.mrf.mxu0  ;;  %v10334_v51 = vld [vmem:[%s12424_s15 + $0x50] sm:$0xff]   ;;  %v10336_v53 = vld [vmem:[%s12424_s15 + $0x40] sm:$0xff]  }
0x148f   :  { %v3631_v60 = vrot.slane %v3630_v57, 2  ;;  %v3638_v61 = vadd.f32 %v3637_v58, %v3636_v56 }
0x1491   :  { %v3632_v62 = vadd.f32 %v3631_v60, %v3630_v57  ;;  %v3639_v63 = vrot.slane %v3638_v61, 2 }
0x1493   :  { %v3633_v0 = vrot.slane %v3632_v62, 1  ;;  %v3640_v1 = vadd.f32 %v3639_v63, %v3638_v61 }
0x1495   :  { %v3634_v2 = vadd.f32 %v3633_v0, %v3632_v62  ;;  %v3641_v3 = vrot.slane %v3640_v1, 1 }
0x1497   :  { %9905 = vmatmul.mubr.msk.f32.vlgmr.msra.gmra.mxu1 %vm310_vm0, %v3634_v2  ;;  %v3642_v4 = vadd.f32 %v3641_v3, %v3640_v1 }
0x1498   :  { %9928 = vmatprep.mubr.msk.bf16.mxu1 %vm10896_vm2, %v10895_v36 }
0x1499   :  { %9924 = vmatmul.mubr.msk.f32.vlgmr.msra.gmra.mxu0 %vm310_vm0, %v3642_v4 }
0x149a   :  { %9934 = vmatprep.mubr.msk.bf16.mxu0 %vm10896_vm2, %v10895_v36 }
0x1557   :  { %v3720_v5 = vpop.f32.mrf.mxu1 }
0x1558   :  { %v3797_v6 = vmul.f32 %v3720_v5, %v3720_v5 }
0x1559   :  { %v9906_v7 = vpop.f32.mrf.mxu1  ;;  %v3793_v8 = vpop.f32.mrf.mxu0 }
0x155a   :  { %v3798_v10 = vsub.f32 %v3793_v8, %v3797_v6  ;;  %v4242_v6 = vld [vmem:[%s12425_s16 + $0x38] sm:$0xff]  ;;  %v4241_v7 = vld [vmem:[%s12425_s16 + $0x30] sm:$0xff]  ;;  %v4240_v8 = vld [vmem:[%s12425_s16 + $0x28] sm:$0xff] }
0x155b   :  { %v9925_v11 = vpop.f32.mrf.mxu0 }
0x155c   :  { %v3799_v9 = vmax.f32 %v3798_v10, 0.0  ;;  %v4239_v10 = vld [vmem:[%s12425_s16 + $0x20] sm:$0xff]  ;;  %v4238_v11 = vld [vmem:[%s12425_s16 + $0x18] sm:$0xff] }
0x155e   :  { %v3801_v12 = vadd.f32 1e-05, %v3799_v9  ;;  %v4237_v9 = vld [vmem:[%s12425_s16 + $0x10] sm:$0xff] }
0x1560   :  { %10549 = vrsqrt.f32 %v3801_v12  ;;  %v4236_v12 = vld [vmem:[%s12425_s16 + $0x8] sm:$0xff] }
0x156d   :  { %v10550_v14 = vpop.eup %10549 }
0x156e   :  { %v3803_v15 = vmul.f32 %v10550_v14, %v3800_v13 }
0x1570   :  { %v3804_v16 = vmul.f32 %v3803_v15, %v3720_v5  ;;  %v3812_v18 = vrot.slane %v3803_v15, %v11227_v50 }
0x1572   :  { %v3806_v17 = vrot.slane %v3804_v16, 7  ;;  %v3813_v20 = vmul.f32 %v3812_v18, %v3627_v48  ;;  %v10332_v48 = vld [vmem:[%s12423_s6 + $0x10] sm:$0xff]  }
0x1574   :  { %v3808_v19 = vsub.f32 %v3800_v13, %v3806_v17  ;;  %v4235_v13 = vld [vmem:[%s12425_s16] sm:$0xff] }
0x1576   :  { %v3817_v21 = vrot.slane %v3808_v19, %v11230_v55 }
0x1578   :  { %v3818_v22 = vadd.f32 %v3817_v21, %v3813_v20 }
0x157a   :  { %v3819_v23 = vmul.f32 0.01, %v3818_v22 }
0x157c   :  { %v3820_v24 = vmax.f32 %v3818_v22, %v3819_v23 }
0x157e   :  { %v3821_v25 = vpack.c.bf16 %v3820_v24, %v3820_v24 }
0x1580   :  { %v3833_v26 = vsel %vm2193_vm4, %v3821_v25, 0 }
0x1581   :  { %9927 = vmatpush3.bf16.msra.mxu1 %v3833_v26  ;;  %9933 = vmatpush3.bf16.msra.mxu0 %v3833_v26 }
0x1582   :  { %9938 = vmatprep.subr.bf16.mxu1 %v10895_v36  ;;  %9950 = vmatprep.subr.bf16.mxu0 %v10895_v36 }
0x1584   :  { %9929 = vmatmul.mubr.msk.bf16.vlgmr.msra.gmra.mxu1 %vm2189_vm5, %v10322_v27  ;;  %9935 = vmatmul.mubr.msk.bf16.vlgmr.msra.gmra.mxu0 %vm2189_vm5, %v10323_v28 }
0x1585   :  { %9939 = vmatpush3.bf16.msra.mxu1 %v10324_v29  ;;  %9951 = vmatpush3.bf16.msra.mxu0 %v10325_v30 }
0x1586   :  { %9940 = vmatprep.subr.bf16.mxu1 %v10895_v36  ;;  %9952 = vmatprep.subr.bf16.mxu0 %v10895_v36 }
0x1587   :  { %9946 = vmatprep.mubr.msk.bf16.mxu1 %vm10896_vm2, %v10895_v36  ;;  %9958 = vmatprep.mubr.msk.bf16.mxu0 %vm10896_vm2, %v10895_v36 }
0x1589   :  { %9941 = vmatpush3.bf16.msra.mxu1 %v10326_v31  ;;  %9953 = vmatpush3.bf16.msra.mxu0 %v10327_v32 }
0x158a   :  { %9942 = vmatprep.subr.bf16.mxu1 %v10895_v36  ;;  %9954 = vmatprep.subr.bf16.mxu0 %v10895_v36 }
0x158d   :  { %9943 = vmatpush3.bf16.msra.mxu1 %v10328_v33  ;;  %9955 = vmatpush3.bf16.msra.mxu0 %v10329_v34 }
0x158e   :  { %9944 = vmatprep.subr.bf16.mxu1 %v10895_v36  ;;  %9956 = vmatprep.subr.bf16.mxu0 %v10895_v36 }
0x1591   :  { %9945 = vmatpush3.bf16.msra.mxu1 %v10330_v35  ;;  %9957 = vmatpush3.bf16.msra.mxu0 %v10331_v37 }
0x1592   :  { %9962 = vmatprep.subr.bf16.mxu1 %v10895_v36  ;;  %9968 = vmatprep.subr.bf16.mxu0 %v10895_v36 }
0x1644   :  { %v3869_v38 = vpop.f32.mrf.mxu1  ;;  %v3930_v39 = vpop.f32.mrf.mxu0 }
0x1646   :  { %v9930_v40 = vpop.f32.mrf.mxu1  ;;  %v9936_v41 = vpop.f32.mrf.mxu0 }
0x1647   :  { %v10337_v41 = vld [vmem:[%s12426_s18 + $0x38] sm:$0xff]  }
0x1648   :  { %v3872_v42 = vpop.f32.mrf.mxu1  ;;  %v3933_v43 = vpop.f32.mrf.mxu0 }
0x1649   :  { %v3876_v44 = vpack.c.bf16 %v3872_v42, %v3869_v38  ;;  %v3937_v45 = vpack.c.bf16 %v3933_v43, %v3930_v39  ;;  %v10338_v42 = vld [vmem:[%s12426_s18 + $0x30] sm:$0xff]   ;;  %v10339_v43 = vld [vmem:[%s12426_s18 + $0x28] sm:$0xff]  }
0x164a   :  { %v9937_v46 = vpop.f32.mrf.mxu0  ;;  %v9931_v47 = vpop.f32.mrf.mxu1 }
0x164b   :  { %9947 = vmatmul.mubr.msk.bf16.vlgmr.msra.gmra.mxu1 %vm310_vm0, %v3937_v45  ;;  %9959 = vmatmul.mubr.msk.bf16.vlgmr.msra.gmra.mxu0 %vm310_vm0, %v3876_v44  ;;  %v10340_v44 = vld [vmem:[%s12426_s18 + $0x20] sm:$0xff]  }
0x164c   :  { %9963 = vmatpush3.bf16.msra.mxu1 %v3833_v26  ;;  %9964 = vmatprep.mubr.msk.bf16.mxu1 %vm10896_vm2, %v10895_v36  ;;  %v10341_v45 = vld [vmem:[%s12427_s22] sm:$0xff]  }
0x164d   :  { %9976 = vmatprep.mubr.msk.bf16.mxu0 %vm10896_vm2, %v10895_v36  ;;  %9980 = vmatprep.subr.mxu1 %v10895_v36 }
0x164e   :  { %9969 = vmatpush3.bf16.msra.mxu0 %v10333_v49 }
0x164f   :  { %9970 = vmatprep.subr.bf16.mxu0 %v10895_v36 }
0x1652   :  { %9971 = vmatpush3.bf16.msra.mxu0 %v10334_v51 }
0x1653   :  { %9965 = vmatmul.mubr.msk.bf16.vlgmr.msra.gmra.mxu1 %vm2189_vm5, %v10332_v48  ;;  %9972 = vmatprep.subr.bf16.mxu0 %v10895_v36 }
0x1654   :  { %9996 = vmatprep.mubr.msk.f32.mxu1 %vm10896_vm2, %v10895_v36  ;;  %9981 = vmatpush3.msra.mxu1 %v4242_v6 }
0x1655   :  { %9982 = vmatprep.subr.mxu1 %v10895_v36 }
0x1656   :  { %9973 = vmatpush3.bf16.msra.mxu0 %v10335_v52  ;;  %9983 = vmatpush3.msra.mxu1 %v4241_v7 }
0x1657   :  { %9974 = vmatprep.subr.bf16.mxu0 %v10895_v36  ;;  %9984 = vmatprep.subr.mxu1 %v10895_v36 }
0x1658   :  { %9985 = vmatpush3.msra.mxu1 %v4240_v8 }
0x1659   :  { %9986 = vmatprep.subr.mxu1 %v10895_v36 }
0x165a   :  { %9975 = vmatpush3.bf16.msra.mxu0 %v10336_v53  ;;  %9987 = vmatpush3.msra.mxu1 %v4239_v10 }
0x165b   :  { %9999 = vmatprep.subr.mxu0 %v10895_v36  ;;  %9988 = vmatprep.subr.mxu1 %v10895_v36 }
0x165c   :  { %9989 = vmatpush3.msra.mxu1 %v4238_v11 }
0x165d   :  { %9990 = vmatprep.subr.mxu1 %v10895_v36 }
0x165e   :  { %9991 = vmatpush3.msra.mxu1 %v4237_v9 }
0x165f   :  { %9992 = vmatprep.subr.mxu1 %v10895_v36 }
0x1660   :  { %9993 = vmatpush3.msra.mxu1 %v4236_v12 }
0x1661   :  { %9994 = vmatprep.subr.mxu1 %v10895_v36 }
0x1662   :  { %9995 = vmatpush3.msra.mxu1 %v4235_v13 }
0x170b   :  { %v4008_v54 = vpop.f32.mrf.mxu1  ;;  %v4076_v56 = vpop.f32.mrf.mxu0 }
0x170c   :  { %v4077_v57 = vadd.f32 %v4076_v56, %v4008_v54  ;;  %v4392_v56 = vld [vmem:[%s12425_s16 + $0x40] sm:$0x3] }
0x170d   :  { %v9948_v58 = vpop.f32.mrf.mxu1  ;;  %v9960_v59 = vpop.f32.mrf.mxu0 }
0x170f   :  { %v4011_v60 = vpop.f32.mrf.mxu1  ;;  %v4079_v61 = vpop.f32.mrf.mxu0 }
0x1710   :  { %v4080_v62 = vadd.f32 %v4079_v61, %v4011_v60 }
0x1711   :  { %v9949_v63 = vpop.f32.mrf.mxu1  ;;  %v9961_v0 = vpop.f32.mrf.mxu0 }
0x1713   :  { %v4128_v1 = vpop.f32.mrf.mxu1 }
0x1715   :  { %v9966_v2 = vpop.f32.mrf.mxu1 }
0x1717   :  { %v4131_v3 = vpop.f32.mrf.mxu1 }
0x1718   :  { %v4135_v4 = vpack.c.bf16 %v4131_v3, %v4128_v1 }
0x1719   :  { %v9967_v5 = vpop.f32.mrf.mxu1 }
0x171a   :  { %9977 = vmatmul.mubr.msk.bf16.vlgmr.msra.gmra.mxu0 %vm310_vm0, %v4135_v4 }
0x171b   :  { %10015 = vmatprep.mubr.msk.f32.mxu0 %vm10896_vm2, %v10895_v36  ;;  %10000 = vmatpush3.msra.mxu0 %v4242_v6 }
0x171c   :  { %10001 = vmatprep.subr.mxu0 %v10895_v36 }
0x171d   :  { %10002 = vmatpush3.msra.mxu0 %v4241_v7 }
0x171e   :  { %10003 = vmatprep.subr.mxu0 %v10895_v36 }
0x171f   :  { %10004 = vmatpush3.msra.mxu0 %v4240_v8 }
0x1720   :  { %10005 = vmatprep.subr.mxu0 %v10895_v36 }
0x1721   :  { %10006 = vmatpush3.msra.mxu0 %v4239_v10  ;;  %v10342_v10 = vld [vmem:[%s12427_s22 + $0x8] sm:$0xff]  }
0x1722   :  { %10007 = vmatprep.subr.mxu0 %v10895_v36 }
0x1723   :  { %10008 = vmatpush3.msra.mxu0 %v4238_v11  ;;  %v10343_v11 = vld [vmem:[%s12427_s22 + $0x10] sm:$0xff]  }
0x1724   :  { %10009 = vmatprep.subr.mxu0 %v10895_v36 }
0x1725   :  { %10010 = vmatpush3.msra.mxu0 %v4237_v9  ;;  %v10345_v9 = vld [vmem:[%s12426_s18 + $0x18] sm:$0xff]  }
0x1726   :  { %10011 = vmatprep.subr.mxu0 %v10895_v36 }
0x1727   :  { %10012 = vmatpush3.msra.mxu0 %v4236_v12  ;;  %v10344_v12 = vld [vmem:[%s12427_s22 + $0x18] sm:$0xff]  }
0x1728   :  { %10013 = vmatprep.subr.mxu0 %v10895_v36 }
0x1729   :  { %10014 = vmatpush3.msra.mxu0 %v4235_v13  ;;  %v10346_v13 = vld [vmem:[%s12426_s18 + $0x10] sm:$0xff]  }
0x172a   :  { %10030 = vmatprep.subr.bf16.mxu0 %v10337_v41 }
0x17da   :  { %v4206_v14 = vpop.f32.mrf.mxu0 }
0x17db   :  { %v4213_v15 = vadd.f32 %v4206_v14, %v4077_v57  ;;  %v10347_v14 = vld [vmem:[%s12426_s18 + $0x8] sm:$0xff]  }
0x17dc   :  { %v9978_v16 = vpop.f32.mrf.mxu0 }
0x17dd   :  { %v4224_v18 = vmul.f32 %v4213_v15, %v4213_v15  ;;  %v4215_v21 = vsel %vm310_vm0, %v4213_v15, 0.0 }
0x17de   :  { %v4209_v17 = vpop.f32.mrf.mxu0 }
0x17df   :  { %v4214_v19 = vadd.f32 %v4209_v17, %v4080_v62  ;;  %v4226_v25 = vsel %vm310_vm0, %v4224_v18, 0.0 }
0x17e0   :  { %v9979_v20 = vpop.f32.mrf.mxu0 }
0x17e1   :  { %v4216_v22 = vsel %vm310_vm0, %v4214_v19, 0.0  ;;  %v4225_v23 = vmul.f32 %v4214_v19, %v4214_v19 }
0x17e2   :  { %v4217_v24 = vadd.f32 %v4216_v22, %v4215_v21 }
0x17e3   :  { %v4227_v26 = vsel %vm310_vm0, %v4225_v23, 0.0 }
0x17e4   :  { %v4218_v27 = vrot.slane %v4217_v24, 4  ;;  %v4228_v28 = vadd.f32 %v4227_v26, %v4226_v25 }
0x17e6   :  { %v4219_v29 = vadd.f32 %v4218_v27, %v4217_v24  ;;  %v4229_v30 = vrot.slane %v4228_v28, 4  ;;  %v10349_v27 = vld [vmem:[%s12427_s22 + $0x20] sm:$0xff]  }
0x17e8   :  { %v4220_v31 = vrot.slane %v4219_v29, 2  ;;  %v4230_v32 = vadd.f32 %v4229_v30, %v4228_v28  ;;  %v10351_v30 = vld [vmem:[%s12426_s18 + $0x58] sm:$0xff]  }
0x17ea   :  { %v4221_v33 = vadd.f32 %v4220_v31, %v4219_v29  ;;  %v4231_v34 = vrot.slane %v4230_v32, 2  ;;  %v10350_v29 = vld [vmem:[%s12427_s22 + $0x28] sm:$0xff]   ;;  %v10352_v31 = vld [vmem:[%s12426_s18 + $0x50] sm:$0xff]  }
0x17ec   :  { %v4222_v35 = vrot.slane %v4221_v33, 1  ;;  %v4232_v37 = vadd.f32 %v4231_v34, %v4230_v32  ;;  %v10353_v32 = vld [vmem:[%s12426_s18 + $0x48] sm:$0xff]   ;;  %v4937_v34 = vld [vmem:[%s12428_s20 + $0x78] sm:$0xff] }
0x17ee   :  { %v4223_v38 = vadd.f32 %v4222_v35, %v4221_v33  ;;  %v4233_v39 = vrot.slane %v4232_v37, 1  ;;  %v10354_v33 = vld [vmem:[%s12426_s18 + $0x40] sm:$0xff]   ;;  %v4936_v35 = vld [vmem:[%s12428_s20 + $0x70] sm:$0xff] }
0x17f0   :  { %9997 = vmatmul.mubr.msk.f32.vlgmr.msra.gmra.mxu1 %vm310_vm0, %v4223_v38  ;;  %v4234_v40 = vadd.f32 %v4233_v39, %v4232_v37 }
0x17f1   :  { %10020 = vmatprep.mubr.msk.bf16.mxu1 %vm1629_vm3, %v10341_v45 }
0x17f2   :  { %10016 = vmatmul.mubr.msk.f32.vlgmr.msra.gmra.mxu0 %vm310_vm0, %v4234_v40 }
0x17f3   :  { %10031 = vmatpush3.bf16.msra.mxu0 %v10337_v41 }
0x17f4   :  { %10032 = vmatprep.subr.bf16.mxu0 %v10338_v42 }
0x17f7   :  { %10033 = vmatpush3.bf16.msra.mxu0 %v10338_v42 }
0x17f8   :  { %10034 = vmatprep.subr.bf16.mxu0 %v10339_v43 }
0x17fb   :  { %10035 = vmatpush3.bf16.msra.mxu0 %v10339_v43 }
0x17fc   :  { %10036 = vmatprep.subr.bf16.mxu0 %v10340_v44 }
0x17ff   :  { %10037 = vmatpush3.bf16.msra.mxu0 %v10340_v44 }
0x18b0   :  { %v4312_v46 = vpop.f32.mrf.mxu1 }
0x18b1   :  { %v4389_v47 = vmul.f32 %v4312_v46, %v4312_v46 }
0x18b2   :  { %v9998_v48 = vpop.f32.mrf.mxu1  ;;  %v4385_v49 = vpop.f32.mrf.mxu0 }
0x18b3   :  { %v4390_v51 = vsub.f32 %v4385_v49, %v4389_v47  ;;  %v4935_v47 = vld [vmem:[%s12428_s20 + $0x68] sm:$0xff]  ;;  %v4934_v48 = vld [vmem:[%s12428_s20 + $0x60] sm:$0xff]  ;;  %v4933_v49 = vld [vmem:[%s12428_s20 + $0x58] sm:$0xff] }
0x18b4   :  { %v10017_v52 = vpop.f32.mrf.mxu0 }
0x18b5   :  { %v4391_v53 = vmax.f32 %v4390_v51, 0.0  ;;  %v4932_v51 = vld [vmem:[%s12428_s20 + $0x50] sm:$0xff]  ;;  %v4931_v52 = vld [vmem:[%s12428_s20 + $0x48] sm:$0xff] }
0x18b7   :  { %v4393_v54 = vadd.f32 1e-05, %v4391_v53  ;;  %v4930_v53 = vld [vmem:[%s12428_s20 + $0x40] sm:$0xff] }
0x18b9   :  { %10551 = vrsqrt.f32 %v4393_v54  ;;  %v4929_v54 = vld [vmem:[%s12428_s20 + $0x38] sm:$0xff] }
0x18c6   :  { %v10552_v57 = vpop.eup %10551 }
0x18c7   :  { %v4395_v58 = vmul.f32 %v10552_v57, %v4392_v56  ;;  %v4927_v57 = vld [vmem:[%s12428_s20 + $0x28] sm:$0xff] }
0x18c9   :  { %v4396_v59 = vmul.f32 %v4395_v58, %v4312_v46  ;;  %v4404_v61 = vrot.slane %v4395_v58, %v11227_v50  ;;  %v4926_v58 = vld [vmem:[%s12428_s20 + $0x20] sm:$0xff] }
0x18cb   :  { %v4398_v60 = vrot.slane %v4396_v59, 7  ;;  %v4405_v63 = vmul.f32 %v4404_v61, %v4213_v15  ;;  %v4406_v0 = vmul.f32 %v4404_v61, %v4214_v19  ;;  %v10348_v15 = vld [vmem:[%s12426_s18] sm:$0xff]   ;;  %v4925_v59 = vld [vmem:[%s12428_s20 + $0x18] sm:$0xff]  ;;  %v4923_v61 = vld [vmem:[%s12428_s20 + $0x8] sm:$0xff] }
0x18cd   :  { %v4400_v62 = vsub.f32 %v4392_v56, %v4398_v60  ;;  %v4928_v56 = vld [vmem:[%s12428_s20 + $0x30] sm:$0xff] }
0x18ce   :  { %v4924_v60 = vld [vmem:[%s12428_s20 + $0x10] sm:$0xff] }
0x18cf   :  { %v4410_v1 = vrot.slane %v4400_v62, %v11230_v55  ;;  %v4922_v62 = vld [vmem:[%s12428_s20] sm:$0xff] }
0x18d1   :  { %v4411_v2 = vadd.f32 %v4410_v1, %v4405_v63  ;;  %v4412_v3 = vadd.f32 %v4410_v1, %v4406_v0 }
0x18d3   :  { %v4413_v4 = vmul.f32 0.01, %v4411_v2  ;;  %v4414_v5 = vmul.f32 0.01, %v4412_v3 }
0x18d5   :  { %v4415_v6 = vmax.f32 %v4411_v2, %v4413_v4  ;;  %v4416_v7 = vmax.f32 %v4412_v3, %v4414_v5 }
0x18d7   :  { %v4417_v8 = vpack.c.bf16 %v4416_v7, %v4415_v6 }
0x18d9   :  { %10018 = vmatprep.subr.bf16.mxu1 %v4417_v8  ;;  %10054 = vmatprep.subr.bf16.mxu0 %v4417_v8 }
0x18da   :  { %10019 = vmatpush3.bf16.msra.mxu1 %v4417_v8 }
0x18db   :  { %10024 = vmatprep.subr.bf16.mxu1 %v4417_v8 }
0x18dd   :  { %10021 = vmatmul.mubr.msk.bf16.vlgmr.msra.gmra.mxu1 %vm1629_vm3, %v10342_v10 }
0x18de   :  { %10025 = vmatpush3.bf16.msra.mxu1 %v4417_v8  ;;  %10026 = vmatprep.mubr.msk.bf16.mxu1 %vm1629_vm3, %v10343_v11 }
0x18df   :  { %10042 = vmatprep.subr.bf16.mxu1 %v10345_v9 }
0x18e5   :  { %10027 = vmatmul.mubr.msk.bf16.vlgmr.msra.gmra.mxu1 %vm1629_vm3, %v10344_v12 }
0x18e6   :  { %10043 = vmatpush3.bf16.msra.mxu1 %v10345_v9 }
0x18e7   :  { %10044 = vmatprep.subr.bf16.mxu1 %v10346_v13 }
0x18ea   :  { %10045 = vmatpush3.bf16.msra.mxu1 %v10346_v13 }
0x18eb   :  { %10046 = vmatprep.subr.bf16.mxu1 %v10347_v14 }
0x18ee   :  { %10047 = vmatpush3.bf16.msra.mxu1 %v10347_v14 }
0x18ef   :  { %10048 = vmatprep.subr.bf16.mxu1 %v10348_v15 }
0x18f2   :  { %10049 = vmatpush3.bf16.msra.mxu1 %v10348_v15 }
0x18f3   :  { %10060 = vmatprep.subr.bf16.mxu1 %v10351_v30 }
0x199d   :  { %v10022_v16 = vpop.f32.mrf.mxu1 }
0x199f   :  { %v4472_v17 = vpop.f32.mrf.mxu1 }
0x19a1   :  { %v10023_v18 = vpop.f32.mrf.mxu1 }
0x19a2   :  { %v4488_v21 = vpack.c.bf16 %v10023_v18, %v10022_v16 }
0x19a3   :  { %v4475_v19 = vpop.f32.mrf.mxu1 }
0x19a4   :  { %v4487_v20 = vpack.c.bf16 %v4475_v19, %v4472_v17 }
0x19a5   :  { %v10028_v22 = vpop.f32.mrf.mxu1 }
0x19a6   :  { %10050 = vmatprep.mubr.msk.bf16.mxu1 %vm310_vm0, %v4487_v20 }
0x19a7   :  { %v4552_v23 = vpop.f32.mrf.mxu1  ;;  %10051 = vmatmul.mubr.msk.bf16.vlgmr.msra.gmra.mxu1 %vm310_vm0, %v4488_v21 }
0x19a8   :  { %10061 = vmatpush3.bf16.msra.mxu1 %v10351_v30 }
0x19a9   :  { %v10029_v24 = vpop.f32.mrf.mxu1  ;;  %10062 = vmatprep.subr.bf16.mxu1 %v10352_v31 }
0x19aa   :  { %v4568_v28 = vpack.c.bf16 %v10029_v24, %v10028_v22 }
0x19ab   :  { %v4555_v25 = vpop.f32.mrf.mxu1 }
0x19ac   :  { %v4567_v26 = vpack.c.bf16 %v4555_v25, %v4552_v23  ;;  %10063 = vmatpush3.bf16.msra.mxu1 %v10352_v31 }
0x19ad   :  { %10064 = vmatprep.subr.bf16.mxu1 %v10353_v32 }
0x19ae   :  { %10038 = vmatprep.mubr.msk.bf16.mxu0 %vm310_vm0, %v4567_v26 }
0x19af   :  { %10039 = vmatmul.mubr.msk.bf16.vlgmr.msra.gmra.mxu0 %vm310_vm0, %v4568_v28 }
0x19b0   :  { %10055 = vmatpush3.bf16.msra.mxu0 %v4417_v8  ;;  %10056 = vmatprep.mubr.msk.bf16.mxu0 %vm1629_vm3, %v10349_v27 }
0x19b1   :  { %10072 = vmatprep.subr.mxu0 %v10895_v36  ;;  %10065 = vmatpush3.bf16.msra.mxu1 %v10353_v32 }
0x19b2   :  { %10066 = vmatprep.subr.bf16.mxu1 %v10354_v33 }
0x19b5   :  { %10067 = vmatpush3.bf16.msra.mxu1 %v10354_v33 }
0x19b6   :  { %10107 = vmatprep.subr.mxu1 %v10895_v36 }
0x19b7   :  { %10057 = vmatmul.mubr.msk.bf16.vlgmr.msra.gmra.mxu0 %vm1629_vm3, %v10350_v29 }
0x19b8   :  { %10104 = vmatprep.mubr.msk.f32.mxu0 %vm10896_vm2, %v10895_v36  ;;  %10073 = vmatpush3.msra.mxu0 %v4937_v34 }
0x19b9   :  { %10074 = vmatprep.subr.mxu0 %v10895_v36 }
0x19ba   :  { %10075 = vmatpush3.msra.mxu0 %v4936_v35 }
0x19bb   :  { %10076 = vmatprep.subr.mxu0 %v10895_v36 }
0x19bc   :  { %10077 = vmatpush3.msra.mxu0 %v4935_v47 }
0x19bd   :  { %10078 = vmatprep.subr.mxu0 %v10895_v36 }
0x19be   :  { %10079 = vmatpush3.msra.mxu0 %v4934_v48 }
0x19bf   :  { %10080 = vmatprep.subr.mxu0 %v10895_v36 }
0x19c0   :  { %10081 = vmatpush3.msra.mxu0 %v4933_v49 }
0x19c1   :  { %10082 = vmatprep.subr.mxu0 %v10895_v36 }
0x19c2   :  { %10083 = vmatpush3.msra.mxu0 %v4932_v51 }
0x19c3   :  { %10084 = vmatprep.subr.mxu0 %v10895_v36 }
0x19c4   :  { %10085 = vmatpush3.msra.mxu0 %v4931_v52 }
0x19c5   :  { %10086 = vmatprep.subr.mxu0 %v10895_v36 }
0x19c6   :  { %10087 = vmatpush3.msra.mxu0 %v4930_v53 }
0x19c7   :  { %10088 = vmatprep.subr.mxu0 %v10895_v36 }
0x19c8   :  { %10089 = vmatpush3.msra.mxu0 %v4929_v54 }
0x19c9   :  { %10090 = vmatprep.subr.mxu0 %v10895_v36 }
0x19ca   :  { %10091 = vmatpush3.msra.mxu0 %v4928_v56 }
0x19cb   :  { %10092 = vmatprep.subr.mxu0 %v10895_v36 }
0x19cc   :  { %10093 = vmatpush3.msra.mxu0 %v4927_v57 }
0x19cd   :  { %10094 = vmatprep.subr.mxu0 %v10895_v36 }
0x19ce   :  { %10095 = vmatpush3.msra.mxu0 %v4926_v58 }
0x19cf   :  { %10096 = vmatprep.subr.mxu0 %v10895_v36 }
0x19d0   :  { %10097 = vmatpush3.msra.mxu0 %v4925_v59 }
0x19d1   :  { %10098 = vmatprep.subr.mxu0 %v10895_v36 }
0x19d2   :  { %10099 = vmatpush3.msra.mxu0 %v4924_v60 }
0x19d3   :  { %10100 = vmatprep.subr.mxu0 %v10895_v36 }
0x19d4   :  { %10101 = vmatpush3.msra.mxu0 %v4923_v61 }
0x19d5   :  { %10102 = vmatprep.subr.mxu0 %v10895_v36 }
0x19d6   :  { %10103 = vmatpush3.msra.mxu0 %v4922_v62 }
0x1a67   :  { %v10052_v63 = vpop.f32.mrf.mxu1 }
0x1a69   :  { %v4721_v0 = vpop.f32.mrf.mxu1 }
0x1a6b   :  { %v10053_v1 = vpop.f32.mrf.mxu1 }
0x1a6d   :  { %v4724_v2 = vpop.f32.mrf.mxu1 }
0x1a6f   :  { %v11740_v37 = vpop.f32.mrf.mxu0 }
0x1a70   :  { %v4730_v7 = vadd.f32 %v10052_v63, %v11740_v37  ;;  %v10355_v37 = vld [vmem:[%s12429_s9] sm:$0xff]  }
0x1a71   :  { %v11742_v38 = vpop.f32.mrf.mxu0 }
0x1a72   :  { %v4722_v5 = vadd.f32 %v4721_v0, %v11742_v38  ;;  %v10356_v38 = vld [vmem:[%s12429_s9 + $0x20] sm:$0xff]  }
0x1a73   :  { %v11744_v39 = vpop.f32.mrf.mxu0 }
0x1a74   :  { %v4733_v9 = vadd.f32 %v10053_v1, %v11744_v39 }
0x1a75   :  { %v11746_v40 = vpop.f32.mrf.mxu0 }
0x1a76   :  { %v4725_v8 = vadd.f32 %v4724_v2, %v11746_v40 }
0x1a77   :  { %v10058_v41 = vpop.f32.mrf.mxu0 }
0x1a79   :  { %v4791_v42 = vpop.f32.mrf.mxu0 }
0x1a7b   :  { %v10059_v43 = vpop.f32.mrf.mxu0 }
0x1a7c   :  { %v4807_v46 = vpack.c.bf16 %v10059_v43, %v10058_v41 }
0x1a7d   :  { %v4794_v44 = vpop.f32.mrf.mxu0 }
0x1a7e   :  { %v4806_v45 = vpack.c.bf16 %v4794_v44, %v4791_v42 }
0x1a80   :  { %10068 = vmatprep.mubr.msk.bf16.mxu1 %vm310_vm0, %v4806_v45 }
0x1a81   :  { %10069 = vmatmul.mubr.msk.bf16.vlgmr.msra.gmra.mxu1 %vm310_vm0, %v4807_v46 }
0x1a82   :  { %10108 = vmatpush3.msra.mxu1 %v4937_v34  ;;  %10139 = vmatprep.mubr.msk.f32.mxu1 %vm10896_vm2, %v10895_v36 }
0x1a83   :  { %10109 = vmatprep.subr.mxu1 %v10895_v36 }
0x1a84   :  { %10110 = vmatpush3.msra.mxu1 %v4936_v35 }
0x1a85   :  { %10111 = vmatprep.subr.mxu1 %v10895_v36 }
0x1a86   :  { %10112 = vmatpush3.msra.mxu1 %v4935_v47  ;;  %v5081_v47 = vld [vmem:[%s12428_s20 + $0x80] sm:$0x3] }
0x1a87   :  { %10113 = vmatprep.subr.mxu1 %v10895_v36 }
0x1a88   :  { %10114 = vmatpush3.msra.mxu1 %v4934_v48 }
0x1a89   :  { %10115 = vmatprep.subr.mxu1 %v10895_v36 }
0x1a8a   :  { %10116 = vmatpush3.msra.mxu1 %v4933_v49 }
0x1a8b   :  { %10117 = vmatprep.subr.mxu1 %v10895_v36 }
0x1a8c   :  { %10118 = vmatpush3.msra.mxu1 %v4932_v51 }
0x1a8d   :  { %10119 = vmatprep.subr.mxu1 %v10895_v36 }
0x1a8e   :  { %10120 = vmatpush3.msra.mxu1 %v4931_v52 }
0x1a8f   :  { %10121 = vmatprep.subr.mxu1 %v10895_v36 }
0x1a90   :  { %10122 = vmatpush3.msra.mxu1 %v4930_v53 }
0x1a91   :  { %10123 = vmatprep.subr.mxu1 %v10895_v36 }
0x1a92   :  { %10124 = vmatpush3.msra.mxu1 %v4929_v54 }
0x1a93   :  { %10125 = vmatprep.subr.mxu1 %v10895_v36 }
0x1a94   :  { %10126 = vmatpush3.msra.mxu1 %v4928_v56 }
0x1a95   :  { %10127 = vmatprep.subr.mxu1 %v10895_v36 }
0x1a96   :  { %10128 = vmatpush3.msra.mxu1 %v4927_v57 }
0x1a97   :  { %10129 = vmatprep.subr.mxu1 %v10895_v36 }
0x1a98   :  { %10130 = vmatpush3.msra.mxu1 %v4926_v58 }
0x1a99   :  { %10131 = vmatprep.subr.mxu1 %v10895_v36 }
0x1a9a   :  { %10132 = vmatpush3.msra.mxu1 %v4925_v59 }
0x1a9b   :  { %10133 = vmatprep.subr.mxu1 %v10895_v36 }
0x1a9c   :  { %10134 = vmatpush3.msra.mxu1 %v4924_v60 }
0x1a9d   :  { %10135 = vmatprep.subr.mxu1 %v10895_v36 }
0x1a9e   :  { %10136 = vmatpush3.msra.mxu1 %v4923_v61 }
0x1a9f   :  { %10137 = vmatprep.subr.mxu1 %v10895_v36 }
0x1aa0   :  { %10138 = vmatpush3.msra.mxu1 %v4922_v62 }
0x1b41   :  { %v10070_v3 = vpop.f32.mrf.mxu1 }
0x1b42   :  { %v4898_v36 = vadd.f32 %v10070_v3, %v4730_v7 }
0x1b43   :  { %v4881_v4 = vpop.f32.mrf.mxu1 }
0x1b44   :  { %v4896_v10 = vadd.f32 %v4881_v4, %v4722_v5  ;;  %v4911_v17 = vmul.f32 %v4898_v36, %v4898_v36 }
0x1b45   :  { %v10071_v6 = vpop.f32.mrf.mxu1 }
0x1b46   :  { %v4909_v13 = vmul.f32 %v4896_v10, %v4896_v10  ;;  %v4899_v14 = vadd.f32 %v10071_v6, %v4733_v9  ;;  %v10361_v9 = vld [vmem:[%s12430_s13 + $0xf4] ss:$8 sps:$4 sm:$0xff]  }
0x1b47   :  { %v4884_v11 = vpop.f32.mrf.mxu1 }
0x1b48   :  { %v4897_v12 = vadd.f32 %v4884_v11, %v4725_v8  ;;  %v4912_v20 = vmul.f32 %v4899_v14, %v4899_v14 }
0x1b4a   :  { %v4900_v15 = vadd.f32 %v4897_v12, %v4896_v10  ;;  %v4910_v16 = vmul.f32 %v4897_v12, %v4897_v12 }
0x1b4c   :  { %v4901_v18 = vadd.f32 %v4900_v15, %v4898_v36  ;;  %v4913_v19 = vadd.f32 %v4910_v16, %v4909_v13  ;;  %v10358_v13 = vld [vmem:[%s12429_s9 + $0x28] sm:$0xff]   ;;  %v10371_v15 = vld [vmem:[%s12429_s9 + $0x30] sm:$0xff]  }
0x1b4d   :  { %v10364_v16 = vld [vmem:[%s12430_s13 + $0xe4] ss:$8 sps:$4 sm:$0xff]  }
0x1b4e   :  { %v4902_v21 = vadd.f32 %v4901_v18, %v4899_v14  ;;  %v4914_v22 = vadd.f32 %v4913_v19, %v4911_v17  ;;  %v10372_v17 = vld [vmem:[%s12429_s9 + $0x10] sm:$0xff]   ;;  %v10392_v19 = vld [vmem:[%s12430_s13 + $0x64] ss:$8 sps:$4 sm:$0xff]  }
0x1b4f   :  { %v10387_v18 = vld [vmem:[%s12430_s13 + $0x70] ss:$8 sps:$4 sm:$0xff]  }
0x1b50   :  { %v4903_v23 = vrot.slane %v4902_v21, 4  ;;  %v4915_v24 = vadd.f32 %v4914_v22, %v4912_v20  ;;  %v10362_v20 = vld [vmem:[%s12430_s13 + $0xe0] ss:$8 sps:$4 sm:$0xff]  }
0x1b51   :  { %v10390_v22 = vld [vmem:[%s12430_s13 + $0x60] ss:$8 sps:$4 sm:$0xff]  }
0x1b52   :  { %v4904_v25 = vadd.f32 %v4903_v23, %v4902_v21  ;;  %v4916_v26 = vrot.slane %v4915_v24, 4  ;;  %v10367_v21 = vld [vmem:[%s12430_s13 + $0xd4] ss:$8 sps:$4 sm:$0xff]  }
0x1b53   :  { %v10373_v23 = vld [vmem:[%s12429_s9 + $0x38] sm:$0xff]  }
0x1b54   :  { %v4905_v27 = vrot.slane %v4904_v25, 2  ;;  %v4917_v28 = vadd.f32 %v4916_v26, %v4915_v24  ;;  %v10374_v24 = vld [vmem:[%s12429_s9 + $0x18] sm:$0xff]  }
0x1b55   :  { %v10395_v26 = vld [vmem:[%s12430_s13 + $0x54] ss:$8 sps:$4 sm:$0xff]  }
0x1b56   :  { %v4906_v29 = vadd.f32 %v4905_v27, %v4904_v25  ;;  %v4918_v30 = vrot.slane %v4917_v28, 2  ;;  %v10365_v25 = vld [vmem:[%s12430_s13 + $0xd0] ss:$8 sps:$4 sm:$0xff]   ;;  %v10370_v27 = vld [vmem:[%s12430_s13 + $0xc4] ss:$8 sps:$4 sm:$0xff]  }
0x1b58   :  { %v4907_v31 = vrot.slane %v4906_v29, 1  ;;  %v4919_v32 = vadd.f32 %v4918_v30, %v4917_v28  ;;  %v10393_v28 = vld [vmem:[%s12430_s13 + $0x50] ss:$8 sps:$4 sm:$0xff]   ;;  %v10368_v30 = vld [vmem:[%s12430_s13 + $0xc0] ss:$8 sps:$4 sm:$0xff]  }
0x1b5a   :  { %v4908_v33 = vadd.f32 %v4907_v31, %v4906_v29  ;;  %v4920_v34 = vrot.slane %v4919_v32, 1  ;;  %v10398_v29 = vld [vmem:[%s12430_s13 + $0x44] ss:$8 sps:$4 sm:$0xff]   ;;  %v10377_v31 = vld [vmem:[%s12430_s13 + $0xb4] ss:$8 sps:$4 sm:$0xff]  }
0x1b5c   :  { %10105 = vmatmul.mubr.f32.vlgmr.msra.gmra.mxu0 %v4908_v33  ;;  %v4921_v35 = vadd.f32 %v4920_v34, %v4919_v32  ;;  %v10396_v32 = vld [vmem:[%s12430_s13 + $0x40] ss:$8 sps:$4 sm:$0xff]   ;;  %v10401_v33 = vld [vmem:[%s12430_s13 + $0x34] ss:$8 sps:$4 sm:$0xff]   ;;  %v10375_v34 = vld [vmem:[%s12430_s13 + $0xb0] ss:$8 sps:$4 sm:$0xff]  }
0x1b5d   :  { %10146 = vmatprep.mubr.msk.bf16.mxu0 %vm461_vm1, %v10355_v37  ;;  %v10399_v37 = vld [vmem:[%s12430_s13 + $0x30] ss:$8 sps:$4 sm:$0xff]  }
0x1b5e   :  { %10140 = vmatmul.mubr.f32.vlgmr.msra.gmra.mxu1 %v4921_v35  ;;  %v10380_v35 = vld [vmem:[%s12430_s13 + $0xa4] ss:$8 sps:$4 sm:$0xff]  }
0x1b5f   :  { %10158 = vmatprep.mubr.msk.bf16.mxu1 %vm461_vm1, %v10356_v38  ;;  %v10404_v38 = vld [vmem:[%s12430_s13 + $0x24] ss:$8 sps:$4 sm:$0xff]  }
0x1c1c   :  { %v5004_v39 = vpop.f32.mrf.mxu0 }
0x1c1d   :  { %v5078_v40 = vmul.f32 %v5004_v39, %v5004_v39 }
0x1c1e   :  { %v10106_v41 = vpop.f32.mrf.mxu0  ;;  %v5074_v42 = vpop.f32.mrf.mxu1 }
0x1c1f   :  { %v5079_v43 = vsub.f32 %v5074_v42, %v5078_v40  ;;  %v10383_v40 = vld [vmem:[%s12430_s13 + $0x94] ss:$8 sps:$4 sm:$0xff]   ;;  %v10402_v41 = vld [vmem:[%s12430_s13 + $0x20] ss:$8 sps:$4 sm:$0xff]   ;;  %v10381_v42 = vld [vmem:[%s12430_s13 + $0x90] ss:$8 sps:$4 sm:$0xff]  }
0x1c20   :  { %v10141_v44 = vpop.f32.mrf.mxu1 }
0x1c21   :  { %v5080_v45 = vmax.f32 %v5079_v43, 0.0  ;;  %v10386_v43 = vld [vmem:[%s12430_s13 + $0x84] ss:$8 sps:$4 sm:$0xff]   ;;  %v10384_v44 = vld [vmem:[%s12430_s13 + $0x80] ss:$8 sps:$4 sm:$0xff]  }
0x1c23   :  { %v5082_v46 = vadd.f32 1e-05, %v5080_v45  ;;  %v10405_v45 = vld [vmem:[%s12430_s13 + $0x10] ss:$8 sps:$4 sm:$0xff]  }
0x1c25   :  { %10553 = vrsqrt.f32 %v5082_v46  ;;  %v10407_v46 = vld [vmem:[%s12430_s13 + $0x14] ss:$8 sps:$4 sm:$0xff]  }
0x1c32   :  { %v10554_v48 = vpop.eup %10553 }
0x1c33   :  { %v5084_v49 = vmul.f32 %v10554_v48, %v5081_v47  ;;  %v10408_v48 = vld [vmem:[%s12430_s13] ss:$8 sps:$4 sm:$0xff]  }
0x1c35   :  { %v5085_v51 = vmul.f32 %v5084_v49, %v5004_v39  ;;  %v5093_v52 = vrot.slane %v5084_v49, %v11227_v50  ;;  %v10378_v39 = vld [vmem:[%s12430_s13 + $0xa0] ss:$8 sps:$4 sm:$0xff]   ;;  %v10897_v49 = vmov 0  }
0x1c37   :  { %v5087_v53 = vrot.slane %v5085_v51, 7  ;;  %v5096_v56 = vmul.f32 %v5093_v52, %v4898_v36  ;;  %v5097_v58 = vmul.f32 %v5093_v52, %v4899_v14  ;;  %v5094_v59 = vmul.f32 %v5093_v52, %v4896_v10  ;;  %v10389_v36 = vld [vmem:[%s12430_s13 + $0x74] ss:$8 sps:$4 sm:$0xff]   ;;  %v10359_v14 = vld [vmem:[%s12430_s13 + $0xf0] ss:$8 sps:$4 sm:$0xff]  }
0x1c38   :  { %v5095_v60 = vmul.f32 %v5093_v52, %v4897_v12  ;;  %v10357_v12 = vld [vmem:[%s12429_s9 + $0x8] sm:$0xff]  }
0x1c39   :  { %v5089_v54 = vsub.f32 %v5081_v47, %v5087_v53  ;;  %v10410_v47 = vld [vmem:[%s12430_s13 + $0x4] ss:$8 sps:$4 sm:$0xff]  }
0x1c3b   :  { %v5101_v57 = vrot.slane %v5089_v54, %v11230_v55 }
0x1c3d   :  { %v5104_v61 = vadd.f32 %v5101_v57, %v5096_v56  ;;  %v5105_v62 = vadd.f32 %v5101_v57, %v5097_v58  ;;  %v5102_v63 = vadd.f32 %v5101_v57, %v5094_v59  ;;  %v5103_v0 = vadd.f32 %v5101_v57, %v5095_v60 }
0x1c3f   :  { %v5108_v1 = vmul.f32 0.01, %v5104_v61  ;;  %v5109_v2 = vmul.f32 0.01, %v5105_v62  ;;  %v5106_v3 = vmul.f32 0.01, %v5102_v63 }
0x1c40   :  { %v5107_v4 = vmul.f32 0.01, %v5103_v0 }
0x1c41   :  { %v5112_v5 = vmax.f32 %v5104_v61, %v5108_v1  ;;  %v5113_v6 = vmax.f32 %v5105_v62, %v5109_v2  ;;  %v5110_v7 = vmax.f32 %v5102_v63, %v5106_v3 }
0x1c42   :  { %v5111_v8 = vmax.f32 %v5103_v0, %v5107_v4 }
0x1c43   :  { %v11805_v10 = vpack.c.bf16 %v5113_v6, %v5112_v5 }
0x1c44   :  { %v11809_v11 = vpack.c.bf16 %v5111_v8, %v5110_v7 }
0x1c45   :  { %10142 = vmatprep.subr.bf16.mxu0 %v11805_v10  ;;  %10154 = vmatprep.subr.bf16.mxu1 %v11805_v10 }
0x1c46   :  { %10143 = vmatpush3.bf16.msra.mxu0 %v11805_v10  ;;  %10155 = vmatpush3.bf16.msra.mxu1 %v11805_v10 }
0x1c47   :  { %10144 = vmatprep.subr.bf16.mxu0 %v11809_v11  ;;  %10156 = vmatprep.subr.bf16.mxu1 %v11809_v11 }
0x1c4a   :  { %10145 = vmatpush3.bf16.msra.mxu0 %v11809_v11  ;;  %10157 = vmatpush3.bf16.msra.mxu1 %v11809_v11 }
0x1c4b   :  { %5448 = vmatprep.subr.bf16.mxu0 %v10361_v9  ;;  %5601 = vmatprep.subr.bf16.mxu1 %v10389_v36  ;;  %v10411_v9 = vld [vmem:[%s12429_s9 + $0x40] sm:$0xff]  }
0x1c4d   :  { %10147 = vmatmul.mubr.msk.bf16.vlgmr.msra.gmra.mxu0 %vm461_vm1, %v10357_v12  ;;  %10159 = vmatmul.mubr.msk.bf16.vlgmr.msra.gmra.mxu1 %vm461_vm1, %v10358_v13  ;;  %v10412_v12 = vld [vmem:[%s12429_s9 + $0x48] sm:$0xff]   ;;  %v10413_v13 = vld [vmem:[%s12429_s9 + $0x50] sm:$0xff]  }
0x1c4e   :  { %5449 = vmatpush1.bf16.msra.mxu0 %v10359_v14  ;;  %10162 = vmatprep.mubr.msk.bf16.mxu1 %vm461_vm1, %v10371_v15  ;;  %v10414_v14 = vld [vmem:[%s12429_s9 + $0x58] sm:$0xff]  }
0x1c4f   :  { %5450 = vmatprep.subr.bf16.mxu0 %v10364_v16  ;;  %10150 = vmatprep.mubr.msk.bf16.mxu0 %vm461_vm1, %v10372_v17  ;;  %v10417_v15 = vld [vmem:[%s12430_s13 + $0x174] ss:$8 sps:$4 sm:$0xff]   ;;  %v10415_v16 = vld [vmem:[%s12430_s13 + $0x170] ss:$8 sps:$4 sm:$0xff]   ;;  %v10420_v17 = vld [vmem:[%s12430_s13 + $0x164] ss:$8 sps:$4 sm:$0xff]  }
0x1c50   :  { %5602 = vmatpush1.bf16.msra.mxu1 %v10387_v18  ;;  %v10418_v18 = vld [vmem:[%s12430_s13 + $0x160] ss:$8 sps:$4 sm:$0xff]  }
0x1c51   :  { %5603 = vmatprep.subr.bf16.mxu1 %v10392_v19  ;;  %v10423_v19 = vld [vmem:[%s12430_s13 + $0x154] ss:$8 sps:$4 sm:$0xff]  }
0x1c52   :  { %5451 = vmatpush1.bf16.msra.mxu0 %v10362_v20  ;;  %v10421_v20 = vld [vmem:[%s12430_s13 + $0x150] ss:$8 sps:$4 sm:$0xff]  }
0x1c53   :  { %5452 = vmatprep.subr.bf16.mxu0 %v10367_v21  ;;  %v10426_v21 = vld [vmem:[%s12430_s13 + $0x144] ss:$8 sps:$4 sm:$0xff]  }
0x1c54   :  { %5604 = vmatpush1.bf16.msra.mxu1 %v10390_v22  ;;  %v10424_v22 = vld [vmem:[%s12430_s13 + $0x140] ss:$8 sps:$4 sm:$0xff]  }
0x1c55   :  { %10163 = vmatmul.mubr.msk.bf16.gmra.mxu1 %vm461_vm1, %v10373_v23  ;;  %10151 = vmatmul.mubr.msk.bf16.gmra.mxu0 %vm461_vm1, %v10374_v24  ;;  %v10429_v23 = vld [vmem:[%s12430_s13 + $0x134] ss:$8 sps:$4 sm:$0xff]   ;;  %v10427_v24 = vld [vmem:[%s12430_s13 + $0x130] ss:$8 sps:$4 sm:$0xff]  }
0x1c56   :  { %5453 = vmatpush1.bf16.msra.mxu0 %v10365_v25  ;;  %5605 = vmatprep.subr.bf16.mxu1 %v10395_v26  ;;  %v10432_v25 = vld [vmem:[%s12430_s13 + $0x124] ss:$8 sps:$4 sm:$0xff]   ;;  %v10430_v26 = vld [vmem:[%s12430_s13 + $0x120] ss:$8 sps:$4 sm:$0xff]  }
0x1c57   :  { %5454 = vmatprep.subr.bf16.mxu0 %v10370_v27  ;;  %5480 = vmatprep.mubr.bf16.mxu0 %v10897_v49  ;;  %v10433_v27 = vld [vmem:[%s12430_s13 + $0x110] ss:$8 sps:$4 sm:$0xff]  }
0x1c58   :  { %5606 = vmatpush1.bf16.msra.mxu1 %v10393_v28  ;;  %5633 = vmatprep.mubr.bf16.mxu1 %v10897_v49  ;;  %v10435_v28 = vld [vmem:[%s12430_s13 + $0x114] ss:$8 sps:$4 sm:$0xff]  }
0x1c59   :  { %5607 = vmatprep.subr.bf16.mxu1 %v10398_v29  ;;  %v10438_v29 = vld [vmem:[%s12430_s13 + $0x104] ss:$8 sps:$4 sm:$0xff]  }
0x1c5a   :  { %5455 = vmatpush1.bf16.msra.mxu0 %v10368_v30  ;;  %v10436_v30 = vld [vmem:[%s12430_s13 + $0x100] ss:$8 sps:$4 sm:$0xff]  }
0x1c5b   :  { %5456 = vmatprep.subr.bf16.mxu0 %v10377_v31  ;;  %v6069_v31 = vld [vmem:[%s12431_s23 + $0xf8] sm:$0xff] }
0x1c5c   :  { %5608 = vmatpush1.bf16.msra.mxu1 %v10396_v32  ;;  %v6068_v32 = vld [vmem:[%s12431_s23 + $0xf0] sm:$0xff] }
0x1c5d   :  { %5609 = vmatprep.subr.bf16.mxu1 %v10401_v33  ;;  %v6067_v33 = vld [vmem:[%s12431_s23 + $0xe8] sm:$0xff] }
0x1c5e   :  { %5457 = vmatpush1.bf16.msra.mxu0 %v10375_v34  ;;  %v6066_v34 = vld [vmem:[%s12431_s23 + $0xe0] sm:$0xff] }
0x1c5f   :  { %5458 = vmatprep.subr.bf16.mxu0 %v10380_v35  ;;  %v6065_v35 = vld [vmem:[%s12431_s23 + $0xd8] sm:$0xff] }
0x1c60   :  { %5610 = vmatpush1.bf16.msra.mxu1 %v10399_v37  ;;  %v6064_v37 = vld [vmem:[%s12431_s23 + $0xd0] sm:$0xff] }
0x1c61   :  { %5611 = vmatprep.subr.bf16.mxu1 %v10404_v38  ;;  %v6063_v38 = vld [vmem:[%s12431_s23 + $0xc8] sm:$0xff] }
0x1c62   :  { %5459 = vmatpush1.bf16.msra.mxu0 %v10378_v39  ;;  %v6062_v39 = vld [vmem:[%s12431_s23 + $0xc0] sm:$0xff] }
0x1c63   :  { %5460 = vmatprep.subr.bf16.mxu0 %v10383_v40  ;;  %v6061_v40 = vld [vmem:[%s12431_s23 + $0xb8] sm:$0xff] }
0x1c64   :  { %5612 = vmatpush1.bf16.msra.mxu1 %v10402_v41  ;;  %v6060_v41 = vld [vmem:[%s12431_s23 + $0xb0] sm:$0xff] }
0x1c65   :  { %5613 = vmatprep.subr.bf16.mxu1 %v10407_v46  ;;  %v6055_v46 = vld [vmem:[%s12431_s23 + $0x88] sm:$0xff] }
0x1c66   :  { %5461 = vmatpush1.bf16.msra.mxu0 %v10381_v42  ;;  %v6059_v42 = vld [vmem:[%s12431_s23 + $0xa8] sm:$0xff] }
0x1c67   :  { %5462 = vmatprep.subr.bf16.mxu0 %v10386_v43  ;;  %v6058_v43 = vld [vmem:[%s12431_s23 + $0xa0] sm:$0xff] }
0x1c68   :  { %5614 = vmatpush1.bf16.msra.mxu1 %v10405_v45  ;;  %v6056_v45 = vld [vmem:[%s12431_s23 + $0x90] sm:$0xff] }
0x1c69   :  { %5615 = vmatprep.subr.bf16.mxu1 %v10410_v47  ;;  %v6054_v47 = vld [vmem:[%s12431_s23 + $0x80] sm:$0xff] }
0x1c6a   :  { %5463 = vmatpush1.bf16.msra.mxu0 %v10384_v44  ;;  %v6057_v44 = vld [vmem:[%s12431_s23 + $0x98] sm:$0xff] }
0x1c6b   :  { %10166 = vmatprep.subr.bf16.mxu0 %v11805_v10 }
0x1c6c   :  { %5616 = vmatpush1.bf16.msra.mxu1 %v10408_v48 }
0x1c6d   :  { %5881 = vmatprep.subr.bf16.mxu1 %v10417_v15  ;;  %v6052_v15 = vld [vmem:[%s12431_s23 + $0x70] sm:$0xff] }
0x1d0d   :  { %v10148_v51 = vpop.f32.mrf.mxu0  ;;  %v10160_v52 = vpop.f32.mrf.mxu1 }
0x1d0f   :  { %v5190_v53 = vpop.f32.mrf.mxu0  ;;  %v5316_v54 = vpop.f32.mrf.mxu1 }
0x1d11   :  { %v10149_v56 = vpop.f32.mrf.mxu0  ;;  %v10161_v57 = vpop.f32.mrf.mxu1 }
0x1d12   :  { %v5222_v2 = vpack.c.bf16 %v10149_v56, %v10148_v51  ;;  %v5348_v4 = vpack.c.bf16 %v10161_v57, %v10160_v52 }
0x1d13   :  { %v5193_v58 = vpop.f32.mrf.mxu0  ;;  %v5319_v59 = vpop.f32.mrf.mxu1 }
0x1d14   :  { %v5221_v60 = vpack.c.bf16 %v5193_v58, %v5190_v53  ;;  %v5347_v61 = vpack.c.bf16 %v5319_v59, %v5316_v54 }
0x1d15   :  { %v10164_v62 = vpop.f32.mrf.mxu1  ;;  %v10152_v63 = vpop.f32.mrf.mxu0 }
0x1d16   :  { %5481 = vmatmul.mubr.bf16.vlgmr.msra.gmra.mxu0 %v5347_v61  ;;  %5634 = vmatmul.mubr.bf16.vlgmr.msra.gmra.mxu1 %v5221_v60 }
0x1d17   :  { %10167 = vmatpush3.bf16.msra.mxu0 %v11805_v10  ;;  %5490 = vmatprep.mubr.bf16.mxu0 %v10897_v49  ;;  %v5206_v0 = vpop.f32.mrf.mxu0  ;;  %v5332_v1 = vpop.f32.mrf.mxu1 }
0x1d18   :  { %10168 = vmatprep.subr.bf16.mxu0 %v11809_v11  ;;  %5643 = vmatprep.mubr.bf16.mxu1 %v10897_v49 }
0x1d19   :  { %v10153_v3 = vpop.f32.mrf.mxu0  ;;  %v10165_v5 = vpop.f32.mrf.mxu1  ;;  %5882 = vmatpush1.bf16.msra.mxu1 %v10415_v16  ;;  %v6051_v16 = vld [vmem:[%s12431_s23 + $0x68] sm:$0xff] }
0x1d1a   :  { %v5350_v36 = vpack.c.bf16 %v10165_v5, %v10164_v62  ;;  %5883 = vmatprep.subr.bf16.mxu1 %v10420_v17  ;;  %v6050_v17 = vld [vmem:[%s12431_s23 + $0x60] sm:$0xff] }
0x1d1b   :  { %10169 = vmatpush3.bf16.msra.mxu0 %v11809_v11  ;;  %v5209_v6 = vpop.f32.mrf.mxu0  ;;  %v5335_v7 = vpop.f32.mrf.mxu1  ;;  %v5224_v11 = vpack.c.bf16 %v10153_v3, %v10152_v63 }
0x1d1c   :  { %v5223_v8 = vpack.c.bf16 %v5209_v6, %v5206_v0  ;;  %v5349_v10 = vpack.c.bf16 %v5335_v7, %v5332_v1  ;;  %6102 = vmatprep.subr.mxu0 %v6069_v31 }
0x1d1d   :  { %5884 = vmatpush1.bf16.msra.mxu1 %v10418_v18  ;;  %v6049_v18 = vld [vmem:[%s12431_s23 + $0x58] sm:$0xff] }
0x1d1e   :  { %5491 = vmatmul.mubr.bf16.gmra.mxu0 %v5348_v4  ;;  %5644 = vmatmul.mubr.bf16.gmra.mxu1 %v5222_v2 }
0x1d1f   :  { %5500 = vmatprep.mubr.bf16.mxu0 %v10897_v49  ;;  %5653 = vmatprep.mubr.bf16.mxu1 %v10897_v49 }
0x1d20   :  { %5885 = vmatprep.subr.bf16.mxu1 %v10423_v19  ;;  %v6048_v19 = vld [vmem:[%s12431_s23 + $0x50] sm:$0xff] }
0x1d21   :  { %5886 = vmatpush1.bf16.msra.mxu1 %v10421_v20  ;;  %v6047_v20 = vld [vmem:[%s12431_s23 + $0x48] sm:$0xff] }
0x1d22   :  { %5887 = vmatprep.subr.bf16.mxu1 %v10426_v21  ;;  %v6046_v21 = vld [vmem:[%s12431_s23 + $0x40] sm:$0xff] }
0x1d25   :  { %5888 = vmatpush1.bf16.msra.mxu1 %v10424_v22  ;;  %v6045_v22 = vld [vmem:[%s12431_s23 + $0x38] sm:$0xff] }
0x1d26   :  { %5501 = vmatmul.mubr.bf16.gmra.mxu0 %v5349_v10  ;;  %5654 = vmatmul.mubr.bf16.gmra.mxu1 %v5223_v8 }
0x1d27   :  { %5510 = vmatprep.mubr.bf16.mxu0 %v10897_v49  ;;  %5663 = vmatprep.mubr.bf16.mxu1 %v10897_v49 }
0x1d28   :  { %5889 = vmatprep.subr.bf16.mxu1 %v10429_v23  ;;  %v6044_v23 = vld [vmem:[%s12431_s23 + $0x30] sm:$0xff] }
0x1d29   :  { %5890 = vmatpush1.bf16.msra.mxu1 %v10427_v24  ;;  %v6043_v24 = vld [vmem:[%s12431_s23 + $0x28] sm:$0xff] }
0x1d2a   :  { %5891 = vmatprep.subr.bf16.mxu1 %v10432_v25  ;;  %v6042_v25 = vld [vmem:[%s12431_s23 + $0x20] sm:$0xff] }
0x1d2d   :  { %5892 = vmatpush1.bf16.msra.mxu1 %v10430_v26  ;;  %v6041_v26 = vld [vmem:[%s12431_s23 + $0x18] sm:$0xff] }
0x1d2e   :  { %5511 = vmatmul.mubr.bf16.gmra.mxu0 %v5350_v36  ;;  %5664 = vmatmul.mubr.bf16.gmra.mxu1 %v5224_v11 }
0x1d2f   :  { %10170 = vmatprep.mubr.msk.bf16.mxu0 %vm461_vm1, %v10411_v9  ;;  %5913 = vmatprep.mubr.bf16.mxu1 %v10897_v49 }
0x1d30   :  { %5893 = vmatprep.subr.bf16.mxu1 %v10435_v28  ;;  %v6039_v28 = vld [vmem:[%s12431_s23 + $0x8] sm:$0xff] }
0x1d31   :  { %5894 = vmatpush1.bf16.msra.mxu1 %v10433_v27  ;;  %v6040_v27 = vld [vmem:[%s12431_s23 + $0x10] sm:$0xff] }
0x1d32   :  { %5895 = vmatprep.subr.bf16.mxu1 %v10438_v29  ;;  %v6038_v29 = vld [vmem:[%s12431_s23] sm:$0xff] }
0x1d35   :  { %5896 = vmatpush1.bf16.msra.mxu1 %v10436_v30  ;;  %v6101_v30 = vld [vmem:[%s12431_s23 + $0x1f8] sm:$0xff] }
0x1d36   :  { %10171 = vmatmul.mubr.msk.bf16.vlgmr.msra.gmra.mxu0 %vm461_vm1, %v10412_v12  ;;  %6173 = vmatprep.subr.mxu1 %v6069_v31  ;;  %v6100_v31 = vld [vmem:[%s12431_s23 + $0x1f0] sm:$0xff] }
0x1d37   :  { %10174 = vmatprep.mubr.msk.bf16.mxu0 %vm461_vm1, %v10413_v13  ;;  %6103 = vmatpush1.msra.mxu0 %v6068_v32 }
0x1d38   :  { %6104 = vmatprep.subr.mxu0 %v6067_v33 }
0x1d39   :  { %6105 = vmatpush1.msra.mxu0 %v6066_v34 }
0x1d3a   :  { %6106 = vmatprep.subr.mxu0 %v6065_v35 }
0x1d3b   :  { %6107 = vmatpush1.msra.mxu0 %v6064_v37 }
0x1d3c   :  { %6108 = vmatprep.subr.mxu0 %v6063_v38 }
0x1d3d   :  { %6109 = vmatpush1.msra.mxu0 %v6062_v39 }
0x1d3e   :  { %10175 = vmatmul.mubr.msk.bf16.gmra.mxu0 %vm461_vm1, %v10414_v14  ;;  %6110 = vmatprep.subr.mxu0 %v6061_v40  ;;  %v6053_v14 = vld [vmem:[%s12431_s23 + $0x78] sm:$0xff] }
0x1d3f   :  { %6111 = vmatpush1.msra.mxu0 %v6060_v41 }
0x1d40   :  { %6112 = vmatprep.subr.mxu0 %v6059_v42 }
0x1d41   :  { %6113 = vmatpush1.msra.mxu0 %v6058_v43 }
0x1d42   :  { %6114 = vmatprep.subr.mxu0 %v6057_v44 }
0x1d43   :  { %6115 = vmatpush1.msra.mxu0 %v6056_v45 }
0x1d44   :  { %6116 = vmatprep.subr.mxu0 %v6055_v46 }
0x1d45   :  { %6117 = vmatpush1.msra.mxu0 %v6054_v47 }
0x1d46   :  { %6118 = vmatprep.subr.mxu0 %v6053_v14 }
0x1d47   :  { %6119 = vmatpush1.msra.mxu0 %v6052_v15 }
0x1d48   :  { %6120 = vmatprep.subr.mxu0 %v6051_v16 }
0x1d49   :  { %6121 = vmatpush1.msra.mxu0 %v6050_v17 }
0x1d4a   :  { %6122 = vmatprep.subr.mxu0 %v6049_v18 }
0x1d4b   :  { %6123 = vmatpush1.msra.mxu0 %v6048_v19 }
0x1d4c   :  { %6124 = vmatprep.subr.mxu0 %v6047_v20 }
0x1d4d   :  { %6125 = vmatpush1.msra.mxu0 %v6046_v21 }
0x1d4e   :  { %6126 = vmatprep.subr.mxu0 %v6045_v22 }
0x1d4f   :  { %6127 = vmatpush1.msra.mxu0 %v6044_v23 }
0x1d50   :  { %6128 = vmatprep.subr.mxu0 %v6043_v24 }
0x1d51   :  { %6129 = vmatpush1.msra.mxu0 %v6042_v25 }
0x1d52   :  { %6130 = vmatprep.subr.mxu0 %v6041_v26 }
0x1d53   :  { %6131 = vmatpush1.msra.mxu0 %v6040_v27 }
0x1d54   :  { %6132 = vmatprep.subr.mxu0 %v6039_v28 }
0x1d55   :  { %6133 = vmatpush1.msra.mxu0 %v6038_v29 }
0x1d56   :  { %6134 = vmatprep.subr.mxu0 %v6101_v30 }
0x1d57   :  { %6135 = vmatpush2.msra.mxu0 %v6100_v31 }
0x1dd6   :  { %v11914_v48 = vpop.f32.mrf.mxu0 }
0x1dd8   :  { %v11916_v51 = vpop.f32.mrf.mxu0 }
0x1dda   :  { %v11918_v52 = vpop.f32.mrf.mxu0 }
0x1ddc   :  { %v11920_v53 = vpop.f32.mrf.mxu0 }
0x1dde   :  { %v11922_v54 = vpop.f32.mrf.mxu0 }
0x1de0   :  { %v11924_v56 = vpop.f32.mrf.mxu0 }
0x1de2   :  { %v11926_v57 = vpop.f32.mrf.mxu0 }
0x1de4   :  { %v11928_v58 = vpop.f32.mrf.mxu0 }
0x1de6   :  { %v11930_v59 = vpop.f32.mrf.mxu0 }
0x1de8   :  { %v11932_v60 = vpop.f32.mrf.mxu0 }
0x1dea   :  { %v11934_v61 = vpop.f32.mrf.mxu0 }
0x1dec   :  { %v11936_v62 = vpop.f32.mrf.mxu0 }
0x1dee   :  { %v11938_v63 = vpop.f32.mrf.mxu0 }
0x1df0   :  { %v11940_v0 = vpop.f32.mrf.mxu0 }
0x1df2   :  { %v11942_v1 = vpop.f32.mrf.mxu0 }
0x1df4   :  { %v11944_v2 = vpop.f32.mrf.mxu0 }
0x1df6   :  { %v10172_v3 = vpop.f32.mrf.mxu0 }
0x1df8   :  { %v5749_v4 = vpop.f32.mrf.mxu0 }
0x1dfa   :  { %v10173_v5 = vpop.f32.mrf.mxu0 }
0x1dfb   :  { %v5781_v11 = vpack.c.bf16 %v10173_v5, %v10172_v3  ;;  %v6084_v3 = vld [vmem:[%s12431_s23 + $0x170] sm:$0xff]  ;;  %v6082_v5 = vld [vmem:[%s12431_s23 + $0x160] sm:$0xff] }
0x1dfc   :  { %v5752_v6 = vpop.f32.mrf.mxu0 }
0x1dfd   :  { %v5780_v7 = vpack.c.bf16 %v5752_v6, %v5749_v4  ;;  %v6083_v4 = vld [vmem:[%s12431_s23 + $0x168] sm:$0xff]  ;;  %v6081_v6 = vld [vmem:[%s12431_s23 + $0x158] sm:$0xff] }
0x1dfe   :  { %v10176_v8 = vpop.f32.mrf.mxu0 }
0x1dff   :  { %5914 = vmatmul.mubr.bf16.vlgmr.msra.gmra.mxu1 %v5780_v7  ;;  %v6080_v7 = vld [vmem:[%s12431_s23 + $0x150] sm:$0xff] }
0x1e00   :  { %5923 = vmatprep.mubr.bf16.mxu1 %v10897_v49  ;;  %6174 = vmatpush1.msra.mxu1 %v6068_v32  ;;  %v5765_v10 = vpop.f32.mrf.mxu0  ;;  %v6099_v32 = vld [vmem:[%s12431_s23 + $0x1e8] sm:$0xff] }
0x1e01   :  { %6175 = vmatprep.subr.mxu1 %v6067_v33  ;;  %6136 = vmatprep.subr.mxu0 %v6099_v32  ;;  %v6098_v33 = vld [vmem:[%s12431_s23 + $0x1e0] sm:$0xff] }
0x1e02   :  { %6176 = vmatpush1.msra.mxu1 %v6066_v34  ;;  %v10177_v9 = vpop.f32.mrf.mxu0  ;;  %6137 = vmatpush2.msra.mxu0 %v6098_v33  ;;  %v6097_v34 = vld [vmem:[%s12431_s23 + $0x1d8] sm:$0xff] }
0x1e03   :  { %6177 = vmatprep.subr.mxu1 %v6065_v35  ;;  %v5783_v13 = vpack.c.bf16 %v10177_v9, %v10176_v8  ;;  %6138 = vmatprep.subr.mxu0 %v6097_v34  ;;  %v6096_v35 = vld [vmem:[%s12431_s23 + $0x1d0] sm:$0xff]  ;;  %v6079_v8 = vld [vmem:[%s12431_s23 + $0x148] sm:$0xff] }
0x1e04   :  { %6178 = vmatpush1.msra.mxu1 %v6064_v37  ;;  %v5768_v36 = vpop.f32.mrf.mxu0  ;;  %6139 = vmatpush2.msra.mxu0 %v6096_v35  ;;  %v6095_v37 = vld [vmem:[%s12431_s23 + $0x1c8] sm:$0xff]  ;;  %v6076_v9 = vld [vmem:[%s12431_s23 + $0x130] sm:$0xff] }
0x1e05   :  { %6179 = vmatprep.subr.mxu1 %v6063_v38  ;;  %v5782_v12 = vpack.c.bf16 %v5768_v36, %v5765_v10  ;;  %6140 = vmatprep.subr.mxu0 %v6095_v37  ;;  %v6094_v38 = vld [vmem:[%s12431_s23 + $0x1c0] sm:$0xff]  ;;  %v6075_v36 = vld [vmem:[%s12431_s23 + $0x128] sm:$0xff] }
0x1e06   :  { %6180 = vmatpush1.msra.mxu1 %v6062_v39  ;;  %6141 = vmatpush2.msra.mxu0 %v6094_v38  ;;  %v6093_v39 = vld [vmem:[%s12431_s23 + $0x1b8] sm:$0xff]  ;;  %v6078_v10 = vld [vmem:[%s12431_s23 + $0x140] sm:$0xff] }
0x1e07   :  { %5924 = vmatmul.mubr.bf16.gmra.mxu1 %v5781_v11  ;;  %6181 = vmatprep.subr.mxu1 %v6061_v40  ;;  %v6092_v40 = vld [vmem:[%s12431_s23 + $0x1b0] sm:$0xff]  ;;  %v6077_v11 = vld [vmem:[%s12431_s23 + $0x138] sm:$0xff] }
0x1e08   :  { %5933 = vmatprep.mubr.bf16.mxu1 %v10897_v49  ;;  %6182 = vmatpush1.msra.mxu1 %v6060_v41  ;;  %v6091_v41 = vld [vmem:[%s12431_s23 + $0x1a8] sm:$0xff] }
0x1e09   :  { %6183 = vmatprep.subr.mxu1 %v6059_v42  ;;  %6142 = vmatprep.subr.mxu0 %v6093_v39  ;;  %v6090_v42 = vld [vmem:[%s12431_s23 + $0x1a0] sm:$0xff] }
0x1e0a   :  { %6184 = vmatpush1.msra.mxu1 %v6058_v43  ;;  %6143 = vmatpush2.msra.mxu0 %v6092_v40  ;;  %v6089_v43 = vld [vmem:[%s12431_s23 + $0x198] sm:$0xff] }
0x1e0b   :  { %6185 = vmatprep.subr.mxu1 %v6057_v44  ;;  %6144 = vmatprep.subr.mxu0 %v6091_v41  ;;  %v6088_v44 = vld [vmem:[%s12431_s23 + $0x190] sm:$0xff] }
0x1e0c   :  { %6186 = vmatpush1.msra.mxu1 %v6056_v45  ;;  %6145 = vmatpush2.msra.mxu0 %v6090_v42  ;;  %v6087_v45 = vld [vmem:[%s12431_s23 + $0x188] sm:$0xff] }
0x1e0d   :  { %6187 = vmatprep.subr.mxu1 %v6055_v46  ;;  %6146 = vmatprep.subr.mxu0 %v6089_v43  ;;  %v6086_v46 = vld [vmem:[%s12431_s23 + $0x180] sm:$0xff] }
0x1e0e   :  { %6188 = vmatpush1.msra.mxu1 %v6054_v47  ;;  %6147 = vmatpush2.msra.mxu0 %v6088_v44  ;;  %v6085_v47 = vld [vmem:[%s12431_s23 + $0x178] sm:$0xff] }
0x1e0f   :  { %5934 = vmatmul.mubr.bf16.gmra.mxu1 %v5782_v12  ;;  %6189 = vmatprep.subr.mxu1 %v6053_v14  ;;  %v6074_v12 = vld [vmem:[%s12431_s23 + $0x120] sm:$0xff]  ;;  %v6072_v14 = vld [vmem:[%s12431_s23 + $0x110] sm:$0xff] }
0x1e10   :  { %5943 = vmatprep.mubr.bf16.mxu1 %v10897_v49  ;;  %6190 = vmatpush1.msra.mxu1 %v6052_v15  ;;  %v6071_v15 = vld [vmem:[%s12431_s23 + $0x108] sm:$0xff] }
0x1e11   :  { %6191 = vmatprep.subr.mxu1 %v6051_v16  ;;  %6148 = vmatprep.subr.mxu0 %v6087_v45  ;;  %v6070_v16 = vld [vmem:[%s12431_s23 + $0x100] sm:$0xff] }
0x1e12   :  { %6192 = vmatpush1.msra.mxu1 %v6050_v17  ;;  %6149 = vmatpush2.msra.mxu0 %v6086_v46  ;;  %v5635_v17 = vpop.f32.mrf.mxu1 }
0x1e13   :  { %6193 = vmatprep.subr.mxu1 %v6049_v18  ;;  %6150 = vmatprep.subr.mxu0 %v6085_v47 }
0x1e14   :  { %6194 = vmatpush1.msra.mxu1 %v6048_v19  ;;  %6151 = vmatpush2.msra.mxu0 %v6084_v3  ;;  %v5637_v18 = vpop.f32.mrf.mxu1 }
0x1e15   :  { %6195 = vmatprep.subr.mxu1 %v6047_v20  ;;  %6152 = vmatprep.subr.mxu0 %v6083_v4 }
0x1e16   :  { %6196 = vmatpush1.msra.mxu1 %v6046_v21  ;;  %6153 = vmatpush2.msra.mxu0 %v6082_v5  ;;  %v5639_v19 = vpop.f32.mrf.mxu1 }
0x1e17   :  { %5944 = vmatmul.mubr.bf16.gmra.mxu1 %v5783_v13  ;;  %6197 = vmatprep.subr.mxu1 %v6045_v22  ;;  %v6073_v13 = vld [vmem:[%s12431_s23 + $0x118] sm:$0xff] }
0x1e18   :  { %6198 = vmatpush1.msra.mxu1 %v6044_v23  ;;  %6154 = vmatprep.subr.mxu0 %v6081_v6  ;;  %v5641_v20 = vpop.f32.mrf.mxu1 }
0x1e19   :  { %6199 = vmatprep.subr.mxu1 %v6043_v24  ;;  %6155 = vmatpush2.msra.mxu0 %v6080_v7 }
0x1e1a   :  { %6200 = vmatpush1.msra.mxu1 %v6042_v25  ;;  %6156 = vmatprep.subr.mxu0 %v6079_v8  ;;  %v5645_v21 = vpop.f32.mrf.mxu1 }
0x1e1b   :  { %6201 = vmatprep.subr.mxu1 %v6041_v26  ;;  %6157 = vmatpush2.msra.mxu0 %v6078_v10 }
0x1e1c   :  { %6202 = vmatpush1.msra.mxu1 %v6040_v27  ;;  %6158 = vmatprep.subr.mxu0 %v6077_v11  ;;  %v5647_v22 = vpop.f32.mrf.mxu1 }
0x1e1d   :  { %6203 = vmatprep.subr.mxu1 %v6039_v28  ;;  %6159 = vmatpush2.msra.mxu0 %v6076_v9 }
0x1e1e   :  { %6204 = vmatpush1.msra.mxu1 %v6038_v29  ;;  %6160 = vmatprep.subr.mxu0 %v6075_v36  ;;  %v5649_v23 = vpop.f32.mrf.mxu1 }
0x1e1f   :  { %6205 = vmatprep.subr.mxu1 %v6101_v30  ;;  %6161 = vmatpush2.msra.mxu0 %v6074_v12 }
0x1e20   :  { %6206 = vmatpush2.msra.mxu1 %v6100_v31  ;;  %6162 = vmatprep.subr.mxu0 %v6073_v13  ;;  %v5651_v24 = vpop.f32.mrf.mxu1 }
0x1e21   :  { %6207 = vmatprep.subr.mxu1 %v6099_v32  ;;  %6163 = vmatpush2.msra.mxu0 %v6072_v14 }
0x1e22   :  { %6208 = vmatpush2.msra.mxu1 %v6098_v33  ;;  %6164 = vmatprep.subr.mxu0 %v6071_v15  ;;  %v5655_v25 = vpop.f32.mrf.mxu1 }
0x1e23   :  { %6209 = vmatprep.subr.mxu1 %v6097_v34  ;;  %6165 = vmatpush2.msra.mxu0 %v6070_v16 }
0x1e24   :  { %6210 = vmatpush2.msra.mxu1 %v6096_v35  ;;  %v5657_v26 = vpop.f32.mrf.mxu1 }
0x1e25   :  { %6211 = vmatprep.subr.mxu1 %v6095_v37 }
0x1e26   :  { %6212 = vmatpush2.msra.mxu1 %v6094_v38  ;;  %v5659_v27 = vpop.f32.mrf.mxu1 }
0x1e27   :  { %6213 = vmatprep.subr.mxu1 %v6093_v39  ;;  %v5640_v39 = vadd.f32 %v5639_v19, %v11918_v52 }
0x1e28   :  { %6214 = vmatpush2.msra.mxu1 %v6092_v40  ;;  %v5661_v28 = vpop.f32.mrf.mxu1 }
0x1e29   :  { %6215 = vmatprep.subr.mxu1 %v6091_v41  ;;  %v5636_v41 = vadd.f32 %v5635_v17, %v11914_v48  ;;  %v5662_v19 = vadd.f32 %v5661_v28, %v11936_v62 }
0x1e2a   :  { %6216 = vmatpush2.msra.mxu1 %v6090_v42  ;;  %v5665_v29 = vpop.f32.mrf.mxu1  ;;  %v5642_v42 = vadd.f32 %v5641_v20, %v11920_v53  ;;  %v5652_v53 = vadd.f32 %v5651_v24, %v11928_v58 }
0x1e2b   :  { %6217 = vmatprep.subr.mxu1 %v6089_v43  ;;  %v5646_v43 = vadd.f32 %v5645_v21, %v11922_v54  ;;  %v5656_v54 = vadd.f32 %v5655_v25, %v11930_v59 }
0x1e2c   :  { %6218 = vmatpush2.msra.mxu1 %v6088_v44  ;;  %v5667_v30 = vpop.f32.mrf.mxu1 }
0x1e2d   :  { %6219 = vmatprep.subr.mxu1 %v6087_v45 }
0x1e2e   :  { %6220 = vmatpush2.msra.mxu1 %v6086_v46  ;;  %v11997_v31 = vpop.f32.mrf.mxu1  ;;  %v5638_v46 = vadd.f32 %v5637_v18, %v11916_v51 }
0x1e2f   :  { %6221 = vmatprep.subr.mxu1 %v6085_v47 }
0x1e30   :  { %6222 = vmatpush2.msra.mxu1 %v6084_v3  ;;  %v11999_v32 = vpop.f32.mrf.mxu1  ;;  %v5648_v3 = vadd.f32 %v5647_v22, %v11924_v56 }
0x1e31   :  { %6223 = vmatprep.subr.mxu1 %v6083_v4  ;;  %v5650_v4 = vadd.f32 %v5649_v23, %v11926_v57  ;;  %v5658_v57 = vadd.f32 %v5657_v26, %v11932_v60 }
0x1e32   :  { %6224 = vmatpush2.msra.mxu1 %v6082_v5 }
0x1e33   :  { %6225 = vmatprep.subr.mxu1 %v6081_v6 }
0x1e34   :  { %6226 = vmatpush2.msra.mxu1 %v6080_v7 }
0x1e35   :  { %6227 = vmatprep.subr.mxu1 %v6079_v8 }
0x1e36   :  { %6228 = vmatpush2.msra.mxu1 %v6078_v10 }
0x1e37   :  { %6229 = vmatprep.subr.mxu1 %v6077_v11 }
0x1e38   :  { %6230 = vmatpush2.msra.mxu1 %v6076_v9 }
0x1e39   :  { %6231 = vmatprep.subr.mxu1 %v6075_v36 }
0x1e3a   :  { %6232 = vmatpush2.msra.mxu1 %v6074_v12  ;;  %v5660_v12 = vadd.f32 %v5659_v27, %v11934_v61  ;;  %v5666_v27 = vadd.f32 %v5665_v29, %v11938_v63 }
0x1e3b   :  { %6233 = vmatprep.subr.mxu1 %v6073_v13 }
0x1e3c   :  { %6234 = vmatpush2.msra.mxu1 %v6072_v14 }
0x1e3d   :  { %6235 = vmatprep.subr.mxu1 %v6071_v15 }
0x1e3e   :  { %6236 = vmatpush2.msra.mxu1 %v6070_v16 }
0x1ebf   :  { %v5915_v33 = vpop.f32.mrf.mxu1 }
0x1ec0   :  { %v12008_v47 = vadd.f32 %v5915_v33, %v5636_v41 }
0x1ec1   :  { %v5917_v34 = vpop.f32.mrf.mxu1 }
0x1ec2   :  { %v12017_v6 = vadd.f32 %v5917_v34, %v5638_v46  ;;  %v5996_v10 = vmul.f32 %v12008_v47, %v12008_v47 }
0x1ec3   :  { %v5919_v35 = vpop.f32.mrf.mxu1 }
0x1ec4   :  { %v12005_v44 = vadd.f32 %v5919_v35, %v5640_v39  ;;  %v5997_v13 = vmul.f32 %v12017_v6, %v12017_v6 }
0x1ec5   :  { %v5921_v37 = vpop.f32.mrf.mxu1 }
0x1ec6   :  { %v12012_v5 = vadd.f32 %v5921_v37, %v5642_v42  ;;  %v5998_v51 = vmul.f32 %v12005_v44, %v12005_v44  ;;  %v5970_v60 = vadd.f32 %v12005_v44, %v12008_v47  ;;  %v5670_v42 = vadd.f32 %v11997_v31, %v11942_v1 }
0x1ec7   :  { %v5925_v38 = vpop.f32.mrf.mxu1 }
0x1ec8   :  { %v12014_v52 = vadd.f32 %v5925_v38, %v5646_v43  ;;  %v5999_v58 = vmul.f32 %v12012_v5, %v12012_v5  ;;  %v6012_v14 = vadd.f32 %v5998_v51, %v5996_v10  ;;  %v5983_v61 = vadd.f32 %v12012_v5, %v12017_v6 }
0x1ec9   :  { %v5927_v40 = vpop.f32.mrf.mxu1 }
0x1eca   :  { %v12022_v7 = vadd.f32 %v5927_v40, %v5648_v3  ;;  %v6000_v11 = vmul.f32 %v12014_v52, %v12014_v52  ;;  %v5971_v20 = vadd.f32 %v5970_v60, %v12014_v52  ;;  %v6025_v22 = vadd.f32 %v5999_v58, %v5997_v13 }
0x1ecb   :  { %v5929_v45 = vpop.f32.mrf.mxu1  ;;  %v5668_v40 = vadd.f32 %v5667_v30, %v11940_v0 }
0x1ecc   :  { %v12024_v8 = vadd.f32 %v5929_v45, %v5650_v4  ;;  %v6001_v15 = vmul.f32 %v12022_v7, %v12022_v7  ;;  %v6013_v23 = vadd.f32 %v6012_v14, %v6000_v11  ;;  %v5984_v62 = vadd.f32 %v5983_v61, %v12022_v7 }
0x1ecd   :  { %v5931_v48 = vpop.f32.mrf.mxu1 }
0x1ece   :  { %v12033_v59 = vadd.f32 %v5931_v48, %v5652_v53  ;;  %v6002_v16 = vmul.f32 %v12024_v8, %v12024_v8  ;;  %v5972_v28 = vadd.f32 %v5971_v20, %v12024_v8  ;;  %v6026_v34 = vadd.f32 %v6025_v22, %v6001_v15 }
0x1ecf   :  { %v5935_v56 = vpop.f32.mrf.mxu1  ;;  %v5672_v53 = vadd.f32 %v11999_v32, %v11944_v2 }
0x1ed0   :  { %v12035_v9 = vadd.f32 %v5935_v56, %v5656_v54  ;;  %v6003_v24 = vmul.f32 %v12033_v59, %v12033_v59  ;;  %v6014_v35 = vadd.f32 %v6013_v23, %v6002_v16  ;;  %v5985_v41 = vadd.f32 %v5984_v62, %v12033_v59 }
0x1ed1   :  { %v5937_v36 = vpop.f32.mrf.mxu1 }
0x1ed2   :  { %v12046_v17 = vadd.f32 %v5937_v36, %v5658_v57  ;;  %v6004_v25 = vmul.f32 %v12035_v9, %v12035_v9  ;;  %v5973_v63 = vadd.f32 %v5972_v28, %v12035_v9  ;;  %v6027_v43 = vadd.f32 %v6026_v34, %v6003_v24 }
0x1ed3   :  { %v5939_v18 = vpop.f32.mrf.mxu1 }
0x1ed4   :  { %v12052_v21 = vadd.f32 %v5939_v18, %v5660_v12  ;;  %v6005_v37 = vmul.f32 %v12046_v17, %v12046_v17  ;;  %v6015_v45 = vadd.f32 %v6014_v35, %v6004_v25  ;;  %v5986_v4 = vadd.f32 %v5985_v41, %v12046_v17 }
0x1ed5   :  { %v5941_v26 = vpop.f32.mrf.mxu1 }
0x1ed6   :  { %v12061_v33 = vadd.f32 %v5941_v26, %v5662_v19  ;;  %v6006_v38 = vmul.f32 %v12052_v21, %v12052_v21  ;;  %v5974_v48 = vadd.f32 %v5973_v63, %v12052_v21  ;;  %v6028_v54 = vadd.f32 %v6027_v43, %v6005_v37 }
0x1ed7   :  { %v5945_v39 = vpop.f32.mrf.mxu1 }
0x1ed8   :  { %v12070_v29 = vadd.f32 %v5945_v39, %v5666_v27  ;;  %v6007_v46 = vmul.f32 %v12061_v33, %v12061_v33  ;;  %v6016_v1 = vadd.f32 %v6015_v45, %v6006_v38  ;;  %v5987_v51 = vadd.f32 %v5986_v4, %v12061_v33 }
0x1ed9   :  { %v5947_v3 = vpop.f32.mrf.mxu1 }
0x1eda   :  { %v6008_v0 = vmul.f32 %v12070_v29, %v12070_v29  ;;  %v12080_v30 = vadd.f32 %v5947_v3, %v5668_v40  ;;  %v5975_v56 = vadd.f32 %v5974_v48, %v12070_v29  ;;  %v6029_v58 = vadd.f32 %v6028_v54, %v6007_v46 }
0x1edb   :  { %v5949_v31 = vpop.f32.mrf.mxu1 }
0x1edc   :  { %v6009_v57 = vmul.f32 %v12080_v30, %v12080_v30  ;;  %v12088_v10 = vadd.f32 %v5949_v31, %v5670_v42  ;;  %v6017_v11 = vadd.f32 %v6016_v1, %v6008_v0  ;;  %v5988_v12 = vadd.f32 %v5987_v51, %v12080_v30 }
0x1edd   :  { %v5951_v36 = vpop.f32.mrf.mxu1 }
0x1ede   :  { %v5976_v13 = vadd.f32 %v5975_v56, %v12088_v10  ;;  %v6010_v2 = vmul.f32 %v12088_v10, %v12088_v10  ;;  %v12094_v32 = vadd.f32 %v5951_v36, %v5672_v53  ;;  %v6030_v60 = vadd.f32 %v6029_v58, %v6009_v57  ;;  %v6250_v36 = vld [vmem:[%s12431_s23 + $0x200] sm:$0x3] }
0x1ee0   :  { %v5977_v14 = vrot.slane %v5976_v13, 4  ;;  %v6018_v15 = vadd.f32 %v6017_v11, %v6010_v2  ;;  %v5989_v16 = vadd.f32 %v5988_v12, %v12094_v32  ;;  %v6011_v18 = vmul.f32 %v12094_v32, %v12094_v32 }
0x1ee2   :  { %v5978_v19 = vadd.f32 %v5977_v14, %v5976_v13  ;;  %v6019_v61 = vrot.slane %v6018_v15, 4  ;;  %v5990_v20 = vrot.slane %v5989_v16, 4  ;;  %v6031_v22 = vadd.f32 %v6030_v60, %v6011_v18  ;;  %v6251_v13 = vld [vmem:[%s12431_s23 + $0x208] sm:$0x3] }
0x1ee4   :  { %v5979_v23 = vrot.slane %v5978_v19, 2  ;;  %v6020_v24 = vadd.f32 %v6019_v61, %v6018_v15  ;;  %v5991_v25 = vadd.f32 %v5990_v20, %v5989_v16  ;;  %v6032_v26 = vrot.slane %v6031_v22, 4 }
0x1ee6   :  { %v5980_v27 = vadd.f32 %v5979_v23, %v5978_v19  ;;  %v6021_v62 = vrot.slane %v6020_v24, 2  ;;  %v5992_v28 = vrot.slane %v5991_v25, 2  ;;  %v6033_v34 = vadd.f32 %v6032_v26, %v6031_v22 }
0x1ee8   :  { %v6022_v35 = vadd.f32 %v6021_v62, %v6020_v24  ;;  %v5993_v37 = vadd.f32 %v5992_v28, %v5991_v25  ;;  %v6034_v38 = vrot.slane %v6033_v34, 2  ;;  %v5981_v39 = vrot.slane %v5980_v27, 1 }
0x1eea   :  { %v5994_v40 = vrot.slane %v5993_v37, 1  ;;  %v6035_v41 = vadd.f32 %v6034_v38, %v6033_v34  ;;  %v6023_v63 = vrot.slane %v6022_v35, 1  ;;  %v5982_v45 = vadd.f32 %v5981_v39, %v5980_v27 }
0x1eec   :  { %v5995_v42 = vadd.f32 %v5994_v40, %v5993_v37  ;;  %v6036_v43 = vrot.slane %v6035_v41, 1  ;;  %v6024_v3 = vadd.f32 %v6023_v63, %v6022_v35 }
0x1eee   :  { %6166 = vmatprep.mubr.f32.mxu0 %v5995_v42  ;;  %v6037_v46 = vadd.f32 %v6036_v43, %v6035_v41 }
0x1eef   :  { %6167 = vmatmul.mubr.f32.vlgmr.msra.gmra.mxu0 %v5982_v45 }
0x1ef0   :  { %6237 = vmatprep.mubr.f32.mxu1 %v6037_v46  ;;  %6425 = vmatprep.mubr.bf16.mxu0 %v10897_v49 }
0x1ef1   :  { %6238 = vmatmul.mubr.f32.vlgmr.msra.gmra.mxu1 %v6024_v3 }
0x1ef2   :  { %6574 = vmatprep.mubr.bf16.mxu1 %v10897_v49 }
0x1faf   :  { %v6168_v4 = vpop.f32.mrf.mxu0 }
0x1fb0   :  { %v6244_v48 = vmul.f32 %v6168_v4, %v6168_v4 }
0x1fb1   :  { %v6170_v0 = vpop.f32.mrf.mxu0  ;;  %v6239_v53 = vpop.f32.mrf.mxu1 }
0x1fb2   :  { %v6245_v54 = vmul.f32 %v6170_v0, %v6170_v0  ;;  %v6246_v1 = vsub.f32 %v6239_v53, %v6244_v48 }
0x1fb3   :  { %v6241_v31 = vpop.f32.mrf.mxu1 }
0x1fb4   :  { %v6248_v51 = vmax.f32 %v6246_v1, 0.0  ;;  %v6247_v56 = vsub.f32 %v6241_v31, %v6245_v54 }
0x1fb6   :  { %v6252_v57 = vadd.f32 1e-05, %v6248_v51  ;;  %v6249_v58 = vmax.f32 %v6247_v56, 0.0 }
0x1fb8   :  { %10555 = vrsqrt.f32 %v6252_v57  ;;  %v6253_v11 = vadd.f32 1e-05, %v6249_v58 }
0x1fba   :  { %10557 = vrsqrt.f32 %v6253_v11 }
0x1fc5   :  { %v10556_v12 = vpop.eup %10555 }
0x1fc6   :  { %v6256_v2 = vmul.f32 %v10556_v12, %v6250_v36 }
0x1fc7   :  { %v10558_v60 = vpop.eup %10557 }
0x1fc8   :  { %v6258_v14 = vmul.f32 %v6256_v2, %v6168_v4  ;;  %v6271_v15 = vrot.slane %v6256_v2, %v11227_v50  ;;  %v6257_v16 = vmul.f32 %v10558_v60, %v6251_v13 }
0x1fca   :  { %v6262_v18 = vrot.slane %v6258_v14, 7  ;;  %v6259_v19 = vmul.f32 %v6257_v16, %v6170_v0  ;;  %v6275_v61 = vrot.slane %v6257_v16, %v11227_v50  ;;  %v6288_v20 = vmul.f32 %v6271_v15, %v12070_v29 }
0x1fcb   :  { %v6290_v22 = vmul.f32 %v6271_v15, %v12088_v10  ;;  %v6284_v25 = vmul.f32 %v6271_v15, %v12035_v9  ;;  %v6286_v26 = vmul.f32 %v6271_v15, %v12052_v21  ;;  %v6280_v34 = vmul.f32 %v6271_v15, %v12014_v52 }
0x1fcc   :  { %v6266_v23 = vsub.f32 %v6250_v36, %v6262_v18  ;;  %v6263_v24 = vrot.slane %v6259_v19, 7  ;;  %v6289_v27 = vmul.f32 %v6275_v61, %v12080_v30  ;;  %v6291_v62 = vmul.f32 %v6275_v61, %v12094_v32 }
0x1fcd   :  { %v6285_v28 = vmul.f32 %v6275_v61, %v12046_v17  ;;  %v6287_v29 = vmul.f32 %v6275_v61, %v12061_v33  ;;  %v6281_v10 = vmul.f32 %v6275_v61, %v12022_v7  ;;  %v6283_v37 = vmul.f32 %v6275_v61, %v12033_v59 }
0x1fce   :  { %v6295_v50 = vrot.slane %v6266_v23, %v11230_v55  ;;  %v6267_v35 = vsub.f32 %v6251_v13, %v6263_v24  ;;  %v6282_v9 = vmul.f32 %v6271_v15, %v12024_v8  ;;  %v6277_v21 = vmul.f32 %v6275_v61, %v12017_v6 }
0x1fcf   :  { %v6279_v30 = vmul.f32 %v6275_v61, %v12012_v5  ;;  %v6276_v41 = vmul.f32 %v6271_v15, %v12008_v47  ;;  %v6278_v33 = vmul.f32 %v6271_v15, %v12005_v44 }
0x1fd0   :  { %v6299_v32 = vrot.slane %v6267_v35, %v11230_v55  ;;  %v6312_v17 = vadd.f32 %v6295_v50, %v6288_v20  ;;  %v6314_v38 = vadd.f32 %v6295_v50, %v6290_v22  ;;  %v6308_v52 = vadd.f32 %v6295_v50, %v6284_v25 }
0x1fd1   :  { %v6310_v39 = vadd.f32 %v6295_v50, %v6286_v26  ;;  %v6304_v40 = vadd.f32 %v6295_v50, %v6280_v34  ;;  %v6306_v0 = vadd.f32 %v6295_v50, %v6282_v9  ;;  %v6300_v53 = vadd.f32 %v6295_v50, %v6276_v41  ;;  %v10466_v41 = vld [vmem:[%s11075_s8 + $0x30] sm:$0xff]  }
0x1fd2   :  { %v6313_v7 = vadd.f32 %v6299_v32, %v6289_v27  ;;  %v6315_v63 = vadd.f32 %v6299_v32, %v6291_v62  ;;  %v6328_v59 = vmul.f32 0.01, %v6312_v17  ;;  %v6330_v42 = vmul.f32 0.01, %v6314_v38 }
0x1fd3   :  { %v6309_v8 = vadd.f32 %v6299_v32, %v6285_v28  ;;  %v6311_v43 = vadd.f32 %v6299_v32, %v6287_v29  ;;  %v6324_v6 = vmul.f32 0.01, %v6308_v52  ;;  %v6326_v45 = vmul.f32 0.01, %v6310_v39 }
0x1fd4   :  { %v6329_v5 = vmul.f32 0.01, %v6313_v7  ;;  %v6331_v46 = vmul.f32 0.01, %v6315_v63  ;;  %v6344_v55 = vmax.f32 %v6312_v17, %v6328_v59  ;;  %v6346_v3 = vmax.f32 %v6314_v38, %v6330_v42  ;;  %v10443_v17 = vld [vmem:[%s11075_s8 + $0xf0] sm:$0xff]   ;;  %v10464_v38 = vld [vmem:[%s11075_s8 + $0x38] sm:$0xff]  }
0x1fd5   :  { %v6325_v4 = vmul.f32 0.01, %v6309_v8  ;;  %v6327_v48 = vmul.f32 0.01, %v6311_v43  ;;  %v6340_v1 = vmax.f32 %v6308_v52, %v6324_v6  ;;  %v6305_v44 = vadd.f32 %v6299_v32, %v6281_v10  ;;  %v10441_v10 = vld [vmem:[%s11075_s8 + $0xf8] sm:$0xff]   ;;  %v10465_v52 = vld [vmem:[%s11075_s8 + $0x70] sm:$0xff]  }
0x1fd6   :  { %v6345_v54 = vmax.f32 %v6313_v7, %v6329_v5  ;;  %v6347_v47 = vmax.f32 %v6315_v63, %v6331_v46  ;;  %v6342_v56 = vmax.f32 %v6310_v39, %v6326_v45  ;;  %v6307_v57 = vadd.f32 %v6299_v32, %v6283_v37  ;;  %v10463_v37 = vld [vmem:[%s11075_s8 + $0x78] sm:$0xff]   ;;  %v10444_v39 = vld [vmem:[%s11075_s8 + $0xb0] sm:$0xff]   ;;  %v10446_v7 = vld [vmem:[%s12432_s26 + $0x24] sm:$0xff]  }
0x1fd7   :  { %v6341_v31 = vmax.f32 %v6309_v8, %v6325_v4  ;;  %v6343_v51 = vmax.f32 %v6311_v43, %v6327_v48  ;;  %v12125_v11 = vpack.c.bf16 %v6346_v3, %v6344_v55  ;;  %v6321_v36 = vmul.f32 0.01, %v6305_v44  ;;  %v10448_v63 = vld [vmem:[%s11075_s8 + $0xa8] sm:$0xff]   ;;  %v10449_v59 = vld [vmem:[%s11075_s8 + $0xe0] sm:$0xff]   ;;  %v10453_v45 = vld [vmem:[%s11075_s8 + $0xd8] sm:$0xff]  }
0x1fd8   :  { %v12123_v58 = vpack.c.bf16 %v6347_v47, %v6345_v54  ;;  %v6320_v12 = vmul.f32 0.01, %v6304_v40  ;;  %v6323_v13 = vmul.f32 0.01, %v6307_v57  ;;  %v6322_v2 = vmul.f32 0.01, %v6306_v0 }
0x1fd9   :  { %v6301_v60 = vadd.f32 %v6299_v32, %v6277_v21  ;;  %v6303_v14 = vadd.f32 %v6299_v32, %v6279_v30  ;;  %v12129_v15 = vpack.c.bf16 %v6343_v51, %v6341_v31  ;;  %v6337_v16 = vmax.f32 %v6305_v44, %v6321_v36  ;;  %v10439_v21 = vld [vmem:[%s12432_s26] sm:$0xff]   ;;  %v10442_v32 = vld [vmem:[%s11075_s8 + $0xb8] sm:$0xff]   ;;  %v10467_v42 = vld [vmem:[%s11075_s8 + $0x68] sm:$0xff]  }
0x1fda   :  { %6401 = vmatprep.subr.bf16.mxu0 %v12123_v58  ;;  %6550 = vmatprep.subr.bf16.mxu1 %v12123_v58  ;;  %v6339_v18 = vmax.f32 %v6307_v57, %v6323_v13  ;;  %v6302_v20 = vadd.f32 %v6295_v50, %v6278_v33  ;;  %v12135_v22 = vpack.c.bf16 %v6342_v56, %v6340_v1  ;;  %v6316_v25 = vmul.f32 0.01, %v6300_v53  ;;  %v10440_v30 = vld [vmem:[%s12432_s26 + $0x1c] sm:$0xff]   ;;  %v10445_v33 = vld [vmem:[%s12432_s26 + $0x8] sm:$0xff]   ;;  %v10451_v5 = vld [vmem:[%s12432_s26 + $0x10] sm:$0xff]  }
0x1fdb   :  { %6402 = vmatpush1.bf16.msra.mxu0 %v12125_v11  ;;  %6551 = vmatpush1.bf16.msra.mxu1 %v12125_v11  ;;  %v6317_v19 = vmul.f32 0.01, %v6301_v60  ;;  %v6319_v61 = vmul.f32 0.01, %v6303_v14  ;;  %v6336_v23 = vmax.f32 %v6304_v40, %v6320_v12  ;;  %v6338_v24 = vmax.f32 %v6306_v0, %v6322_v2  ;;  %v10447_v40 = vld [vmem:[%s11075_s8 + $0xe8] sm:$0xff]   ;;  %v10450_v43 = vld [vmem:[%s11075_s8 + $0xa0] sm:$0xff]  }
0x1fdc   :  { %6403 = vmatprep.subr.bf16.mxu0 %v12129_v15  ;;  %6552 = vmatprep.subr.bf16.mxu1 %v12129_v15  ;;  %v6318_v26 = vmul.f32 0.01, %v6302_v20  ;;  %v12137_v27 = vpack.c.bf16 %v6339_v18, %v6337_v16  ;;  %v6332_v50 = vmax.f32 %v6300_v53, %v6316_v25  ;;  %v10468_v8 = vld [vmem:[%s11075_s8 + $0x28] sm:$0xff]   ;;  %v10469_v6 = vld [vmem:[%s11075_s8 + $0x60] sm:$0xff]   ;;  %v10454_v55 = vld [vmem:[%s11075_s8 + $0x98] sm:$0xff]  }
0x1fdd   :  { %v6333_v62 = vmax.f32 %v6301_v60, %v6317_v19  ;;  %v6335_v28 = vmax.f32 %v6303_v14, %v6319_v61  ;;  %v12143_v34 = vpack.c.bf16 %v6338_v24, %v6336_v23  ;;  %v10452_v46 = vld [vmem:[%s12432_s26 + $0x2c] sm:$0xff]   ;;  %v10470_v4 = vld [vmem:[%s11075_s8 + $0x20] sm:$0xff]   ;;  %v10471_v48 = vld [vmem:[%s11075_s8 + $0x58] sm:$0xff]  }
0x1fde   :  { %v6334_v35 = vmax.f32 %v6302_v20, %v6318_v26  ;;  %v10455_v3 = vld [vmem:[%s11075_s8 + $0xd0] sm:$0xff]   ;;  %v10457_v53 = vld [vmem:[%s11075_s8 + $0xc8] sm:$0xff]   ;;  %v10472_v54 = vld [vmem:[%s11075_s8 + $0x18] sm:$0xff]  }
0x1fdf   :  { %6404 = vmatpush1.bf16.msra.mxu0 %v12135_v22  ;;  %6553 = vmatpush1.bf16.msra.mxu1 %v12135_v22  ;;  %v12145_v29 = vpack.c.bf16 %v6335_v28, %v6333_v62  ;;  %v10456_v0 = vld [vmem:[%s11075_s8 + $0x90] sm:$0xff]   ;;  %v10460_v1 = vld [vmem:[%s12432_s26 + $0x18] ss:$0 sps:$4 sm:$0xff]   ;;  %v10458_v44 = vld [vmem:[%s11075_s8 + $0x88] sm:$0xff]  }
0x1fe0   :  { %6405 = vmatprep.subr.bf16.mxu0 %v12137_v27  ;;  %6554 = vmatprep.subr.bf16.mxu1 %v12137_v27  ;;  %v12153_v9 = vpack.c.bf16 %v6334_v35, %v6332_v50  ;;  %v10459_v47 = vld [vmem:[%s12432_s26 + $0x34] ss:$0 sps:$4 sm:$0xff]   ;;  %v10461_v51 = vld [vmem:[%s11075_s8 + $0xc0] sm:$0xff]   ;;  %v10475_v36 = vld [vmem:[%s11075_s8 + $0x48] sm:$0xff]  }
0x1fe1   :  { %v10473_v31 = vld [vmem:[%s11075_s8 + $0x50] sm:$0xff]   ;;  %v10462_v57 = vld [vmem:[%s11075_s8 + $0x80] sm:$0xff]   ;;  %v10476_v12 = vld [vmem:[%s11075_s8 + $0x8] sm:$0xff]  }
0x1fe2   :  { %v10474_v56 = vld [vmem:[%s11075_s8 + $0x10] sm:$0xff]   ;;  %v10477_v13 = vld [vmem:[%s11075_s8 + $0x40] sm:$0xff]  }
0x1fe3   :  { %6406 = vmatpush1.bf16.msra.mxu0 %v12143_v34  ;;  %6555 = vmatpush1.bf16.msra.mxu1 %v12143_v34  ;;  %v10478_v2 = vld [vmem:[%s11075_s8] sm:$0xff]  }
0x1fe4   :  { %6407 = vmatprep.subr.bf16.mxu0 %v12145_v29  ;;  %6556 = vmatprep.subr.bf16.mxu1 %v12145_v29 }
0x1fe7   :  { %6408 = vmatpush1.bf16.msra.mxu0 %v12153_v9  ;;  %6557 = vmatpush1.bf16.msra.mxu1 %v12153_v9 }
0x1fe8   :  { %9150 = vmatprep.subr.bf16.mxu0 %v10441_v10  ;;  %9190 = vmatprep.subr.bf16.mxu1 %v10463_v37 }
0x1fea   :  { %8509 = vmatmul.mubr.msk.bf16.vlgmr.msra.gmra.mxu0 %vm310_vm0, %v10439_v21  ;;  %8524 = vmatmul.mubr.msk.bf16.vlgmr.msra.gmra.mxu1 %vm310_vm0, %v10440_v30 }
0x1feb   :  { %9151 = vmatpush3.bf16.msra.mxu0 %v10442_v32  ;;  %6435 = vmatprep.mubr.bf16.mxu0 %v10897_v49 }
0x1fec   :  { %9152 = vmatprep.subr.bf16.mxu0 %v10443_v17  ;;  %6584 = vmatprep.mubr.bf16.mxu1 %v10897_v49 }
0x1fed   :  { %9191 = vmatpush3.bf16.msra.mxu1 %v10464_v38 }
0x1fee   :  { %9192 = vmatprep.subr.bf16.mxu1 %v10465_v52 }
0x1fef   :  { %9153 = vmatpush3.bf16.msra.mxu0 %v10444_v39 }
0x1ff0   :  { %9154 = vmatprep.subr.bf16.mxu0 %v10447_v40 }
0x1ff1   :  { %9193 = vmatpush3.bf16.msra.mxu1 %v10466_v41 }
0x1ff2   :  { %8510 = vmatmul.mubr.msk.bf16.gmra.mxu0 %vm310_vm0, %v10445_v33  ;;  %8525 = vmatmul.mubr.msk.bf16.gmra.mxu1 %vm310_vm0, %v10446_v7 }
0x1ff3   :  { %9155 = vmatpush3.bf16.msra.mxu0 %v10448_v63  ;;  %6445 = vmatprep.mubr.bf16.mxu0 %v10897_v49 }
0x1ff4   :  { %9156 = vmatprep.subr.bf16.mxu0 %v10449_v59  ;;  %6594 = vmatprep.mubr.bf16.mxu1 %v10897_v49 }
0x1ff5   :  { %9194 = vmatprep.subr.bf16.mxu1 %v10467_v42 }
0x1ff6   :  { %9195 = vmatpush3.bf16.msra.mxu1 %v10468_v8 }
0x1ff7   :  { %9157 = vmatpush3.bf16.msra.mxu0 %v10450_v43  ;;  %9196 = vmatprep.subr.bf16.mxu1 %v10469_v6 }
0x1ff8   :  { %9158 = vmatprep.subr.bf16.mxu0 %v10453_v45 }
0x1ffa   :  { %8511 = vmatmul.mubr.msk.bf16.gmra.mxu0 %vm310_vm0, %v10451_v5  ;;  %8526 = vmatmul.mubr.msk.bf16.gmra.mxu1 %vm310_vm0, %v10452_v46 }
0x1ffb   :  { %9159 = vmatpush3.bf16.msra.mxu0 %v10454_v55  ;;  %6604 = vmatprep.mubr.bf16.mxu1 %v10897_v49 }
0x1ffc   :  { %9160 = vmatprep.subr.bf16.mxu0 %v10455_v3  ;;  %6455 = vmatprep.mubr.bf16.mxu0 %v10897_v49 }
0x1ffd   :  { %9197 = vmatpush3.bf16.msra.mxu1 %v10470_v4 }
0x1ffe   :  { %9198 = vmatprep.subr.bf16.mxu1 %v10471_v48 }
0x1fff   :  { %9161 = vmatpush3.bf16.msra.mxu0 %v10456_v0 }
0x2000   :  { %9162 = vmatprep.subr.bf16.mxu0 %v10457_v53 }
0x2001   :  { %9199 = vmatpush3.bf16.msra.mxu1 %v10472_v54 }
0x2002   :  { %8527 = vmatmul.mubr.msk.bf16.gmra.mxu1 %vm310_vm0, %v10459_v47  ;;  %8512 = vmatmul.mubr.msk.bf16.gmra.mxu0 %vm310_vm0, %v10460_v1 }
0x2003   :  { %9163 = vmatpush3.bf16.msra.mxu0 %v10458_v44  ;;  %9200 = vmatprep.subr.bf16.mxu1 %v10473_v31 }
0x2004   :  { %9164 = vmatprep.subr.bf16.mxu0 %v10461_v51  ;;  %v10479_v51 = vld [vmem:[%s12432_s26 + $0x38] sm:$0xff]  }
0x2005   :  { %9201 = vmatpush3.bf16.msra.mxu1 %v10474_v56  ;;  %v10480_v56 = vld [vmem:[%s12432_s26 + $0x40] sm:$0xff]  }
0x2006   :  { %9202 = vmatprep.subr.bf16.mxu1 %v10475_v36  ;;  %v10482_v36 = vld [vmem:[%s12432_s26 + $0x50] ss:$0 sps:$4 sm:$0xff]  }
0x2007   :  { %9165 = vmatpush3.bf16.msra.mxu0 %v10462_v57  ;;  %v10481_v57 = vld [vmem:[%s12432_s26 + $0x48] sm:$0xff]  }
0x2008   :  { %7020 = vmatprep.subr.bf16.mxu0 %v12123_v58 }
0x2009   :  { %9203 = vmatpush3.bf16.msra.mxu1 %v10476_v12  ;;  %v10483_v12 = vld [vmem:[%s12432_s26 + $0x54] sm:$0xff]  }
0x200a   :  { %9204 = vmatprep.subr.bf16.mxu1 %v10477_v13  ;;  %v10492_v13 = vld [vmem:[%s11075_s8 + $0x138] sm:$0xff]  }
0x200d   :  { %9205 = vmatpush3.bf16.msra.mxu1 %v10478_v2  ;;  %v10497_v2 = vld [vmem:[%s11075_s8 + $0x160] sm:$0xff]  }
0x20aa   :  { %v6427_v60 = vpop.f32.mrf.mxu0  ;;  %v6576_v14 = vpop.f32.mrf.mxu1 }
0x20ac   :  { %v6429_v16 = vpop.f32.mrf.mxu0  ;;  %v6578_v18 = vpop.f32.mrf.mxu1 }
0x20ae   :  { %v6431_v19 = vpop.f32.mrf.mxu0  ;;  %v6580_v61 = vpop.f32.mrf.mxu1 }
0x20af   :  { %v6464_v20 = vpack.c.bf16 %v6431_v19, %v6427_v60  ;;  %v6613_v62 = vpack.c.bf16 %v6580_v61, %v6576_v14  ;;  %v10498_v60 = vld [vmem:[%s11075_s8 + $0x120] sm:$0xff]   ;;  %v10487_v14 = vld [vmem:[%s12432_s26 + $0x70] sm:$0xff]  }
0x20b0   :  { %v6433_v23 = vpop.f32.mrf.mxu0  ;;  %v6582_v24 = vpop.f32.mrf.mxu1  ;;  %v10501_v19 = vld [vmem:[%s11075_s8 + $0x150] sm:$0xff]  }
0x20b1   :  { %v6465_v25 = vpack.c.bf16 %v6433_v23, %v6429_v16  ;;  %v6614_v26 = vpack.c.bf16 %v6582_v24, %v6578_v18  ;;  %v10499_v16 = vld [vmem:[%s11075_s8 + $0x158] sm:$0xff]   ;;  %v10502_v61 = vld [vmem:[%s11075_s8 + $0x110] sm:$0xff]   ;;  %v10504_v24 = vld [vmem:[%s11075_s8 + $0x108] sm:$0xff]  }
0x20b2   :  { %v6437_v28 = vpop.f32.mrf.mxu0  ;;  %v6586_v50 = vpop.f32.mrf.mxu1  ;;  %v10500_v18 = vld [vmem:[%s11075_s8 + $0x118] sm:$0xff]  }
0x20b3   :  { %6782 = vmatprep.mubr.bf16.mxu0 %v6614_v26  ;;  %6942 = vmatprep.mubr.bf16.mxu1 %v6465_v25  ;;  %v10488_v23 = vld [vmem:[%s12432_s26 + $0x78] sm:$0xff]   ;;  %v10505_v25 = vld [vmem:[%s11075_s8 + $0x140] sm:$0xff]  }
0x20b4   :  { %v6439_v35 = vpop.f32.mrf.mxu0  ;;  %v6588_v10 = vpop.f32.mrf.mxu1  ;;  %6783 = vmatmul.mubr.bf16.vlgmr.msra.gmra.mxu0 %v6613_v62  ;;  %6943 = vmatmul.mubr.bf16.vlgmr.msra.gmra.mxu1 %v6464_v20  ;;  %v10503_v20 = vld [vmem:[%s11075_s8 + $0x148] sm:$0xff]   ;;  %v10506_v26 = vld [vmem:[%s11075_s8 + $0x100] sm:$0xff]   ;;  %v10507_v62 = vld [vmem:[%s11075_s8 + $0x1f8] sm:$0xff]  }
0x20b5   :  { %7021 = vmatpush1.bf16.msra.mxu0 %v12125_v11 }
0x20b6   :  { %7022 = vmatprep.subr.bf16.mxu0 %v12129_v15  ;;  %v6441_v37 = vpop.f32.mrf.mxu0  ;;  %v6590_v21 = vpop.f32.mrf.mxu1 }
0x20b7   :  { %v6466_v30 = vpack.c.bf16 %v6441_v37, %v6437_v28  ;;  %v6615_v39 = vpack.c.bf16 %v6590_v21, %v6586_v50  ;;  %v10489_v28 = vld [vmem:[%s12432_s26 + $0x80] sm:$0xff]   ;;  %v10490_v50 = vld [vmem:[%s12432_s26 + $0x88] ss:$0 sps:$4 sm:$0xff]  }
0x20b8   :  { %v6443_v32 = vpop.f32.mrf.mxu0  ;;  %v6592_v17 = vpop.f32.mrf.mxu1 }
0x20b9   :  { %v6467_v38 = vpack.c.bf16 %v6443_v32, %v6439_v35  ;;  %v6616_v52 = vpack.c.bf16 %v6592_v17, %v6588_v10  ;;  %7023 = vmatpush1.bf16.msra.mxu0 %v12135_v22 }
0x20ba   :  { %7024 = vmatprep.subr.bf16.mxu0 %v12137_v27  ;;  %v6447_v40 = vpop.f32.mrf.mxu0  ;;  %v6596_v41 = vpop.f32.mrf.mxu1 }
0x20bb   :  { %6790 = vmatprep.mubr.bf16.mxu0 %v6616_v52  ;;  %6950 = vmatprep.mubr.bf16.mxu1 %v6467_v38 }
0x20bc   :  { %v6449_v33 = vpop.f32.mrf.mxu0  ;;  %v6598_v7 = vpop.f32.mrf.mxu1  ;;  %6791 = vmatmul.mubr.bf16.gmra.mxu0 %v6615_v39  ;;  %6951 = vmatmul.mubr.bf16.gmra.mxu1 %v6466_v30 }
0x20bd   :  { %7025 = vmatpush1.bf16.msra.mxu0 %v12143_v34 }
0x20be   :  { %7026 = vmatprep.subr.bf16.mxu0 %v12145_v29  ;;  %v6451_v63 = vpop.f32.mrf.mxu0  ;;  %v6600_v59 = vpop.f32.mrf.mxu1 }
0x20bf   :  { %v6468_v42 = vpack.c.bf16 %v6451_v63, %v6447_v40  ;;  %v6617_v5 = vpack.c.bf16 %v6600_v59, %v6596_v41 }
0x20c0   :  { %v6453_v8 = vpop.f32.mrf.mxu0  ;;  %v6602_v43 = vpop.f32.mrf.mxu1 }
0x20c1   :  { %v6469_v6 = vpack.c.bf16 %v6453_v8, %v6449_v33  ;;  %v6618_v45 = vpack.c.bf16 %v6602_v43, %v6598_v7  ;;  %7027 = vmatpush1.bf16.msra.mxu0 %v12153_v9 }
0x20c2   :  { %7337 = vmatprep.subr.bf16.mxu0 %v12123_v58  ;;  %v6606_v46 = vpop.f32.mrf.mxu1  ;;  %v6457_v55 = vpop.f32.mrf.mxu0 }
0x20c3   :  { %6798 = vmatprep.mubr.bf16.mxu0 %v6618_v45  ;;  %6958 = vmatprep.mubr.bf16.mxu1 %v6469_v6  ;;  %v6470_v47 = vpack.c.bf16 %v6457_v55, %v6457_v55  ;;  %v6619_v31 = vpack.c.bf16 %v6606_v46, %v6606_v46 }
0x20c4   :  { %6799 = vmatmul.mubr.bf16.gmra.mxu0 %v6617_v5  ;;  %6959 = vmatmul.mubr.bf16.gmra.mxu1 %v6468_v42  ;;  %v6608_v3 = vpop.f32.mrf.mxu1  ;;  %v6459_v4 = vpop.f32.mrf.mxu0 }
0x20c5   :  { %v6620_v48 = vpack.c.bf16 %v6608_v3, %v6608_v3  ;;  %v6471_v0 = vpack.c.bf16 %v6459_v4, %v6459_v4 }
0x20c6   :  { %v6610_v53 = vpop.f32.mrf.mxu1  ;;  %v6461_v54 = vpop.f32.mrf.mxu0 }
0x20c7   :  { %6806 = vmatprep.mubr.bf16.mxu0 %v6620_v48  ;;  %6966 = vmatprep.mubr.bf16.mxu1 %v6471_v0 }
0x20c8   :  { %v6611_v1 = vpop.f32.mrf.mxu1  ;;  %v6462_v44 = vpop.f32.mrf.mxu0 }
0x20cc   :  { %6807 = vmatmul.mubr.bf16.gmra.mxu0 %v6619_v31  ;;  %6967 = vmatmul.mubr.bf16.gmra.mxu1 %v6470_v47 }
0x20cd   :  { %7044 = vmatprep.mubr.bf16.mxu0 %v10897_v49 }
0x20d4   :  { %8603 = vmatmul.mubr.msk.bf16.vlgmr.msra.gmra.mxu0 %vm310_vm0, %v10479_v51 }
0x20d5   :  { %7338 = vmatpush1.bf16.msra.mxu0 %v12125_v11  ;;  %7054 = vmatprep.mubr.bf16.mxu0 %v10897_v49 }
0x20d6   :  { %7339 = vmatprep.subr.bf16.mxu0 %v12129_v15 }
0x20d9   :  { %7340 = vmatpush1.bf16.msra.mxu0 %v12135_v22 }
0x20da   :  { %7341 = vmatprep.subr.bf16.mxu0 %v12137_v27 }
0x20dc   :  { %8604 = vmatmul.mubr.msk.bf16.gmra.mxu0 %vm310_vm0, %v10480_v56 }
0x20dd   :  { %7342 = vmatpush1.bf16.msra.mxu0 %v12143_v34  ;;  %7064 = vmatprep.mubr.bf16.mxu0 %v10897_v49 }
0x20de   :  { %7343 = vmatprep.subr.bf16.mxu0 %v12145_v29 }
0x20e1   :  { %7344 = vmatpush1.bf16.msra.mxu0 %v12153_v9 }
0x20e2   :  { %7654 = vmatprep.subr.bf16.mxu0 %v12123_v58  ;;  %v10484_v58 = vld [vmem:[%s12432_s26 + $0x5c] sm:$0xff]  }
0x20e4   :  { %8605 = vmatmul.mubr.msk.bf16.gmra.mxu0 %vm310_vm0, %v10481_v57 }
0x20e5   :  { %7074 = vmatprep.mubr.bf16.mxu0 %v10897_v49 }
0x20ec   :  { %8606 = vmatmul.mubr.msk.bf16.gmra.mxu0 %vm310_vm0, %v10482_v36 }
0x20ed   :  { %7361 = vmatprep.mubr.bf16.mxu0 %v10897_v49 }
0x20f4   :  { %8666 = vmatmul.mubr.msk.bf16.vlgmr.msra.gmra.mxu0 %vm310_vm0, %v10483_v12 }
0x20f5   :  { %7655 = vmatpush1.bf16.msra.mxu0 %v12125_v11  ;;  %7371 = vmatprep.mubr.bf16.mxu0 %v10897_v49  ;;  %v10485_v11 = vld [vmem:[%s12432_s26 + $0x64] sm:$0xff]  }
0x20f6   :  { %7656 = vmatprep.subr.bf16.mxu0 %v12129_v15  ;;  %v10491_v15 = vld [vmem:[%s11075_s8 + $0x178] sm:$0xff]  }
0x20f7   :  { %9230 = vmatprep.subr.bf16.mxu1 %v10491_v15 }
0x20f8   :  { %9231 = vmatpush3.bf16.msra.mxu1 %v10492_v13 }
0x20f9   :  { %7657 = vmatpush1.bf16.msra.mxu0 %v12135_v22  ;;  %v10493_v22 = vld [vmem:[%s11075_s8 + $0x170] sm:$0xff]  }
0x20fa   :  { %7658 = vmatprep.subr.bf16.mxu0 %v12137_v27  ;;  %v10494_v27 = vld [vmem:[%s11075_s8 + $0x130] sm:$0xff]   ;;  %9232 = vmatprep.subr.bf16.mxu1 %v10493_v22 }
0x20fc   :  { %8667 = vmatmul.mubr.msk.bf16.gmra.mxu0 %vm310_vm0, %v10484_v58  ;;  %9233 = vmatpush3.bf16.msra.mxu1 %v10494_v27 }
0x20fd   :  { %7659 = vmatpush1.bf16.msra.mxu0 %v12143_v34  ;;  %7381 = vmatprep.mubr.bf16.mxu0 %v10897_v49  ;;  %v10486_v34 = vld [vmem:[%s12432_s26 + $0x6c] ss:$0 sps:$4 sm:$0xff]  }
0x20fe   :  { %7660 = vmatprep.subr.bf16.mxu0 %v12145_v29  ;;  %v10495_v29 = vld [vmem:[%s11075_s8 + $0x168] sm:$0xff]  }
0x20ff   :  { %9234 = vmatprep.subr.bf16.mxu1 %v10495_v29 }
0x2101   :  { %7661 = vmatpush1.bf16.msra.mxu0 %v12153_v9  ;;  %v10496_v9 = vld [vmem:[%s11075_s8 + $0x128] sm:$0xff]  }
0x2102   :  { %9235 = vmatpush3.bf16.msra.mxu1 %v10496_v9 }
0x2103   :  { %9236 = vmatprep.subr.bf16.mxu1 %v10497_v2 }
0x2104   :  { %8668 = vmatmul.mubr.msk.bf16.gmra.mxu0 %vm310_vm0, %v10485_v11 }
0x2105   :  { %7391 = vmatprep.mubr.bf16.mxu0 %v10897_v49 }
0x2106   :  { %9237 = vmatpush3.bf16.msra.mxu1 %v10498_v60 }
0x2107   :  { %9238 = vmatprep.subr.bf16.mxu1 %v10499_v16 }
0x210a   :  { %9239 = vmatpush3.bf16.msra.mxu1 %v10500_v18 }
0x210b   :  { %9240 = vmatprep.subr.bf16.mxu1 %v10501_v19 }
0x210c   :  { %8669 = vmatmul.mubr.msk.bf16.gmra.mxu0 %vm310_vm0, %v10486_v34 }
0x210d   :  { %7678 = vmatprep.mubr.bf16.mxu0 %v10897_v49 }
0x210e   :  { %9241 = vmatpush3.bf16.msra.mxu1 %v10502_v61 }
0x210f   :  { %9242 = vmatprep.subr.bf16.mxu1 %v10503_v20 }
0x2112   :  { %9243 = vmatpush3.bf16.msra.mxu1 %v10504_v24  ;;  %v10508_v24 = vld [vmem:[%s11075_s8 + $0x1b8] sm:$0xff]  }
0x2113   :  { %9244 = vmatprep.subr.bf16.mxu1 %v10505_v25 }
0x2114   :  { %8729 = vmatmul.mubr.msk.bf16.vlgmr.msra.gmra.mxu0 %vm310_vm0, %v10487_v14 }
0x2115   :  { %7688 = vmatprep.mubr.bf16.mxu0 %v10897_v49 }
0x2116   :  { %9245 = vmatpush3.bf16.msra.mxu1 %v10506_v26 }
0x2117   :  { %9270 = vmatprep.subr.bf16.mxu1 %v10507_v62  ;;  %v10509_v62 = vld [vmem:[%s11075_s8 + $0x1f0] sm:$0xff]  }
0x211c   :  { %8730 = vmatmul.mubr.msk.bf16.gmra.mxu0 %vm310_vm0, %v10488_v23 }
0x211d   :  { %7698 = vmatprep.mubr.bf16.mxu0 %v10897_v49 }
0x2124   :  { %8731 = vmatmul.mubr.msk.bf16.gmra.mxu0 %vm310_vm0, %v10489_v28 }
0x2125   :  { %7708 = vmatprep.mubr.bf16.mxu0 %v10897_v49 }
0x212c   :  { %8732 = vmatmul.mubr.msk.bf16.gmra.mxu0 %vm310_vm0, %v10490_v50  ;;  %v10510_v50 = vld [vmem:[%s11075_s8 + $0x1b0] sm:$0xff]  }
0x2174   :  { %v9166_v35 = vpop.f32.mrf.mxu0  ;;  %v9206_v10 = vpop.f32.mrf.mxu1 }
0x2176   :  { %v9167_v37 = vpop.f32.mrf.mxu0  ;;  %v9207_v21 = vpop.f32.mrf.mxu1 }
0x2177   :  { %v9168_v30 = vadd.f32 %v9167_v37, %v9166_v35  ;;  %v9208_v32 = vadd.f32 %v9207_v21, %v9206_v10  ;;  %v10511_v10 = vld [vmem:[%s11075_s8 + $0x1e8] sm:$0xff]  }
0x2178   :  { %v9169_v17 = vpop.f32.mrf.mxu0  ;;  %v9209_v38 = vpop.f32.mrf.mxu1 }
0x2179   :  { %v12286_v52 = vadd.f32 %v9208_v32, %v9168_v30  ;;  %v10512_v30 = vld [vmem:[%s11075_s8 + $0x1a8] sm:$0xff]  }
0x217a   :  { %v9170_v39 = vpop.f32.mrf.mxu0  ;;  %v9210_v40 = vpop.f32.mrf.mxu1 }
0x217b   :  { %v9171_v41 = vadd.f32 %v9170_v39, %v9169_v17  ;;  %v9211_v33 = vadd.f32 %v9210_v40, %v9209_v38  ;;  %v10513_v38 = vld [vmem:[%s11075_s8 + $0x1e0] sm:$0xff]  }
0x217c   :  { %v9172_v7 = vpop.f32.mrf.mxu0  ;;  %v9212_v63 = vpop.f32.mrf.mxu1  ;;  %v10514_v40 = vld [vmem:[%s11075_s8 + $0x1a0] sm:$0xff]  }
0x217d   :  { %v12288_v49 = vadd.f32 %v9211_v33, %v9171_v41  ;;  %v10515_v33 = vld [vmem:[%s11075_s8 + $0x1d8] sm:$0xff]  }
0x217e   :  { %v9173_v59 = vpop.f32.mrf.mxu0  ;;  %v9213_v42 = vpop.f32.mrf.mxu1 }
0x217f   :  { %v9174_v8 = vadd.f32 %v9173_v59, %v9172_v7  ;;  %v9214_v43 = vadd.f32 %v9213_v42, %v9212_v63  ;;  %v10516_v59 = vld [vmem:[%s11075_s8 + $0x198] sm:$0xff]  }
0x2180   :  { %v9175_v6 = vpop.f32.mrf.mxu0  ;;  %v9215_v45 = vpop.f32.mrf.mxu1 }
0x2181   :  { %v12290_v5 = vadd.f32 %v9214_v43, %v9174_v8  ;;  %v10517_v43 = vld [vmem:[%s11075_s8 + $0x1d0] sm:$0xff]  }
0x2182   :  { %v9176_v46 = vpop.f32.mrf.mxu0  ;;  %v9216_v55 = vpop.f32.mrf.mxu1 }
0x2183   :  { %v9177_v3 = vadd.f32 %v9176_v46, %v9175_v6  ;;  %v9217_v4 = vadd.f32 %v9216_v55, %v9215_v45  ;;  %v10518_v46 = vld [vmem:[%s11075_s8 + $0x190] sm:$0xff]  }
0x2184   :  { %v9178_v48 = vpop.f32.mrf.mxu0  ;;  %v9218_v0 = vpop.f32.mrf.mxu1 }
0x2185   :  { %v12292_v53 = vadd.f32 %v9217_v4, %v9177_v3  ;;  %v10519_v3 = vld [vmem:[%s11075_s8 + $0x1c8] sm:$0xff]  }
0x2186   :  { %v9179_v54 = vpop.f32.mrf.mxu0  ;;  %v9219_v47 = vpop.f32.mrf.mxu1 }
0x2187   :  { %v9180_v1 = vadd.f32 %v9179_v54, %v9178_v48  ;;  %v9220_v44 = vadd.f32 %v9219_v47, %v9218_v0  ;;  %v10520_v48 = vld [vmem:[%s11075_s8 + $0x188] sm:$0xff]   ;;  %v10521_v47 = vld [vmem:[%s11075_s8 + $0x1c0] sm:$0xff]  }
0x2188   :  { %v9181_v31 = vpop.f32.mrf.mxu0  ;;  %v9221_v51 = vpop.f32.mrf.mxu1 }
0x2189   :  { %v12294_v56 = vadd.f32 %v9220_v44, %v9180_v1  ;;  %v10522_v44 = vld [vmem:[%s11075_s8 + $0x180] sm:$0xff]  }
0x218a   :  { %v9182_v57 = vpop.f32.mrf.mxu0  ;;  %v9222_v36 = vpop.f32.mrf.mxu1 }
0x218b   :  { %v9183_v12 = vadd.f32 %v9182_v57, %v9181_v31  ;;  %v9223_v58 = vadd.f32 %v9222_v36, %v9221_v51  ;;  %v10523_v51 = vld [vmem:[%s11075_s8 + $0x278] sm:$0xff]  }
0x218c   :  { %v9184_v11 = vpop.f32.mrf.mxu0  ;;  %v9224_v15 = vpop.f32.mrf.mxu1 }
0x218d   :  { %v12296_v13 = vadd.f32 %v9223_v58, %v9183_v12  ;;  %v10524_v12 = vld [vmem:[%s11075_s8 + $0x238] sm:$0xff]  }
0x218e   :  { %v9185_v22 = vpop.f32.mrf.mxu0  ;;  %v9225_v27 = vpop.f32.mrf.mxu1 }
0x218f   :  { %v9186_v34 = vadd.f32 %v9185_v22, %v9184_v11  ;;  %v9226_v29 = vadd.f32 %v9225_v27, %v9224_v15  ;;  %v10525_v15 = vld [vmem:[%s11075_s8 + $0x270] sm:$0xff]  }
0x2190   :  { %v9187_v9 = vpop.f32.mrf.mxu0  ;;  %v9227_v2 = vpop.f32.mrf.mxu1  ;;  %v10526_v27 = vld [vmem:[%s11075_s8 + $0x230] sm:$0xff]  }
0x2191   :  { %v12298_v60 = vadd.f32 %v9226_v29, %v9186_v34  ;;  %v10527_v29 = vld [vmem:[%s11075_s8 + $0x268] sm:$0xff]  }
0x2192   :  { %v9188_v14 = vpop.f32.mrf.mxu0  ;;  %v9228_v16 = vpop.f32.mrf.mxu1 }
0x2193   :  { %v10528_v14 = vld [vmem:[%s11075_s8 + $0x228] sm:$0xff]  }
0x2194   :  { %v7046_v18 = vpop.f32.mrf.mxu0 }
0x2196   :  { %v7048_v19 = vpop.f32.mrf.mxu0 }
0x2198   :  { %v7050_v61 = vpop.f32.mrf.mxu0 }
0x2199   :  { %v7083_v25 = vpack.c.bf16 %v7050_v61, %v7046_v18 }
0x219a   :  { %v7052_v20 = vpop.f32.mrf.mxu0 }
0x219b   :  { %v7084_v23 = vpack.c.bf16 %v7052_v20, %v7048_v19  ;;  %v10529_v19 = vld [vmem:[%s11075_s8 + $0x260] sm:$0xff]  }
0x219c   :  { %v7056_v26 = vpop.f32.mrf.mxu0  ;;  %v10530_v20 = vld [vmem:[%s11075_s8 + $0x220] sm:$0xff]  }
0x219d   :  { %7252 = vmatprep.mubr.bf16.mxu1 %v7084_v23 }
0x219e   :  { %v7058_v28 = vpop.f32.mrf.mxu0  ;;  %7253 = vmatmul.mubr.bf16.vlgmr.msra.gmra.mxu1 %v7083_v25 }
0x219f   :  { %9271 = vmatpush3.bf16.msra.mxu1 %v10508_v24  ;;  %v10531_v24 = vld [vmem:[%s11075_s8 + $0x258] sm:$0xff]  }
0x21a0   :  { %v7060_v35 = vpop.f32.mrf.mxu0  ;;  %9272 = vmatprep.subr.bf16.mxu1 %v10509_v62  ;;  %v10532_v62 = vld [vmem:[%s11075_s8 + $0x218] sm:$0xff]  }
0x21a1   :  { %v7085_v32 = vpack.c.bf16 %v7060_v35, %v7056_v26  ;;  %v10533_v35 = vld [vmem:[%s11075_s8 + $0x250] sm:$0xff]  }
0x21a2   :  { %v7062_v37 = vpop.f32.mrf.mxu0 }
0x21a3   :  { %v7086_v21 = vpack.c.bf16 %v7062_v37, %v7058_v28  ;;  %9273 = vmatpush3.bf16.msra.mxu1 %v10510_v50 }
0x21a4   :  { %v7066_v17 = vpop.f32.mrf.mxu0  ;;  %9274 = vmatprep.subr.bf16.mxu1 %v10511_v10 }
0x21a5   :  { %7260 = vmatprep.mubr.bf16.mxu1 %v7086_v21  ;;  %v10534_v21 = vld [vmem:[%s11075_s8 + $0x210] sm:$0xff]  }
0x21a6   :  { %v7068_v39 = vpop.f32.mrf.mxu0  ;;  %7261 = vmatmul.mubr.bf16.gmra.mxu1 %v7085_v32  ;;  %v10535_v32 = vld [vmem:[%s11075_s8 + $0x248] sm:$0xff]  }
0x21a7   :  { %9275 = vmatpush3.bf16.msra.mxu1 %v10512_v30 }
0x21a8   :  { %v7070_v41 = vpop.f32.mrf.mxu0  ;;  %9276 = vmatprep.subr.bf16.mxu1 %v10513_v38  ;;  %v10536_v38 = vld [vmem:[%s11075_s8 + $0x208] sm:$0xff]  }
0x21a9   :  { %v7087_v42 = vpack.c.bf16 %v7070_v41, %v7066_v17  ;;  %v10537_v41 = vld [vmem:[%s11075_s8 + $0x240] sm:$0xff]  }
0x21aa   :  { %v7072_v7 = vpop.f32.mrf.mxu0 }
0x21ab   :  { %v7088_v63 = vpack.c.bf16 %v7072_v7, %v7068_v39  ;;  %9277 = vmatpush3.bf16.msra.mxu1 %v10514_v40  ;;  %v10538_v7 = vld [vmem:[%s11075_s8 + $0x200] sm:$0xff]   ;;  %s10898_s8 = smov [#allocation19]  }
0x21ac   :  { %v7076_v8 = vpop.f32.mrf.mxu0  ;;  %9278 = vmatprep.subr.bf16.mxu1 %v10515_v33  ;;  %s8002_s28 = sshll.u32 %s10898_s8, 4  ;;  %s8003_s28 = int_to_ptr.vmem [resolvable:$true] %s8002_s28 }
0x21ad   :  { %7268 = vmatprep.mubr.bf16.mxu1 %v7088_v63  ;;  %v7089_v0 = vpack.c.bf16 %v7076_v8, %v7076_v8  ;;  %s10787_s1 = scalar_lea.vmem %s8003_s28, 32  ;;  %p10792_p9 = scmp.lt.s32.totalorder %s8003_s28, %s8003_s28 }
0x21ae   :  { %v7078_v6 = vpop.f32.mrf.mxu0  ;;  %7269 = vmatmul.mubr.bf16.gmra.mxu1 %v7087_v42  ;;  %p10788_p8 = scmp.ne.s32.totalorder %s8003_s28, %s10787_s1  ;;  %p10793_p10 = scmp.lt.s32.totalorder %s10787_s1, %s10787_s1 }
0x21af   :  { %v7090_v45 = vpack.c.bf16 %v7078_v6, %v7078_v6  ;;  %9279 = vmatpush3.bf16.msra.mxu1 %v10516_v59 }
0x21b0   :  { %v7080_v55 = vpop.f32.mrf.mxu0  ;;  %9280 = vmatprep.subr.bf16.mxu1 %v10517_v43  ;;  %p10794_p11 = por %p10793_p10, %p10792_p9 }
0x21b1   :  { %7276 = vmatprep.mubr.bf16.mxu1 %v7090_v45 }
0x21b2   :  { %v7081_v4 = vpop.f32.mrf.mxu0  ;;  %p10795_p12 = pnand %p10794_p11, %p10788_p8 }
0x21b3   :  { %9281 = vmatpush3.bf16.msra.mxu1 %v10518_v46 }
0x21b4   :  { %v7363_v54 = vpop.f32.mrf.mxu0  ;;  %9282 = vmatprep.subr.bf16.mxu1 %v10519_v3 }
0x21b6   :  { %7277 = vmatmul.mubr.bf16.gmra.mxu1 %v7089_v0  ;;  %v7365_v1 = vpop.f32.mrf.mxu0 }
0x21b7   :  { %9283 = vmatpush3.bf16.msra.mxu1 %v10520_v48 }
0x21b8   :  { %v7367_v31 = vpop.f32.mrf.mxu0  ;;  %9284 = vmatprep.subr.bf16.mxu1 %v10521_v47 }
0x21b9   :  { %v7400_v58 = vpack.c.bf16 %v7367_v31, %v7363_v54 }
0x21ba   :  { %v7369_v57 = vpop.f32.mrf.mxu0 }
0x21bb   :  { %v7401_v36 = vpack.c.bf16 %v7369_v57, %v7365_v1  ;;  %9285 = vmatpush3.bf16.msra.mxu1 %v10522_v44 }
0x21bc   :  { %v7373_v11 = vpop.f32.mrf.mxu0  ;;  %9310 = vmatprep.subr.bf16.mxu1 %v10523_v51 }
0x21bd   :  { %7569 = vmatprep.mubr.bf16.mxu1 %v7401_v36 }
0x21be   :  { %v7375_v22 = vpop.f32.mrf.mxu0  ;;  %7570 = vmatmul.mubr.bf16.vlgmr.msra.gmra.mxu1 %v7400_v58 }
0x21bf   :  { %9311 = vmatpush3.bf16.msra.mxu1 %v10524_v12 }
0x21c0   :  { %v7377_v34 = vpop.f32.mrf.mxu0  ;;  %9312 = vmatprep.subr.bf16.mxu1 %v10525_v15 }
0x21c1   :  { %v7402_v16 = vpack.c.bf16 %v7377_v34, %v7373_v11 }
0x21c2   :  { %v7379_v9 = vpop.f32.mrf.mxu0 }
0x21c3   :  { %v7403_v2 = vpack.c.bf16 %v7379_v9, %v7375_v22  ;;  %9313 = vmatpush3.bf16.msra.mxu1 %v10526_v27 }
0x21c4   :  { %v7383_v18 = vpop.f32.mrf.mxu0  ;;  %9314 = vmatprep.subr.bf16.mxu1 %v10527_v29 }
0x21c5   :  { %7577 = vmatprep.mubr.bf16.mxu1 %v7403_v2 }
0x21c6   :  { %v7385_v61 = vpop.f32.mrf.mxu0  ;;  %7578 = vmatmul.mubr.bf16.gmra.mxu1 %v7402_v16 }
0x21c7   :  { %9315 = vmatpush3.bf16.msra.mxu1 %v10528_v14 }
0x21c8   :  { %v7387_v23 = vpop.f32.mrf.mxu0  ;;  %9316 = vmatprep.subr.bf16.mxu1 %v10529_v19 }
0x21c9   :  { %v7404_v28 = vpack.c.bf16 %v7387_v23, %v7383_v18 }
0x21ca   :  { %v7389_v25 = vpop.f32.mrf.mxu0 }
0x21cb   :  { %v7405_v26 = vpack.c.bf16 %v7389_v25, %v7385_v61  ;;  %9317 = vmatpush3.bf16.msra.mxu1 %v10530_v20 }
0x21cc   :  { %v7393_v50 = vpop.f32.mrf.mxu0  ;;  %9318 = vmatprep.subr.bf16.mxu1 %v10531_v24 }
0x21cd   :  { %7585 = vmatprep.mubr.bf16.mxu1 %v7405_v26  ;;  %v7406_v39 = vpack.c.bf16 %v7393_v50, %v7393_v50 }
0x21ce   :  { %v7395_v10 = vpop.f32.mrf.mxu0  ;;  %7586 = vmatmul.mubr.bf16.gmra.mxu1 %v7404_v28 }
0x21cf   :  { %v7407_v37 = vpack.c.bf16 %v7395_v10, %v7395_v10  ;;  %9319 = vmatpush3.bf16.msra.mxu1 %v10532_v62 }
0x21d0   :  { %v7397_v30 = vpop.f32.mrf.mxu0  ;;  %9320 = vmatprep.subr.bf16.mxu1 %v10533_v35 }
0x21d1   :  { %7593 = vmatprep.mubr.bf16.mxu1 %v7407_v37 }
0x21d2   :  { %v7398_v17 = vpop.f32.mrf.mxu0 }
0x21d3   :  { %9321 = vmatpush3.bf16.msra.mxu1 %v10534_v21 }
0x21d4   :  { %v7680_v40 = vpop.f32.mrf.mxu0  ;;  %9322 = vmatprep.subr.bf16.mxu1 %v10535_v32 }
0x21d6   :  { %7594 = vmatmul.mubr.bf16.gmra.mxu1 %v7406_v39  ;;  %v7682_v33 = vpop.f32.mrf.mxu0 }
0x21d7   :  { %9323 = vmatpush3.bf16.msra.mxu1 %v10536_v38 }
0x21d8   :  { %v7684_v63 = vpop.f32.mrf.mxu0  ;;  %9324 = vmatprep.subr.bf16.mxu1 %v10537_v41 }
0x21d9   :  { %v7717_v8 = vpack.c.bf16 %v7684_v63, %v7680_v40 }
0x21da   :  { %v7686_v59 = vpop.f32.mrf.mxu0 }
0x21db   :  { %v7718_v42 = vpack.c.bf16 %v7686_v59, %v7682_v33  ;;  %9325 = vmatpush3.bf16.msra.mxu1 %v10538_v7 }
0x21dc   :  { %v7690_v43 = vpop.f32.mrf.mxu0 }
0x21dd   :  { %7886 = vmatprep.mubr.bf16.mxu1 %v7718_v42 }
0x21de   :  { %v7692_v6 = vpop.f32.mrf.mxu0  ;;  %7887 = vmatmul.mubr.bf16.vlgmr.msra.gmra.mxu1 %v7717_v8 }
0x21e0   :  { %v7694_v45 = vpop.f32.mrf.mxu0 }
0x21e1   :  { %v7719_v3 = vpack.c.bf16 %v7694_v45, %v7690_v43 }
0x21e2   :  { %v7696_v46 = vpop.f32.mrf.mxu0 }
0x21e3   :  { %v7720_v55 = vpack.c.bf16 %v7696_v46, %v7692_v6 }
0x21e4   :  { %v7700_v4 = vpop.f32.mrf.mxu0 }
0x21e5   :  { %7894 = vmatprep.mubr.bf16.mxu1 %v7720_v55 }
0x21e6   :  { %v7702_v48 = vpop.f32.mrf.mxu0  ;;  %7895 = vmatmul.mubr.bf16.gmra.mxu1 %v7719_v3 }
0x21e8   :  { %v7704_v0 = vpop.f32.mrf.mxu0 }
0x21e9   :  { %v7721_v1 = vpack.c.bf16 %v7704_v0, %v7700_v4 }
0x21ea   :  { %v7706_v54 = vpop.f32.mrf.mxu0 }
0x21eb   :  { %v7722_v47 = vpack.c.bf16 %v7706_v54, %v7702_v48 }
0x21ec   :  { %v7710_v44 = vpop.f32.mrf.mxu0 }
0x21ed   :  { %7902 = vmatprep.mubr.bf16.mxu1 %v7722_v47  ;;  %v7723_v12 = vpack.c.bf16 %v7710_v44, %v7710_v44 }
0x21ee   :  { %7903 = vmatmul.mubr.bf16.gmra.mxu1 %v7721_v1  ;;  %v7712_v31 = vpop.f32.mrf.mxu0 }
0x21ef   :  { %v7724_v51 = vpack.c.bf16 %v7712_v31, %v7712_v31 }
0x21f0   :  { %v7714_v57 = vpop.f32.mrf.mxu0 }
0x21f1   :  { %7910 = vmatprep.mubr.bf16.mxu1 %v7724_v51 }
0x21f2   :  { %v7715_v36 = vpop.f32.mrf.mxu0 }
0x21f6   :  { %7911 = vmatmul.mubr.bf16.gmra.mxu1 %v7723_v12 }
0x225e   :  { %v9246_v58 = vpop.f32.mrf.mxu1 }
0x2260   :  { %v9247_v11 = vpop.f32.mrf.mxu1 }
0x2262   :  { %v9249_v15 = vpop.f32.mrf.mxu1 }
0x2264   :  { %v9250_v22 = vpop.f32.mrf.mxu1 }
0x2266   :  { %v9252_v27 = vpop.f32.mrf.mxu1 }
0x2268   :  { %v9253_v34 = vpop.f32.mrf.mxu1 }
0x2269   :  { %10798 = shalt.err (!%p10795_p12)
}
0x226a   :  { %8005 = dma.vmem_to_hbm [thread:$0]  %s8003_s28, 32, %s11085_s24, [#allocation4]   ;;  %v9255_v29 = vpop.f32.mrf.mxu1  ;;  %v9248_v40 = vadd.f32 %v9247_v11, %v9246_v58  ;;  %v9251_v59 = vadd.f32 %v9250_v22, %v9249_v15  ;;  %v9254_v45 = vadd.f32 %v9253_v34, %v9252_v27  ;;  %v12346_v46 = vld [vmem:[%s11080_s30] ss:$0 sm:$0xff]  ;;  %vm7988_vm12 = vcmask 228352  }
0x226b   :  { %s10899_s24 = smov [#allocation20]  }
0x226c   :  { %v9256_v9 = vpop.f32.mrf.mxu1  ;;  %v7284_v63 = vadd.f32 %v9248_v40, %v12286_v52  ;;  %v7285_v3 = vadd.f32 %v9251_v59, %v12288_v49  ;;  %v7286_v52 = vadd.f32 %v9254_v45, %v12290_v5  ;;  %s8011_s30 = sshll.u32 %s10899_s24, 4  ;;  %s8012_s30 = int_to_ptr.vmem [resolvable:$true] %s8011_s30 }
0x226d   :  { %v9257_v31 = vadd.f32 %v9256_v9, %v9255_v29  ;;  %s10807_s2 = scalar_lea.vmem %s8012_s30, 896  ;;  %p10812_p0 = scmp.lt.s32.totalorder %s8012_s30, %s8012_s30 }
0x226e   :  { %v9258_v2 = vpop.f32.mrf.mxu1  ;;  %p10808_p13 = scmp.ne.s32.totalorder %s8012_s30, %s10807_s2  ;;  %p10813_p1 = scmp.lt.s32.totalorder %s10807_s2, %s10807_s2 }
0x226f   :  { %v7287_v34 = vadd.f32 %v9257_v31, %v12292_v53 }
0x2270   :  { %v9259_v14 = vpop.f32.mrf.mxu1  ;;  %p10814_p2 = por %p10813_p1, %p10812_p0 }
0x2271   :  { %v9260_v22 = vadd.f32 %v9259_v14, %v9258_v2 }
0x2272   :  { %v12332_v16 = vpop.f32.mrf.mxu1  ;;  %p10815_p3 = pnand %p10814_p2, %p10808_p13 }
0x2274   :  { %v12334_v18 = vpop.f32.mrf.mxu1 }
0x2276   :  { %v12336_v19 = vpop.f32.mrf.mxu1 }
0x2278   :  { %v12338_v61 = vpop.f32.mrf.mxu1 }
0x2279   :  { %v9266_v40 = vadd.f32 %v12338_v61, %v12336_v19 }
0x227a   :  { %v9267_v20 = vpop.f32.mrf.mxu1 }
0x227c   :  { %v9268_v23 = vpop.f32.mrf.mxu1 }
0x227e   :  { %v9286_v24 = vpop.f32.mrf.mxu1 }
0x2280   :  { %v9287_v25 = vpop.f32.mrf.mxu1 }
0x2281   :  { %v9288_v33 = vadd.f32 %v9287_v25, %v9286_v24 }
0x2282   :  { %v9289_v26 = vpop.f32.mrf.mxu1 }
0x2283   :  { %v7601_v8 = vadd.f32 %v9288_v33, %v7284_v63 }
0x2284   :  { %v9290_v62 = vpop.f32.mrf.mxu1 }
0x2285   :  { %v9291_v43 = vadd.f32 %v9290_v62, %v9289_v26  ;;  %v7288_v62 = vadd.f32 %v9260_v22, %v12294_v56 }
0x2286   :  { %v9292_v28 = vpop.f32.mrf.mxu1 }
0x2287   :  { %v7602_v54 = vadd.f32 %v9291_v43, %v7285_v3 }
0x2288   :  { %v9293_v50 = vpop.f32.mrf.mxu1 }
0x2289   :  { %v9294_v48 = vadd.f32 %v9293_v50, %v9292_v28  ;;  %v9263_v50 = vadd.f32 %v12334_v18, %v12332_v16 }
0x228a   :  { %v9295_v35 = vpop.f32.mrf.mxu1 }
0x228b   :  { %v7603_v36 = vadd.f32 %v9294_v48, %v7286_v52  ;;  %v7289_v56 = vadd.f32 %v9263_v50, %v12296_v13 }
0x228c   :  { %v9296_v10 = vpop.f32.mrf.mxu1 }
0x228d   :  { %v9297_v58 = vadd.f32 %v9296_v10, %v9295_v35 }
0x228e   :  { %v9298_v37 = vpop.f32.mrf.mxu1 }
0x228f   :  { %v7604_v25 = vadd.f32 %v9297_v58, %v7287_v34 }
0x2290   :  { %v9299_v21 = vpop.f32.mrf.mxu1 }
0x2291   :  { %v9300_v24 = vadd.f32 %v9299_v21, %v9298_v37 }
0x2292   :  { %v9301_v30 = vpop.f32.mrf.mxu1 }
0x2293   :  { %v7605_v53 = vadd.f32 %v9300_v24, %v7288_v62 }
0x2294   :  { %v9302_v32 = vpop.f32.mrf.mxu1 }
0x2295   :  { %v9303_v10 = vadd.f32 %v9302_v32, %v9301_v30 }
0x2296   :  { %v12340_v17 = vpop.f32.mrf.mxu1 }
0x2297   :  { %v7606_v63 = vadd.f32 %v9303_v10, %v7289_v56 }
0x2298   :  { %v12342_v38 = vpop.f32.mrf.mxu1 }
0x2299   :  { %v9306_v16 = vadd.f32 %v12342_v38, %v12340_v17 }
0x229a   :  { %v9307_v39 = vpop.f32.mrf.mxu1 }
0x229c   :  { %v9308_v41 = vpop.f32.mrf.mxu1 }
0x229e   :  { %v9326_v7 = vpop.f32.mrf.mxu1 }
0x22a0   :  { %v9327_v42 = vpop.f32.mrf.mxu1 }
0x22a1   :  { %v9328_v6 = vadd.f32 %v9327_v42, %v9326_v7  ;;  %v7290_v42 = vadd.f32 %v9266_v40, %v12298_v60 }
0x22a2   :  { %v9329_v55 = vpop.f32.mrf.mxu1 }
0x22a3   :  { %v7918_v4 = vadd.f32 %v9328_v6, %v7601_v8  ;;  %v7607_v13 = vadd.f32 %v9306_v16, %v7290_v42 }
0x22a4   :  { %v9330_v0 = vpop.f32.mrf.mxu1 }
0x22a5   :  { %v7932_v47 = vadd.f32 %v12346_v46, %v7918_v4  ;;  %v9331_v1 = vadd.f32 %v9330_v0, %v9329_v55 }
0x22a6   :  { %v9332_v44 = vpop.f32.mrf.mxu1 }
0x22a7   :  { %v7939_v51 = vsub.f32 0.0, %v7932_v47  ;;  %v7919_v57 = vadd.f32 %v9331_v1, %v7602_v54 }
0x22a8   :  { %v9333_v12 = vpop.f32.mrf.mxu1 }
0x22a9   :  { %v7946_v11 = vmul.f32 1.442695, %v7939_v51  ;;  %v7933_v15 = vadd.f32 %v12346_v46, %v7919_v57  ;;  %v9334_v49 = vadd.f32 %v9333_v12, %v9332_v44 }
0x22aa   :  { %v9335_v27 = vpop.f32.mrf.mxu1 }
0x22ab   :  { %10559 = vpow2.f32 %v7946_v11  ;;  %v7940_v20 = vsub.f32 0.0, %v7933_v15  ;;  %v7920_v23 = vadd.f32 %v9334_v49, %v7603_v36 }
0x22ac   :  { %v9336_v5 = vpop.f32.mrf.mxu1 }
0x22ad   :  { %v7948_v29 = vmul.f32 1.442695, %v7940_v20  ;;  %v7934_v9 = vadd.f32 %v12346_v46, %v7920_v23  ;;  %v9337_v26 = vadd.f32 %v9336_v5, %v9335_v27 }
0x22ae   :  { %v9338_v28 = vpop.f32.mrf.mxu1 }
0x22af   :  { %10561 = vpow2.f32 %v7948_v29  ;;  %v7941_v2 = vsub.f32 0.0, %v7934_v9  ;;  %v7921_v14 = vadd.f32 %v9337_v26, %v7604_v25 }
0x22b0   :  { %v9339_v35 = vpop.f32.mrf.mxu1 }
0x22b1   :  { %v7950_v39 = vmul.f32 1.442695, %v7941_v2  ;;  %v7935_v37 = vadd.f32 %v12346_v46, %v7921_v14  ;;  %v9340_v21 = vadd.f32 %v9339_v35, %v9338_v28 }
0x22b2   :  { %v9341_v41 = vpop.f32.mrf.mxu1 }
0x22b3   :  { %10563 = vpow2.f32 %v7950_v39  ;;  %v7942_v33 = vsub.f32 0.0, %v7935_v37  ;;  %v7922_v7 = vadd.f32 %v9340_v21, %v7605_v53 }
0x22b4   :  { %v9342_v18 = vpop.f32.mrf.mxu1 }
0x22b5   :  { %v7952_v59 = vmul.f32 1.442695, %v7942_v33  ;;  %v7936_v30 = vadd.f32 %v12346_v46, %v7922_v7  ;;  %v9343_v32 = vadd.f32 %v9342_v18, %v9341_v41 }
0x22b6   :  { %v9344_v8 = vpop.f32.mrf.mxu1 }
0x22b7   :  { %10565 = vpow2.f32 %v7952_v59  ;;  %v7943_v19 = vsub.f32 0.0, %v7936_v30  ;;  %v7923_v61 = vadd.f32 %v9343_v32, %v7606_v63 }
0x22b8   :  { %v10560_v43 = vpop.eup %10559  ;;  %v9345_v6 = vpop.f32.mrf.mxu1 }
0x22b9   :  { %v7960_v45 = vadd.f32 1.0, %v10560_v43  ;;  %v7954_v55 = vmul.f32 1.442695, %v7943_v19  ;;  %v7937_v3 = vadd.f32 %v12346_v46, %v7923_v61  ;;  %v9346_v17 = vadd.f32 %v9345_v6, %v9344_v8 }
0x22ba   :  { %v9347_v38 = vpop.f32.mrf.mxu1 }
0x22bb   :  { %10567 = vrcp.f32 %v7960_v45  ;;  %v7944_v4 = vsub.f32 0.0, %v7937_v3  ;;  %v7924_v48 = vadd.f32 %v9346_v17, %v7607_v13 }
0x22bc   :  { %v10562_v0 = vpop.eup %10561  ;;  %10569 = vpow2.f32 %v7954_v55  ;;  %v9348_v54 = vpop.f32.mrf.mxu1 }
0x22bd   :  { %v7961_v60 = vadd.f32 1.0, %v10562_v0  ;;  %v7956_v47 = vmul.f32 1.442695, %v7944_v4  ;;  %v7938_v1 = vadd.f32 %v12346_v46, %v7924_v48 }
0x22bf   :  { %10571 = vrcp.f32 %v7961_v60  ;;  %v7945_v52 = vsub.f32 0.0, %v7938_v1 }
0x22c0   :  { %v10564_v44 = vpop.eup %10563  ;;  %10573 = vpow2.f32 %v7956_v47 }
0x22c1   :  { %v7962_v31 = vadd.f32 1.0, %v10564_v44  ;;  %v7958_v51 = vmul.f32 1.442695, %v7945_v52 }
0x22c3   :  { %10575 = vrcp.f32 %v7962_v31 }
0x22c4   :  { %v10566_v57 = vpop.eup %10565  ;;  %10577 = vpow2.f32 %v7958_v51 }
0x22c5   :  { %v7963_v36 = vadd.f32 1.0, %v10566_v57 }
0x22c7   :  { %10579 = vrcp.f32 %v7963_v36 }
0x22c8   :  { %v10568_v12 = vpop.eup %10567 }
0x22c9   :  { %v10570_v58 = vpop.eup %10569  ;;  %v7974_v11 = vmax.f32 %v10568_v12, 0.0 }
0x22ca   :  { %v7964_v15 = vadd.f32 1.0, %v10570_v58 }
0x22cb   :  { %v7981_v49 = vmin.f32 %v7974_v11, 1.0 }
0x22cc   :  { %v10572_v22 = vpop.eup %10571  ;;  %10581 = vrcp.f32 %v7964_v15 }
0x22cd   :  { %v10574_v46 = vpop.eup %10573  ;;  %7989 = vst.msk [vmem:[#allocation20] sm:$0xff] %vm7988_vm12, %v7981_v49  ;;  %v7975_v27 = vmax.f32 %v10572_v22, 0.0 }
0x22ce   :  { %v7965_v34 = vadd.f32 1.0, %v10574_v46 }
0x22cf   :  { %v7982_v20 = vmin.f32 %v7975_v27, 1.0 }
0x22d0   :  { %v10576_v23 = vpop.eup %10575  ;;  %10583 = vrcp.f32 %v7965_v34 }
0x22d1   :  { %v10578_v24 = vpop.eup %10577  ;;  %7990 = vst.msk [vmem:[#allocation20 + $0x8] sm:$0xff] %vm7988_vm12, %v7982_v20  ;;  %v7976_v5 = vmax.f32 %v10576_v23, 0.0 }
0x22d2   :  { %v7966_v25 = vadd.f32 1.0, %v10578_v24 }
0x22d3   :  { %v7983_v29 = vmin.f32 %v7976_v5, 1.0 }
0x22d4   :  { %v10580_v9 = vpop.eup %10579  ;;  %10585 = vrcp.f32 %v7966_v25 }
0x22d5   :  { %7991 = vst.msk [vmem:[#allocation20 + $0x10] sm:$0xff] %vm7988_vm12, %v7983_v29  ;;  %v7977_v26 = vmax.f32 %v10580_v9, 0.0 }
0x22d7   :  { %v7984_v62 = vmin.f32 %v7977_v26, 1.0 }
0x22d9   :  { %v10582_v28 = vpop.eup %10581  ;;  %7992 = vst.msk [vmem:[#allocation20 + $0x18] sm:$0xff] %vm7988_vm12, %v7984_v62 }
0x22da   :  { %v7978_v50 = vmax.f32 %v10582_v28, 0.0 }
0x22dc   :  { %v7985_v2 = vmin.f32 %v7978_v50, 1.0 }
0x22dd   :  { %v10584_v14 = vpop.eup %10583 }
0x22de   :  { %7993 = vst.msk [vmem:[#allocation20 + $0x20] sm:$0xff] %vm7988_vm12, %v7985_v2  ;;  %v7979_v53 = vmax.f32 %v10584_v14, 0.0 }
0x22e0   :  { %v7986_v35 = vmin.f32 %v7979_v53, 1.0 }
0x22e1   :  { %v10586_v10 = vpop.eup %10585 }
0x22e2   :  { %7994 = vst.msk [vmem:[#allocation20 + $0x28] sm:$0xff] %vm7988_vm12, %v7986_v35  ;;  %v7980_v39 = vmax.f32 %v10586_v10, 0.0 }
0x22e4   :  { %v7987_v37 = vmin.f32 %v7980_v39, 1.0 }
0x22e6   :  { %7995 = vst.msk [vmem:[#allocation20 + $0x30] sm:$0xff] %vm7988_vm12, %v7987_v37 }
0x22e7   :  { %10818 = shalt.err (!%p10815_p3)
}
0x22e8   :  { %s10900_s21 = smov 128   ;;  %s10901_s19 = smov 8  }
0x22e9   :  { %8017 = dma.vmem_to_hbm [thread:$0]  %s8012_s30, 896, %s11090_s14, [#allocation21], %s10900_s21, %s10900_s21, %s10901_s19  }
0x22ea   :  { %10839 = dma.done.wait [#allocation4], 32  }
0x22eb   :  { %10840 = vsyncadd [#allocation4], 4294967264 }
0x22ec   :  { %10841 = dma.done.wait [#allocation21], 896  }
0x22ed   :  { %10842 = vsyncadd [#allocation21], 4294966400 }
0x22ee   :  { %8024 = vsyncpa [#allocation3], 1 }
0x22ef   :  { %8025 = vsyncpa [#allocation6], 1 }
0x22f0   :  { %8026 = vsyncpa [#allocation9], 1 }
0x22f1   :  { %8027 = vsyncpa [#allocation12], 1 }
0x22f2   :  { %8028 = vsyncpa [#allocation15], 1 }
0x22f3   :  { %8029 = vsyncpa [#allocation18], 1 }
0x22f4   :  { %8030 = vsyncpa [#allocation4], 1 }
0x22f5   :  { %8031 = vsyncpa [#allocation21], 1 }

</bundles_post_ra>
